<compile_context>
chip_gen: v7x
topology: tpu7x:2x2x1
jax: 0.10.0
libtpu: 0.0.40
codegen_flags: <defaults>
</compile_context>

<pallas_src>
import functools
import math

import jax
import jax.numpy as jnp
from jax.experimental import pallas as pl
from jax.experimental.pallas import tpu as pltpu


IN_FEATURES = 34 * 34 * 2          # 2312, fixed by the module
CIN_PAD = 19 * 128                 # 2432: ragged K axis padded to a lane multiple
NEURON = dict(threshold=1.25, current_decay=0.25, voltage_decay=0.03)
# Dropout(p=0.05) on the first blocks is train-only -> no-op in this forward pass.

F0, F1, FH, FL = 512, 512, 256, 128
# F0 : Dense(2312->512) width
# F1 : Dense(512->512) width
# FH : fused heads width: cols [0:128] = label Dense(512->128),
#                         cols [128:131] = task Dense(512->3), rest zero
# FL : label Dense(128->14), lane-padded to 128


def _round_up(x, m):
    return (x + m - 1) // m * m


def _pick_time_block(t, n, rows_target=128, tb_cap=32):
    """Timesteps per grid block: ~rows_target rows per block, tb*n % 8 == 0."""
    g = 8 // math.gcd(8, n)                      # smallest tb granule for sublane alignment
    tb = max(1, min(rows_target // max(n, 1), tb_cap, t))
    tb = _round_up(tb, g)
    return tb, _round_up(t, tb)


# ---------------------------------------------------------------------------
# CUBA-LIF scan over the tb timesteps of the current block (VPU only).
# z_ref[:, :width] holds the synaptic drive; row block [i*n : i*n+n] is step i.
# dst_ref receives the *delayed* spike (slayer delay_shift=True): step i emits
# the spike computed at step i-1 (zeros at global t == 0).  State is carried as
# fori_loop register values and written back to st_ref once per block so it
# persists across grid steps.
# ---------------------------------------------------------------------------
def _cuba_scan(z_ref, width, dst_ref, st_ref, *, tb, n, cur_keep, vol_keep, thr):
    def step(i, carry):
        cur, vol, spk = carry
        r = i * n
        dst_ref[pl.ds(r, n), :] = spk.astype(dst_ref.dtype)   # delayed output
        z = z_ref[pl.ds(r, n), :width]
        cur = cur_keep * cur + z
        vol = vol_keep * vol + cur
        s = (vol >= thr).astype(jnp.float32)
        vol = vol * (1.0 - s)                                  # hard reset (Loihi CUBA)
        return cur, vol, s

    cur, vol, spk = jax.lax.fori_loop(
        0, tb, step, (st_ref[0], st_ref[1], st_ref[2]), unroll=True)
    st_ref[0] = cur
    st_ref[1] = vol
    st_ref[2] = spk


# ---------------------------------------------------------------------------
# Fused whole-network kernel: per grid step (one block of tb timesteps) do
# matmul + CUBA scan for each of the four layers back-to-back; weights stay
# resident in VMEM, only bf16 label/task spikes are written to HBM.
# TODO(synk): v7x dual-TensorCore batch split (parallel leading grid axis with
# per-chunk state scratch) not implemented; time axis must stay sequential.
# ---------------------------------------------------------------------------
def _network_kernel(x_ref, w0_ref, w1_ref, w2_ref, w3_ref,
                    lbl_ref, tsk_ref,
                    z_ref, s0_ref, s1_ref, s2_ref,
                    st0_ref, st1_ref, st2_ref, st3_ref,
                    *, tb, n, cur_keep, vol_keep, thr):
    @pl.when(pl.program_id(0) == 0)
    def _():
        st0_ref[...] = jnp.zeros_like(st0_ref)
        st1_ref[...] = jnp.zeros_like(st1_ref)
        st2_ref[...] = jnp.zeros_like(st2_ref)
        st3_ref[...] = jnp.zeros_like(st3_ref)

    scan = functools.partial(_cuba_scan, tb=tb, n=n,
                             cur_keep=cur_keep, vol_keep=vol_keep, thr=thr)

    # feature block 0: Dense(2312->512) + CUBA (+ 1-step delay_shift)
    z_ref[...] = jnp.dot(x_ref[...], w0_ref[...],
                         preferred_element_type=jnp.float32)
    scan(z_ref, F0, s0_ref, st0_ref)

    # feature block 1: Dense(512->512) + CUBA
    z_ref[...] = jnp.dot(s0_ref[...], w1_ref[...],
                         preferred_element_type=jnp.float32)
    scan(z_ref, F1, s1_ref, st1_ref)

    # fused heads: label Dense(512->128) | task Dense(512->3, lane-padded) + CUBA
    z_ref[:, :FH] = jnp.dot(s1_ref[...], w2_ref[...],
                            preferred_element_type=jnp.float32)
    scan(z_ref, FH, s2_ref, st2_ref)
    tsk_ref[...] = s2_ref[:, 128:256]            # task spikes live in cols [128:131]

    # label head: Dense(128->14, lane-padded to 128) + CUBA
    z_ref[:, :FL] = jnp.dot(s2_ref[:, :128], w3_ref[...],
                            preferred_element_type=jnp.float32)
    scan(z_ref, FL, lbl_ref, st3_ref)


# ---------------------------------------------------------------------------
# Parameter construction (deterministic, in-script).
# torch.nn.utils.weight_norm with dim=0 at init: w = g * v / ||v||, g = ||v||  ==  v
# ---------------------------------------------------------------------------
def make_weight(key, out_f, in_f):
    v = jax.random.normal(key, (out_f, in_f), dtype=jnp.float32) / jnp.sqrt(in_f)
    return v
    # TODO(synk): slayer pre_hook_fx fixed-point weight/decay quantization omitted.


def make_params(key):
    k0, k1, k2, k3, k4 = jax.random.split(key, 5)
    fe0 = make_weight(k0, 512, IN_FEATURES)      # (512, 2312)
    fe1 = make_weight(k1, 512, 512)
    lc0 = make_weight(k2, 128, 512)
    lc1 = make_weight(k3, 14, 128)
    lt0 = make_weight(k4, 3, 512)

    # Pre-transpose to (Cin, Cout), zero-pad ragged dims to lane multiples, bf16.
    # (spikes are exact 0/1 in bf16; weight rounding to bf16 can flip threshold
    #  crossings vs an f32 reference -- acceptable for this forward pass.)
    fe0_t = jnp.zeros((CIN_PAD, F0), jnp.float32).at[:IN_FEATURES, :].set(fe0.T)
    heads = jnp.zeros((F1, FH), jnp.float32)
    heads = heads.at[:, :128].set(lc0.T)
    heads = heads.at[:, 128:131].set(lt0.T)
    lc1_t = jnp.zeros((128, FL), jnp.float32).at[:, :14].set(lc1.T)

    return {
        "fe0": fe0_t.astype(jnp.bfloat16),
        "fe1": fe1.T.astype(jnp.bfloat16),
        "heads": heads.astype(jnp.bfloat16),
        "lc1": lc1_t.astype(jnp.bfloat16),
    }


def network_forward(spike_nct, params):
    """spike_nct: (N, 2312, T) float spikes (PyTorch NCT).  Returns (label, task) in NCT."""
    N, Cin, T = spike_nct.shape
    tb, T_pad = _pick_time_block(T, N)
    m_blk = tb * N

    # one relayout pass: NCT -> time-major rows (T*N, Cin), bf16; then a single
    # pad covering both the ragged K axis (2312 -> 2432) and the time tail.
    x = jnp.transpose(spike_nct, (2, 0, 1)).astype(jnp.bfloat16).reshape(T * N, Cin)
    x = jnp.pad(x, ((0, (T_pad - T) * N), (0, CIN_PAD - Cin)))

    flops = 2 * T_pad * N * (CIN_PAD * F0 + F0 * F1 + F1 * FH + 128 * FL)
    bytes_accessed = (int(x.size) + sum(int(p.size) for p in params.values())
                      + 2 * T_pad * N * 128) * 2

    kernel = functools.partial(
        _network_kernel, tb=tb, n=N,
        cur_keep=1.0 - float(NEURON["current_decay"]),
        vol_keep=1.0 - float(NEURON["voltage_decay"]),
        thr=float(NEURON["threshold"]))

    lbl, tsk = pl.pallas_call(
        kernel,
        out_shape=(jax.ShapeDtypeStruct((T_pad * N, 128), jnp.bfloat16),
                   jax.ShapeDtypeStruct((T_pad * N, 128), jnp.bfloat16)),
        grid_spec=pltpu.PrefetchScalarGridSpec(
            num_scalar_prefetch=0,
            grid=(T_pad // tb,),
            in_specs=[
                pl.BlockSpec((m_blk, CIN_PAD), lambda t: (t, 0)),
                pl.BlockSpec((CIN_PAD, F0), lambda t: (0, 0)),   # weights stay resident
                pl.BlockSpec((F0, F1), lambda t: (0, 0)),
                pl.BlockSpec((F1, FH), lambda t: (0, 0)),
                pl.BlockSpec((128, FL), lambda t: (0, 0)),
            ],
            out_specs=[
                pl.BlockSpec((m_blk, 128), lambda t: (t, 0)),    # label spikes (padded 14->128)
                pl.BlockSpec((m_blk, 128), lambda t: (t, 0)),    # task spikes (padded 3->128)
            ],
            scratch_shapes=[
                pltpu.VMEM((m_blk, F0), jnp.float32),    # synaptic drive (reused by all layers)
                pltpu.VMEM((m_blk, F0), jnp.bfloat16),   # fe0 spikes
                pltpu.VMEM((m_blk, F1), jnp.bfloat16),   # fe1 spikes
                pltpu.VMEM((m_blk, FH), jnp.bfloat16),   # heads spikes
                pltpu.VMEM((3, N, F0), jnp.float32),     # fe0   (cur, vol, prev-spike)
                pltpu.VMEM((3, N, F1), jnp.float32),     # fe1   state
                pltpu.VMEM((3, N, FH), jnp.float32),     # heads state
                pltpu.VMEM((3, N, FL), jnp.float32),     # lc1   state
            ],
        ),
        compiler_params=pltpu.CompilerParams(
            dimension_semantics=("arbitrary",),          # time recurrence is sequential
            vmem_limit_bytes=32 * 1024 * 1024),
        cost_estimate=pl.CostEstimate(flops=flops, transcendentals=0,
                                      bytes_accessed=bytes_accessed),
    )(x, params["fe0"], params["fe1"], params["heads"], params["lc1"])

    lbl = lbl[:T * N, :14].reshape(T, N, 14)
    tsk = tsk[:T * N, :3].reshape(T, N, 3)
    # TODO(synk): learnable per-neuron Delay (delay=True) is zero-initialized in
    # slayer, hence a no-op at init; fractional per-neuron delays not implemented.

    # back to PyTorch NCT layout
    return (jnp.transpose(lbl, (1, 2, 0)).astype(jnp.float32),
            jnp.transpose(tsk, (1, 2, 0)).astype(jnp.float32))


if __name__ == "__main__":
    key = jax.random.PRNGKey(0)
    k_in, k_p = jax.random.split(key)

    N, T = 2, 8                    # small batch / time for the smoke test
    params = make_params(k_p)

    # binary input spike train, NCT layout like PyTorch/slayer
    spike_in = jax.random.bernoulli(
        k_in, p=0.3, shape=(N, IN_FEATURES, T)).astype(jnp.float32)

    spike_label, spike_task = jax.block_until_ready(
        jax.jit(network_forward)(spike_in, params))

    assert spike_label.shape == (N, 14, T)
    assert spike_task.shape == (N, 3, T)
    assert spike_label.dtype == jnp.float32 and spike_task.dtype == jnp.float32
    print("KERNEL_OK")
</pallas_src>

<mosaic_0001>
module attributes {stable_mosaic.version = 11 : i64} {
  func.func @_network_kernel(%arg0: i32, %arg1: memref<16x2432xbf16, #tpu.memory_space<vmem>>, %arg2: memref<2432x512xbf16, #tpu.memory_space<vmem>>, %arg3: memref<512x512xbf16, #tpu.memory_space<vmem>>, %arg4: memref<512x256xbf16, #tpu.memory_space<vmem>>, %arg5: memref<128x128xbf16, #tpu.memory_space<vmem>>, %arg6: memref<16x128xbf16, #tpu.memory_space<vmem>>, %arg7: memref<16x128xbf16, #tpu.memory_space<vmem>>, %arg8: memref<16x512xf32, #tpu.memory_space<vmem>>, %arg9: memref<16x512xbf16, #tpu.memory_space<vmem>>, %arg10: memref<16x512xbf16, #tpu.memory_space<vmem>>, %arg11: memref<16x256xbf16, #tpu.memory_space<vmem>>, %arg12: memref<3x2x512xf32, #tpu.memory_space<vmem>>, %arg13: memref<3x2x512xf32, #tpu.memory_space<vmem>>, %arg14: memref<3x2x256xf32, #tpu.memory_space<vmem>>, %arg15: memref<3x2x128xf32, #tpu.memory_space<vmem>>) attributes {dimension_semantics = [#tpu.dimension_semantics<arbitrary>], iteration_bounds = array<i64: 1>, scalar_prefetch = 0 : i64, scratch_operands = 8 : i64, tpu.core_type = #tpu.core_type<tc>, window_params = [{transform_indices = @transform_0, window_bounds = array<i64: 16, 2432>}, {pipeline_mode = #tpu.pipeline_mode<synchronous>, transform_indices = @transform_1, window_bounds = array<i64: 2432, 512>}, {pipeline_mode = #tpu.pipeline_mode<synchronous>, transform_indices = @transform_2, window_bounds = array<i64: 512, 512>}, {pipeline_mode = #tpu.pipeline_mode<synchronous>, transform_indices = @transform_3, window_bounds = array<i64: 512, 256>}, {pipeline_mode = #tpu.pipeline_mode<synchronous>, transform_indices = @transform_4, window_bounds = array<i64: 128, 128>}, {transform_indices = @transform_5, window_bounds = array<i64: 16, 128>}, {transform_indices = @transform_6, window_bounds = array<i64: 16, 128>}]} {
    %c0_i32 = arith.constant 0 : i32
    %0 = arith.cmpi eq, %arg0, %c0_i32 : i32
    %1 = arith.extui %0 : i1 to i32
    %c0_i32_0 = arith.constant 0 : i32
    %2 = arith.cmpi ne, %1, %c0_i32_0 : i32
    scf.if %2 {
      %cst_352 = arith.constant 0.000000e+00 : f32
      %689 = vector.broadcast %cst_352 : f32 to vector<3x2x512xf32>
      %c0_353 = arith.constant 0 : index
      %c0_354 = arith.constant 0 : index
      %c0_355 = arith.constant 0 : index
      %690 = vector.load %arg12[%c0_353, %c0_354, %c0_355] : memref<3x2x512xf32, #tpu.memory_space<vmem>>, vector<3x2x512xf32>
      tpu.vector_store %arg12[%c0_353, %c0_354, %c0_355], %689 {strides = array<i32>} : memref<3x2x512xf32, #tpu.memory_space<vmem>>, vector<3x2x512xf32>,
      %cst_356 = arith.constant 0.000000e+00 : f32
      %691 = vector.broadcast %cst_356 : f32 to vector<3x2x512xf32>
      %c0_357 = arith.constant 0 : index
      %c0_358 = arith.constant 0 : index
      %c0_359 = arith.constant 0 : index
      %692 = vector.load %arg13[%c0_357, %c0_358, %c0_359] : memref<3x2x512xf32, #tpu.memory_space<vmem>>, vector<3x2x512xf32>
      tpu.vector_store %arg13[%c0_357, %c0_358, %c0_359], %691 {strides = array<i32>} : memref<3x2x512xf32, #tpu.memory_space<vmem>>, vector<3x2x512xf32>,
      %cst_360 = arith.constant 0.000000e+00 : f32
      %693 = vector.broadcast %cst_360 : f32 to vector<3x2x256xf32>
      %c0_361 = arith.constant 0 : index
      %c0_362 = arith.constant 0 : index
      %c0_363 = arith.constant 0 : index
      %694 = vector.load %arg14[%c0_361, %c0_362, %c0_363] : memref<3x2x256xf32, #tpu.memory_space<vmem>>, vector<3x2x256xf32>
      tpu.vector_store %arg14[%c0_361, %c0_362, %c0_363], %693 {strides = array<i32>} : memref<3x2x256xf32, #tpu.memory_space<vmem>>, vector<3x2x256xf32>,
      %cst_364 = arith.constant 0.000000e+00 : f32
      %695 = vector.broadcast %cst_364 : f32 to vector<3x2x128xf32>
      %c0_365 = arith.constant 0 : index
      %c0_366 = arith.constant 0 : index
      %c0_367 = arith.constant 0 : index
      %696 = vector.load %arg15[%c0_365, %c0_366, %c0_367] : memref<3x2x128xf32, #tpu.memory_space<vmem>>, vector<3x2x128xf32>
      tpu.vector_store %arg15[%c0_365, %c0_366, %c0_367], %695 {strides = array<i32>} : memref<3x2x128xf32, #tpu.memory_space<vmem>>, vector<3x2x128xf32>,
    } else {
    }
    %c0 = arith.constant 0 : index
    %c0_1 = arith.constant 0 : index
    %3 = vector.load %arg1[%c0, %c0_1] : memref<16x2432xbf16, #tpu.memory_space<vmem>>, vector<16x2432xbf16>
    %c0_2 = arith.constant 0 : index
    %c0_3 = arith.constant 0 : index
    %4 = vector.load %arg2[%c0_2, %c0_3] : memref<2432x512xbf16, #tpu.memory_space<vmem>>, vector<2432x512xbf16>
    %cst = arith.constant dense<0.000000e+00> : vector<16x512xf32>
    %5 = tpu.matmul %3, %4, %cst {dimension_numbers = #tpu.dot_dimension_numbers<[1], [0], [0], [1], [0, 0, 1, 1], [], []>} : vector<16x2432xbf16>, vector<2432x512xbf16>, vector<16x512xf32> -> vector<16x512xf32>
    %c0_4 = arith.constant 0 : index
    %c0_5 = arith.constant 0 : index
    %6 = vector.load %arg8[%c0_4, %c0_5] : memref<16x512xf32, #tpu.memory_space<vmem>>, vector<16x512xf32>
    tpu.vector_store %arg8[%c0_4, %c0_5], %5 {strides = array<i32>} : memref<16x512xf32, #tpu.memory_space<vmem>>, vector<16x512xf32>,
    %c0_6 = arith.constant 0 : index
    %c0_7 = arith.constant 0 : index
    %c0_8 = arith.constant 0 : index
    %7 = vector.load %arg12[%c0_6, %c0_7, %c0_8] : memref<3x2x512xf32, #tpu.memory_space<vmem>>, vector<1x2x512xf32>
    %8 = vector.shape_cast %7 : vector<1x2x512xf32> to vector<2x512xf32>
    %c1 = arith.constant 1 : index
    %c0_9 = arith.constant 0 : index
    %c0_10 = arith.constant 0 : index
    %9 = vector.load %arg12[%c1, %c0_9, %c0_10] : memref<3x2x512xf32, #tpu.memory_space<vmem>>, vector<1x2x512xf32>
    %10 = vector.shape_cast %9 : vector<1x2x512xf32> to vector<2x512xf32>
    %c2 = arith.constant 2 : index
    %c0_11 = arith.constant 0 : index
    %c0_12 = arith.constant 0 : index
    %11 = vector.load %arg12[%c2, %c0_11, %c0_12] : memref<3x2x512xf32, #tpu.memory_space<vmem>>, vector<1x2x512xf32>
    %12 = vector.shape_cast %11 : vector<1x2x512xf32> to vector<2x512xf32>
    %c0_i32_13 = arith.constant 0 : i32
    %c2_i32 = arith.constant 2 : i32
    %13 = arith.muli %c0_i32_13, %c2_i32 : i32
    %14 = arith.truncf %12 : vector<2x512xf32> to vector<2x512xbf16>
    %15 = arith.index_cast %13 : i32 to index
    %c0_14 = arith.constant 0 : index
    %16 = vector.load %arg9[%15, %c0_14] : memref<16x512xbf16, #tpu.memory_space<vmem>>, vector<2x512xbf16>
    tpu.vector_store %arg9[%15, %c0_14], %14 {strides = array<i32>} : memref<16x512xbf16, #tpu.memory_space<vmem>>, vector<2x512xbf16>,
    %17 = arith.index_cast %13 : i32 to index
    %c0_15 = arith.constant 0 : index
    %18 = vector.load %arg8[%17, %c0_15] : memref<16x512xf32, #tpu.memory_space<vmem>>, vector<2x512xf32>
    %cst_16 = arith.constant 7.500000e-01 : f32
    %19 = vector.broadcast %cst_16 : f32 to vector<2x512xf32>
    %20 = arith.mulf %19, %8 : vector<2x512xf32>
    %21 = arith.addf %20, %18 : vector<2x512xf32>
    %cst_17 = arith.constant 9.700000e-01 : f32
    %22 = vector.broadcast %cst_17 : f32 to vector<2x512xf32>
    %23 = arith.mulf %22, %10 : vector<2x512xf32>
    %24 = arith.addf %23, %21 : vector<2x512xf32>
    %cst_18 = arith.constant 1.250000e+00 : f32
    %25 = vector.broadcast %cst_18 : f32 to vector<2x512xf32>
    %26 = arith.cmpf oge, %24, %25 : vector<2x512xf32>
    %27 = arith.extui %26 : vector<2x512xi1> to vector<2x512xi32>
    %28 = arith.sitofp %27 : vector<2x512xi32> to vector<2x512xf32>
    %cst_19 = arith.constant 1.000000e+00 : f32
    %29 = vector.broadcast %cst_19 : f32 to vector<2x512xf32>
    %30 = arith.subf %29, %28 : vector<2x512xf32>
    %31 = arith.mulf %24, %30 : vector<2x512xf32>
    %c1_i32 = arith.constant 1 : i32
    %c2_i32_20 = arith.constant 2 : i32
    %32 = arith.muli %c1_i32, %c2_i32_20 : i32
    %33 = arith.truncf %28 : vector<2x512xf32> to vector<2x512xbf16>
    %34 = arith.index_cast %32 : i32 to index
    %c0_21 = arith.constant 0 : index
    %35 = vector.load %arg9[%34, %c0_21] : memref<16x512xbf16, #tpu.memory_space<vmem>>, vector<2x512xbf16>
    tpu.vector_store %arg9[%34, %c0_21], %33 {strides = array<i32>} : memref<16x512xbf16, #tpu.memory_space<vmem>>, vector<2x512xbf16>,
    %36 = arith.index_cast %32 : i32 to index
    %c0_22 = arith.constant 0 : index
    %37 = vector.load %arg8[%36, %c0_22] : memref<16x512xf32, #tpu.memory_space<vmem>>, vector<2x512xf32>
    %cst_23 = arith.constant 7.500000e-01 : f32
    %38 = vector.broadcast %cst_23 : f32 to vector<2x512xf32>
    %39 = arith.mulf %38, %21 : vector<2x512xf32>
    %40 = arith.addf %39, %37 : vector<2x512xf32>
    %cst_24 = arith.constant 9.700000e-01 : f32
    %41 = vector.broadcast %cst_24 : f32 to vector<2x512xf32>
    %42 = arith.mulf %41, %31 : vector<2x512xf32>
    %43 = arith.addf %42, %40 : vector<2x512xf32>
    %cst_25 = arith.constant 1.250000e+00 : f32
    %44 = vector.broadcast %cst_25 : f32 to vector<2x512xf32>
    %45 = arith.cmpf oge, %43, %44 : vector<2x512xf32>
    %46 = arith.extui %45 : vector<2x512xi1> to vector<2x512xi32>
    %47 = arith.sitofp %46 : vector<2x512xi32> to vector<2x512xf32>
    %cst_26 = arith.constant 1.000000e+00 : f32
    %48 = vector.broadcast %cst_26 : f32 to vector<2x512xf32>
    %49 = arith.subf %48, %47 : vector<2x512xf32>
    %50 = arith.mulf %43, %49 : vector<2x512xf32>
    %c2_i32_27 = arith.constant 2 : i32
    %c2_i32_28 = arith.constant 2 : i32
    %51 = arith.muli %c2_i32_27, %c2_i32_28 : i32
    %52 = arith.truncf %47 : vector<2x512xf32> to vector<2x512xbf16>
    %53 = arith.index_cast %51 : i32 to index
    %c0_29 = arith.constant 0 : index
    %54 = vector.load %arg9[%53, %c0_29] : memref<16x512xbf16, #tpu.memory_space<vmem>>, vector<2x512xbf16>
    tpu.vector_store %arg9[%53, %c0_29], %52 {strides = array<i32>} : memref<16x512xbf16, #tpu.memory_space<vmem>>, vector<2x512xbf16>,
    %55 = arith.index_cast %51 : i32 to index
    %c0_30 = arith.constant 0 : index
    %56 = vector.load %arg8[%55, %c0_30] : memref<16x512xf32, #tpu.memory_space<vmem>>, vector<2x512xf32>
    %cst_31 = arith.constant 7.500000e-01 : f32
    %57 = vector.broadcast %cst_31 : f32 to vector<2x512xf32>
    %58 = arith.mulf %57, %40 : vector<2x512xf32>
    %59 = arith.addf %58, %56 : vector<2x512xf32>
    %cst_32 = arith.constant 9.700000e-01 : f32
    %60 = vector.broadcast %cst_32 : f32 to vector<2x512xf32>
    %61 = arith.mulf %60, %50 : vector<2x512xf32>
    %62 = arith.addf %61, %59 : vector<2x512xf32>
    %cst_33 = arith.constant 1.250000e+00 : f32
    %63 = vector.broadcast %cst_33 : f32 to vector<2x512xf32>
    %64 = arith.cmpf oge, %62, %63 : vector<2x512xf32>
    %65 = arith.extui %64 : vector<2x512xi1> to vector<2x512xi32>
    %66 = arith.sitofp %65 : vector<2x512xi32> to vector<2x512xf32>
    %cst_34 = arith.constant 1.000000e+00 : f32
    %67 = vector.broadcast %cst_34 : f32 to vector<2x512xf32>
    %68 = arith.subf %67, %66 : vector<2x512xf32>
    %69 = arith.mulf %62, %68 : vector<2x512xf32>
    %c3_i32 = arith.constant 3 : i32
    %c2_i32_35 = arith.constant 2 : i32
    %70 = arith.muli %c3_i32, %c2_i32_35 : i32
    %71 = arith.truncf %66 : vector<2x512xf32> to vector<2x512xbf16>
    %72 = arith.index_cast %70 : i32 to index
    %c0_36 = arith.constant 0 : index
    %73 = vector.load %arg9[%72, %c0_36] : memref<16x512xbf16, #tpu.memory_space<vmem>>, vector<2x512xbf16>
    tpu.vector_store %arg9[%72, %c0_36], %71 {strides = array<i32>} : memref<16x512xbf16, #tpu.memory_space<vmem>>, vector<2x512xbf16>,
    %74 = arith.index_cast %70 : i32 to index
    %c0_37 = arith.constant 0 : index
    %75 = vector.load %arg8[%74, %c0_37] : memref<16x512xf32, #tpu.memory_space<vmem>>, vector<2x512xf32>
    %cst_38 = arith.constant 7.500000e-01 : f32
    %76 = vector.broadcast %cst_38 : f32 to vector<2x512xf32>
    %77 = arith.mulf %76, %59 : vector<2x512xf32>
    %78 = arith.addf %77, %75 : vector<2x512xf32>
    %cst_39 = arith.constant 9.700000e-01 : f32
    %79 = vector.broadcast %cst_39 : f32 to vector<2x512xf32>
    %80 = arith.mulf %79, %69 : vector<2x512xf32>
    %81 = arith.addf %80, %78 : vector<2x512xf32>
    %cst_40 = arith.constant 1.250000e+00 : f32
    %82 = vector.broadcast %cst_40 : f32 to vector<2x512xf32>
    %83 = arith.cmpf oge, %81, %82 : vector<2x512xf32>
    %84 = arith.extui %83 : vector<2x512xi1> to vector<2x512xi32>
    %85 = arith.sitofp %84 : vector<2x512xi32> to vector<2x512xf32>
    %cst_41 = arith.constant 1.000000e+00 : f32
    %86 = vector.broadcast %cst_41 : f32 to vector<2x512xf32>
    %87 = arith.subf %86, %85 : vector<2x512xf32>
    %88 = arith.mulf %81, %87 : vector<2x512xf32>
    %c4_i32 = arith.constant 4 : i32
    %c2_i32_42 = arith.constant 2 : i32
    %89 = arith.muli %c4_i32, %c2_i32_42 : i32
    %90 = arith.truncf %85 : vector<2x512xf32> to vector<2x512xbf16>
    %91 = arith.index_cast %89 : i32 to index
    %c0_43 = arith.constant 0 : index
    %92 = vector.load %arg9[%91, %c0_43] : memref<16x512xbf16, #tpu.memory_space<vmem>>, vector<2x512xbf16>
    tpu.vector_store %arg9[%91, %c0_43], %90 {strides = array<i32>} : memref<16x512xbf16, #tpu.memory_space<vmem>>, vector<2x512xbf16>,
    %93 = arith.index_cast %89 : i32 to index
    %c0_44 = arith.constant 0 : index
    %94 = vector.load %arg8[%93, %c0_44] : memref<16x512xf32, #tpu.memory_space<vmem>>, vector<2x512xf32>
    %cst_45 = arith.constant 7.500000e-01 : f32
    %95 = vector.broadcast %cst_45 : f32 to vector<2x512xf32>
    %96 = arith.mulf %95, %78 : vector<2x512xf32>
    %97 = arith.addf %96, %94 : vector<2x512xf32>
    %cst_46 = arith.constant 9.700000e-01 : f32
    %98 = vector.broadcast %cst_46 : f32 to vector<2x512xf32>
    %99 = arith.mulf %98, %88 : vector<2x512xf32>
    %100 = arith.addf %99, %97 : vector<2x512xf32>
    %cst_47 = arith.constant 1.250000e+00 : f32
    %101 = vector.broadcast %cst_47 : f32 to vector<2x512xf32>
    %102 = arith.cmpf oge, %100, %101 : vector<2x512xf32>
    %103 = arith.extui %102 : vector<2x512xi1> to vector<2x512xi32>
    %104 = arith.sitofp %103 : vector<2x512xi32> to vector<2x512xf32>
    %cst_48 = arith.constant 1.000000e+00 : f32
    %105 = vector.broadcast %cst_48 : f32 to vector<2x512xf32>
    %106 = arith.subf %105, %104 : vector<2x512xf32>
    %107 = arith.mulf %100, %106 : vector<2x512xf32>
    %c5_i32 = arith.constant 5 : i32
    %c2_i32_49 = arith.constant 2 : i32
    %108 = arith.muli %c5_i32, %c2_i32_49 : i32
    %109 = arith.truncf %104 : vector<2x512xf32> to vector<2x512xbf16>
    %110 = arith.index_cast %108 : i32 to index
    %c0_50 = arith.constant 0 : index
    %111 = vector.load %arg9[%110, %c0_50] : memref<16x512xbf16, #tpu.memory_space<vmem>>, vector<2x512xbf16>
    tpu.vector_store %arg9[%110, %c0_50], %109 {strides = array<i32>} : memref<16x512xbf16, #tpu.memory_space<vmem>>, vector<2x512xbf16>,
    %112 = arith.index_cast %108 : i32 to index
    %c0_51 = arith.constant 0 : index
    %113 = vector.load %arg8[%112, %c0_51] : memref<16x512xf32, #tpu.memory_space<vmem>>, vector<2x512xf32>
    %cst_52 = arith.constant 7.500000e-01 : f32
    %114 = vector.broadcast %cst_52 : f32 to vector<2x512xf32>
    %115 = arith.mulf %114, %97 : vector<2x512xf32>
    %116 = arith.addf %115, %113 : vector<2x512xf32>
    %cst_53 = arith.constant 9.700000e-01 : f32
    %117 = vector.broadcast %cst_53 : f32 to vector<2x512xf32>
    %118 = arith.mulf %117, %107 : vector<2x512xf32>
    %119 = arith.addf %118, %116 : vector<2x512xf32>
    %cst_54 = arith.constant 1.250000e+00 : f32
    %120 = vector.broadcast %cst_54 : f32 to vector<2x512xf32>
    %121 = arith.cmpf oge, %119, %120 : vector<2x512xf32>
    %122 = arith.extui %121 : vector<2x512xi1> to vector<2x512xi32>
    %123 = arith.sitofp %122 : vector<2x512xi32> to vector<2x512xf32>
    %cst_55 = arith.constant 1.000000e+00 : f32
    %124 = vector.broadcast %cst_55 : f32 to vector<2x512xf32>
    %125 = arith.subf %124, %123 : vector<2x512xf32>
    %126 = arith.mulf %119, %125 : vector<2x512xf32>
    %c6_i32 = arith.constant 6 : i32
    %c2_i32_56 = arith.constant 2 : i32
    %127 = arith.muli %c6_i32, %c2_i32_56 : i32
    %128 = arith.truncf %123 : vector<2x512xf32> to vector<2x512xbf16>
    %129 = arith.index_cast %127 : i32 to index
    %c0_57 = arith.constant 0 : index
    %130 = vector.load %arg9[%129, %c0_57] : memref<16x512xbf16, #tpu.memory_space<vmem>>, vector<2x512xbf16>
    tpu.vector_store %arg9[%129, %c0_57], %128 {strides = array<i32>} : memref<16x512xbf16, #tpu.memory_space<vmem>>, vector<2x512xbf16>,
    %131 = arith.index_cast %127 : i32 to index
    %c0_58 = arith.constant 0 : index
    %132 = vector.load %arg8[%131, %c0_58] : memref<16x512xf32, #tpu.memory_space<vmem>>, vector<2x512xf32>
    %cst_59 = arith.constant 7.500000e-01 : f32
    %133 = vector.broadcast %cst_59 : f32 to vector<2x512xf32>
    %134 = arith.mulf %133, %116 : vector<2x512xf32>
    %135 = arith.addf %134, %132 : vector<2x512xf32>
    %cst_60 = arith.constant 9.700000e-01 : f32
    %136 = vector.broadcast %cst_60 : f32 to vector<2x512xf32>
    %137 = arith.mulf %136, %126 : vector<2x512xf32>
    %138 = arith.addf %137, %135 : vector<2x512xf32>
    %cst_61 = arith.constant 1.250000e+00 : f32
    %139 = vector.broadcast %cst_61 : f32 to vector<2x512xf32>
    %140 = arith.cmpf oge, %138, %139 : vector<2x512xf32>
    %141 = arith.extui %140 : vector<2x512xi1> to vector<2x512xi32>
    %142 = arith.sitofp %141 : vector<2x512xi32> to vector<2x512xf32>
    %cst_62 = arith.constant 1.000000e+00 : f32
    %143 = vector.broadcast %cst_62 : f32 to vector<2x512xf32>
    %144 = arith.subf %143, %142 : vector<2x512xf32>
    %145 = arith.mulf %138, %144 : vector<2x512xf32>
    %c7_i32 = arith.constant 7 : i32
    %c2_i32_63 = arith.constant 2 : i32
    %146 = arith.muli %c7_i32, %c2_i32_63 : i32
    %147 = arith.truncf %142 : vector<2x512xf32> to vector<2x512xbf16>
    %148 = arith.index_cast %146 : i32 to index
    %c0_64 = arith.constant 0 : index
    %149 = vector.load %arg9[%148, %c0_64] : memref<16x512xbf16, #tpu.memory_space<vmem>>, vector<2x512xbf16>
    tpu.vector_store %arg9[%148, %c0_64], %147 {strides = array<i32>} : memref<16x512xbf16, #tpu.memory_space<vmem>>, vector<2x512xbf16>,
    %150 = arith.index_cast %146 : i32 to index
    %c0_65 = arith.constant 0 : index
    %151 = vector.load %arg8[%150, %c0_65] : memref<16x512xf32, #tpu.memory_space<vmem>>, vector<2x512xf32>
    %cst_66 = arith.constant 7.500000e-01 : f32
    %152 = vector.broadcast %cst_66 : f32 to vector<2x512xf32>
    %153 = arith.mulf %152, %135 : vector<2x512xf32>
    %154 = arith.addf %153, %151 : vector<2x512xf32>
    %cst_67 = arith.constant 9.700000e-01 : f32
    %155 = vector.broadcast %cst_67 : f32 to vector<2x512xf32>
    %156 = arith.mulf %155, %145 : vector<2x512xf32>
    %157 = arith.addf %156, %154 : vector<2x512xf32>
    %cst_68 = arith.constant 1.250000e+00 : f32
    %158 = vector.broadcast %cst_68 : f32 to vector<2x512xf32>
    %159 = arith.cmpf oge, %157, %158 : vector<2x512xf32>
    %160 = arith.extui %159 : vector<2x512xi1> to vector<2x512xi32>
    %161 = arith.sitofp %160 : vector<2x512xi32> to vector<2x512xf32>
    %cst_69 = arith.constant 1.000000e+00 : f32
    %162 = vector.broadcast %cst_69 : f32 to vector<2x512xf32>
    %163 = arith.subf %162, %161 : vector<2x512xf32>
    %164 = arith.mulf %157, %163 : vector<2x512xf32>
    %c8_i32 = arith.constant 8 : i32
    %c0_70 = arith.constant 0 : index
    %c0_71 = arith.constant 0 : index
    %c0_72 = arith.constant 0 : index
    %165 = vector.load %arg12[%c0_70, %c0_71, %c0_72] : memref<3x2x512xf32, #tpu.memory_space<vmem>>, vector<1x2x512xf32>
    %166 = vector.shape_cast %165 : vector<1x2x512xf32> to vector<2x512xf32>
    %167 = vector.shape_cast %154 : vector<2x512xf32> to vector<1x2x512xf32>
    tpu.vector_store %arg12[%c0_70, %c0_71, %c0_72], %167 {strides = array<i32>} : memref<3x2x512xf32, #tpu.memory_space<vmem>>, vector<1x2x512xf32>,
    %c1_73 = arith.constant 1 : index
    %c0_74 = arith.constant 0 : index
    %c0_75 = arith.constant 0 : index
    %168 = vector.load %arg12[%c1_73, %c0_74, %c0_75] : memref<3x2x512xf32, #tpu.memory_space<vmem>>, vector<1x2x512xf32>
    %169 = vector.shape_cast %168 : vector<1x2x512xf32> to vector<2x512xf32>
    %170 = vector.shape_cast %164 : vector<2x512xf32> to vector<1x2x512xf32>
    tpu.vector_store %arg12[%c1_73, %c0_74, %c0_75], %170 {strides = array<i32>} : memref<3x2x512xf32, #tpu.memory_space<vmem>>, vector<1x2x512xf32>,
    %c2_76 = arith.constant 2 : index
    %c0_77 = arith.constant 0 : index
    %c0_78 = arith.constant 0 : index
    %171 = vector.load %arg12[%c2_76, %c0_77, %c0_78] : memref<3x2x512xf32, #tpu.memory_space<vmem>>, vector<1x2x512xf32>
    %172 = vector.shape_cast %171 : vector<1x2x512xf32> to vector<2x512xf32>
    %173 = vector.shape_cast %161 : vector<2x512xf32> to vector<1x2x512xf32>
    tpu.vector_store %arg12[%c2_76, %c0_77, %c0_78], %173 {strides = array<i32>} : memref<3x2x512xf32, #tpu.memory_space<vmem>>, vector<1x2x512xf32>,
    %c0_79 = arith.constant 0 : index
    %c0_80 = arith.constant 0 : index
    %174 = vector.load %arg9[%c0_79, %c0_80] : memref<16x512xbf16, #tpu.memory_space<vmem>>, vector<16x512xbf16>
    %c0_81 = arith.constant 0 : index
    %c0_82 = arith.constant 0 : index
    %175 = vector.load %arg3[%c0_81, %c0_82] : memref<512x512xbf16, #tpu.memory_space<vmem>>, vector<512x512xbf16>
    %cst_83 = arith.constant dense<0.000000e+00> : vector<16x512xf32>
    %176 = tpu.matmul %174, %175, %cst_83 {dimension_numbers = #tpu.dot_dimension_numbers<[1], [0], [0], [1], [0, 0, 1, 1], [], []>} : vector<16x512xbf16>, vector<512x512xbf16>, vector<16x512xf32> -> vector<16x512xf32>
    %c0_84 = arith.constant 0 : index
    %c0_85 = arith.constant 0 : index
    %177 = vector.load %arg8[%c0_84, %c0_85] : memref<16x512xf32, #tpu.memory_space<vmem>>, vector<16x512xf32>
    tpu.vector_store %arg8[%c0_84, %c0_85], %176 {strides = array<i32>} : memref<16x512xf32, #tpu.memory_space<vmem>>, vector<16x512xf32>,
    %c0_86 = arith.constant 0 : index
    %c0_87 = arith.constant 0 : index
    %c0_88 = arith.constant 0 : index
    %178 = vector.load %arg13[%c0_86, %c0_87, %c0_88] : memref<3x2x512xf32, #tpu.memory_space<vmem>>, vector<1x2x512xf32>
    %179 = vector.shape_cast %178 : vector<1x2x512xf32> to vector<2x512xf32>
    %c1_89 = arith.constant 1 : index
    %c0_90 = arith.constant 0 : index
    %c0_91 = arith.constant 0 : index
    %180 = vector.load %arg13[%c1_89, %c0_90, %c0_91] : memref<3x2x512xf32, #tpu.memory_space<vmem>>, vector<1x2x512xf32>
    %181 = vector.shape_cast %180 : vector<1x2x512xf32> to vector<2x512xf32>
    %c2_92 = arith.constant 2 : index
    %c0_93 = arith.constant 0 : index
    %c0_94 = arith.constant 0 : index
    %182 = vector.load %arg13[%c2_92, %c0_93, %c0_94] : memref<3x2x512xf32, #tpu.memory_space<vmem>>, vector<1x2x512xf32>
    %183 = vector.shape_cast %182 : vector<1x2x512xf32> to vector<2x512xf32>
    %c0_i32_95 = arith.constant 0 : i32
    %c2_i32_96 = arith.constant 2 : i32
    %184 = arith.muli %c0_i32_95, %c2_i32_96 : i32
    %185 = arith.truncf %183 : vector<2x512xf32> to vector<2x512xbf16>
    %186 = arith.index_cast %184 : i32 to index
    %c0_97 = arith.constant 0 : index
    %187 = vector.load %arg10[%186, %c0_97] : memref<16x512xbf16, #tpu.memory_space<vmem>>, vector<2x512xbf16>
    tpu.vector_store %arg10[%186, %c0_97], %185 {strides = array<i32>} : memref<16x512xbf16, #tpu.memory_space<vmem>>, vector<2x512xbf16>,
    %188 = arith.index_cast %184 : i32 to index
    %c0_98 = arith.constant 0 : index
    %189 = vector.load %arg8[%188, %c0_98] : memref<16x512xf32, #tpu.memory_space<vmem>>, vector<2x512xf32>
    %cst_99 = arith.constant 7.500000e-01 : f32
    %190 = vector.broadcast %cst_99 : f32 to vector<2x512xf32>
    %191 = arith.mulf %190, %179 : vector<2x512xf32>
    %192 = arith.addf %191, %189 : vector<2x512xf32>
    %cst_100 = arith.constant 9.700000e-01 : f32
    %193 = vector.broadcast %cst_100 : f32 to vector<2x512xf32>
    %194 = arith.mulf %193, %181 : vector<2x512xf32>
    %195 = arith.addf %194, %192 : vector<2x512xf32>
    %cst_101 = arith.constant 1.250000e+00 : f32
    %196 = vector.broadcast %cst_101 : f32 to vector<2x512xf32>
    %197 = arith.cmpf oge, %195, %196 : vector<2x512xf32>
    %198 = arith.extui %197 : vector<2x512xi1> to vector<2x512xi32>
    %199 = arith.sitofp %198 : vector<2x512xi32> to vector<2x512xf32>
    %cst_102 = arith.constant 1.000000e+00 : f32
    %200 = vector.broadcast %cst_102 : f32 to vector<2x512xf32>
    %201 = arith.subf %200, %199 : vector<2x512xf32>
    %202 = arith.mulf %195, %201 : vector<2x512xf32>
    %c1_i32_103 = arith.constant 1 : i32
    %c2_i32_104 = arith.constant 2 : i32
    %203 = arith.muli %c1_i32_103, %c2_i32_104 : i32
    %204 = arith.truncf %199 : vector<2x512xf32> to vector<2x512xbf16>
    %205 = arith.index_cast %203 : i32 to index
    %c0_105 = arith.constant 0 : index
    %206 = vector.load %arg10[%205, %c0_105] : memref<16x512xbf16, #tpu.memory_space<vmem>>, vector<2x512xbf16>
    tpu.vector_store %arg10[%205, %c0_105], %204 {strides = array<i32>} : memref<16x512xbf16, #tpu.memory_space<vmem>>, vector<2x512xbf16>,
    %207 = arith.index_cast %203 : i32 to index
    %c0_106 = arith.constant 0 : index
    %208 = vector.load %arg8[%207, %c0_106] : memref<16x512xf32, #tpu.memory_space<vmem>>, vector<2x512xf32>
    %cst_107 = arith.constant 7.500000e-01 : f32
    %209 = vector.broadcast %cst_107 : f32 to vector<2x512xf32>
    %210 = arith.mulf %209, %192 : vector<2x512xf32>
    %211 = arith.addf %210, %208 : vector<2x512xf32>
    %cst_108 = arith.constant 9.700000e-01 : f32
    %212 = vector.broadcast %cst_108 : f32 to vector<2x512xf32>
    %213 = arith.mulf %212, %202 : vector<2x512xf32>
    %214 = arith.addf %213, %211 : vector<2x512xf32>
    %cst_109 = arith.constant 1.250000e+00 : f32
    %215 = vector.broadcast %cst_109 : f32 to vector<2x512xf32>
    %216 = arith.cmpf oge, %214, %215 : vector<2x512xf32>
    %217 = arith.extui %216 : vector<2x512xi1> to vector<2x512xi32>
    %218 = arith.sitofp %217 : vector<2x512xi32> to vector<2x512xf32>
    %cst_110 = arith.constant 1.000000e+00 : f32
    %219 = vector.broadcast %cst_110 : f32 to vector<2x512xf32>
    %220 = arith.subf %219, %218 : vector<2x512xf32>
    %221 = arith.mulf %214, %220 : vector<2x512xf32>
    %c2_i32_111 = arith.constant 2 : i32
    %c2_i32_112 = arith.constant 2 : i32
    %222 = arith.muli %c2_i32_111, %c2_i32_112 : i32
    %223 = arith.truncf %218 : vector<2x512xf32> to vector<2x512xbf16>
    %224 = arith.index_cast %222 : i32 to index
    %c0_113 = arith.constant 0 : index
    %225 = vector.load %arg10[%224, %c0_113] : memref<16x512xbf16, #tpu.memory_space<vmem>>, vector<2x512xbf16>
    tpu.vector_store %arg10[%224, %c0_113], %223 {strides = array<i32>} : memref<16x512xbf16, #tpu.memory_space<vmem>>, vector<2x512xbf16>,
    %226 = arith.index_cast %222 : i32 to index
    %c0_114 = arith.constant 0 : index
    %227 = vector.load %arg8[%226, %c0_114] : memref<16x512xf32, #tpu.memory_space<vmem>>, vector<2x512xf32>
    %cst_115 = arith.constant 7.500000e-01 : f32
    %228 = vector.broadcast %cst_115 : f32 to vector<2x512xf32>
    %229 = arith.mulf %228, %211 : vector<2x512xf32>
    %230 = arith.addf %229, %227 : vector<2x512xf32>
    %cst_116 = arith.constant 9.700000e-01 : f32
    %231 = vector.broadcast %cst_116 : f32 to vector<2x512xf32>
    %232 = arith.mulf %231, %221 : vector<2x512xf32>
    %233 = arith.addf %232, %230 : vector<2x512xf32>
    %cst_117 = arith.constant 1.250000e+00 : f32
    %234 = vector.broadcast %cst_117 : f32 to vector<2x512xf32>
    %235 = arith.cmpf oge, %233, %234 : vector<2x512xf32>
    %236 = arith.extui %235 : vector<2x512xi1> to vector<2x512xi32>
    %237 = arith.sitofp %236 : vector<2x512xi32> to vector<2x512xf32>
    %cst_118 = arith.constant 1.000000e+00 : f32
    %238 = vector.broadcast %cst_118 : f32 to vector<2x512xf32>
    %239 = arith.subf %238, %237 : vector<2x512xf32>
    %240 = arith.mulf %233, %239 : vector<2x512xf32>
    %c3_i32_119 = arith.constant 3 : i32
    %c2_i32_120 = arith.constant 2 : i32
    %241 = arith.muli %c3_i32_119, %c2_i32_120 : i32
    %242 = arith.truncf %237 : vector<2x512xf32> to vector<2x512xbf16>
    %243 = arith.index_cast %241 : i32 to index
    %c0_121 = arith.constant 0 : index
    %244 = vector.load %arg10[%243, %c0_121] : memref<16x512xbf16, #tpu.memory_space<vmem>>, vector<2x512xbf16>
    tpu.vector_store %arg10[%243, %c0_121], %242 {strides = array<i32>} : memref<16x512xbf16, #tpu.memory_space<vmem>>, vector<2x512xbf16>,
    %245 = arith.index_cast %241 : i32 to index
    %c0_122 = arith.constant 0 : index
    %246 = vector.load %arg8[%245, %c0_122] : memref<16x512xf32, #tpu.memory_space<vmem>>, vector<2x512xf32>
    %cst_123 = arith.constant 7.500000e-01 : f32
    %247 = vector.broadcast %cst_123 : f32 to vector<2x512xf32>
    %248 = arith.mulf %247, %230 : vector<2x512xf32>
    %249 = arith.addf %248, %246 : vector<2x512xf32>
    %cst_124 = arith.constant 9.700000e-01 : f32
    %250 = vector.broadcast %cst_124 : f32 to vector<2x512xf32>
    %251 = arith.mulf %250, %240 : vector<2x512xf32>
    %252 = arith.addf %251, %249 : vector<2x512xf32>
    %cst_125 = arith.constant 1.250000e+00 : f32
    %253 = vector.broadcast %cst_125 : f32 to vector<2x512xf32>
    %254 = arith.cmpf oge, %252, %253 : vector<2x512xf32>
    %255 = arith.extui %254 : vector<2x512xi1> to vector<2x512xi32>
    %256 = arith.sitofp %255 : vector<2x512xi32> to vector<2x512xf32>
    %cst_126 = arith.constant 1.000000e+00 : f32
    %257 = vector.broadcast %cst_126 : f32 to vector<2x512xf32>
    %258 = arith.subf %257, %256 : vector<2x512xf32>
    %259 = arith.mulf %252, %258 : vector<2x512xf32>
    %c4_i32_127 = arith.constant 4 : i32
    %c2_i32_128 = arith.constant 2 : i32
    %260 = arith.muli %c4_i32_127, %c2_i32_128 : i32
    %261 = arith.truncf %256 : vector<2x512xf32> to vector<2x512xbf16>
    %262 = arith.index_cast %260 : i32 to index
    %c0_129 = arith.constant 0 : index
    %263 = vector.load %arg10[%262, %c0_129] : memref<16x512xbf16, #tpu.memory_space<vmem>>, vector<2x512xbf16>
    tpu.vector_store %arg10[%262, %c0_129], %261 {strides = array<i32>} : memref<16x512xbf16, #tpu.memory_space<vmem>>, vector<2x512xbf16>,
    %264 = arith.index_cast %260 : i32 to index
    %c0_130 = arith.constant 0 : index
    %265 = vector.load %arg8[%264, %c0_130] : memref<16x512xf32, #tpu.memory_space<vmem>>, vector<2x512xf32>
    %cst_131 = arith.constant 7.500000e-01 : f32
    %266 = vector.broadcast %cst_131 : f32 to vector<2x512xf32>
    %267 = arith.mulf %266, %249 : vector<2x512xf32>
    %268 = arith.addf %267, %265 : vector<2x512xf32>
    %cst_132 = arith.constant 9.700000e-01 : f32
    %269 = vector.broadcast %cst_132 : f32 to vector<2x512xf32>
    %270 = arith.mulf %269, %259 : vector<2x512xf32>
    %271 = arith.addf %270, %268 : vector<2x512xf32>
    %cst_133 = arith.constant 1.250000e+00 : f32
    %272 = vector.broadcast %cst_133 : f32 to vector<2x512xf32>
    %273 = arith.cmpf oge, %271, %272 : vector<2x512xf32>
    %274 = arith.extui %273 : vector<2x512xi1> to vector<2x512xi32>
    %275 = arith.sitofp %274 : vector<2x512xi32> to vector<2x512xf32>
    %cst_134 = arith.constant 1.000000e+00 : f32
    %276 = vector.broadcast %cst_134 : f32 to vector<2x512xf32>
    %277 = arith.subf %276, %275 : vector<2x512xf32>
    %278 = arith.mulf %271, %277 : vector<2x512xf32>
    %c5_i32_135 = arith.constant 5 : i32
    %c2_i32_136 = arith.constant 2 : i32
    %279 = arith.muli %c5_i32_135, %c2_i32_136 : i32
    %280 = arith.truncf %275 : vector<2x512xf32> to vector<2x512xbf16>
    %281 = arith.index_cast %279 : i32 to index
    %c0_137 = arith.constant 0 : index
    %282 = vector.load %arg10[%281, %c0_137] : memref<16x512xbf16, #tpu.memory_space<vmem>>, vector<2x512xbf16>
    tpu.vector_store %arg10[%281, %c0_137], %280 {strides = array<i32>} : memref<16x512xbf16, #tpu.memory_space<vmem>>, vector<2x512xbf16>,
    %283 = arith.index_cast %279 : i32 to index
    %c0_138 = arith.constant 0 : index
    %284 = vector.load %arg8[%283, %c0_138] : memref<16x512xf32, #tpu.memory_space<vmem>>, vector<2x512xf32>
    %cst_139 = arith.constant 7.500000e-01 : f32
    %285 = vector.broadcast %cst_139 : f32 to vector<2x512xf32>
    %286 = arith.mulf %285, %268 : vector<2x512xf32>
    %287 = arith.addf %286, %284 : vector<2x512xf32>
    %cst_140 = arith.constant 9.700000e-01 : f32
    %288 = vector.broadcast %cst_140 : f32 to vector<2x512xf32>
    %289 = arith.mulf %288, %278 : vector<2x512xf32>
    %290 = arith.addf %289, %287 : vector<2x512xf32>
    %cst_141 = arith.constant 1.250000e+00 : f32
    %291 = vector.broadcast %cst_141 : f32 to vector<2x512xf32>
    %292 = arith.cmpf oge, %290, %291 : vector<2x512xf32>
    %293 = arith.extui %292 : vector<2x512xi1> to vector<2x512xi32>
    %294 = arith.sitofp %293 : vector<2x512xi32> to vector<2x512xf32>
    %cst_142 = arith.constant 1.000000e+00 : f32
    %295 = vector.broadcast %cst_142 : f32 to vector<2x512xf32>
    %296 = arith.subf %295, %294 : vector<2x512xf32>
    %297 = arith.mulf %290, %296 : vector<2x512xf32>
    %c6_i32_143 = arith.constant 6 : i32
    %c2_i32_144 = arith.constant 2 : i32
    %298 = arith.muli %c6_i32_143, %c2_i32_144 : i32
    %299 = arith.truncf %294 : vector<2x512xf32> to vector<2x512xbf16>
    %300 = arith.index_cast %298 : i32 to index
    %c0_145 = arith.constant 0 : index
    %301 = vector.load %arg10[%300, %c0_145] : memref<16x512xbf16, #tpu.memory_space<vmem>>, vector<2x512xbf16>
    tpu.vector_store %arg10[%300, %c0_145], %299 {strides = array<i32>} : memref<16x512xbf16, #tpu.memory_space<vmem>>, vector<2x512xbf16>,
    %302 = arith.index_cast %298 : i32 to index
    %c0_146 = arith.constant 0 : index
    %303 = vector.load %arg8[%302, %c0_146] : memref<16x512xf32, #tpu.memory_space<vmem>>, vector<2x512xf32>
    %cst_147 = arith.constant 7.500000e-01 : f32
    %304 = vector.broadcast %cst_147 : f32 to vector<2x512xf32>
    %305 = arith.mulf %304, %287 : vector<2x512xf32>
    %306 = arith.addf %305, %303 : vector<2x512xf32>
    %cst_148 = arith.constant 9.700000e-01 : f32
    %307 = vector.broadcast %cst_148 : f32 to vector<2x512xf32>
    %308 = arith.mulf %307, %297 : vector<2x512xf32>
    %309 = arith.addf %308, %306 : vector<2x512xf32>
    %cst_149 = arith.constant 1.250000e+00 : f32
    %310 = vector.broadcast %cst_149 : f32 to vector<2x512xf32>
    %311 = arith.cmpf oge, %309, %310 : vector<2x512xf32>
    %312 = arith.extui %311 : vector<2x512xi1> to vector<2x512xi32>
    %313 = arith.sitofp %312 : vector<2x512xi32> to vector<2x512xf32>
    %cst_150 = arith.constant 1.000000e+00 : f32
    %314 = vector.broadcast %cst_150 : f32 to vector<2x512xf32>
    %315 = arith.subf %314, %313 : vector<2x512xf32>
    %316 = arith.mulf %309, %315 : vector<2x512xf32>
    %c7_i32_151 = arith.constant 7 : i32
    %c2_i32_152 = arith.constant 2 : i32
    %317 = arith.muli %c7_i32_151, %c2_i32_152 : i32
    %318 = arith.truncf %313 : vector<2x512xf32> to vector<2x512xbf16>
    %319 = arith.index_cast %317 : i32 to index
    %c0_153 = arith.constant 0 : index
    %320 = vector.load %arg10[%319, %c0_153] : memref<16x512xbf16, #tpu.memory_space<vmem>>, vector<2x512xbf16>
    tpu.vector_store %arg10[%319, %c0_153], %318 {strides = array<i32>} : memref<16x512xbf16, #tpu.memory_space<vmem>>, vector<2x512xbf16>,
    %321 = arith.index_cast %317 : i32 to index
    %c0_154 = arith.constant 0 : index
    %322 = vector.load %arg8[%321, %c0_154] : memref<16x512xf32, #tpu.memory_space<vmem>>, vector<2x512xf32>
    %cst_155 = arith.constant 7.500000e-01 : f32
    %323 = vector.broadcast %cst_155 : f32 to vector<2x512xf32>
    %324 = arith.mulf %323, %306 : vector<2x512xf32>
    %325 = arith.addf %324, %322 : vector<2x512xf32>
    %cst_156 = arith.constant 9.700000e-01 : f32
    %326 = vector.broadcast %cst_156 : f32 to vector<2x512xf32>
    %327 = arith.mulf %326, %316 : vector<2x512xf32>
    %328 = arith.addf %327, %325 : vector<2x512xf32>
    %cst_157 = arith.constant 1.250000e+00 : f32
    %329 = vector.broadcast %cst_157 : f32 to vector<2x512xf32>
    %330 = arith.cmpf oge, %328, %329 : vector<2x512xf32>
    %331 = arith.extui %330 : vector<2x512xi1> to vector<2x512xi32>
    %332 = arith.sitofp %331 : vector<2x512xi32> to vector<2x512xf32>
    %cst_158 = arith.constant 1.000000e+00 : f32
    %333 = vector.broadcast %cst_158 : f32 to vector<2x512xf32>
    %334 = arith.subf %333, %332 : vector<2x512xf32>
    %335 = arith.mulf %328, %334 : vector<2x512xf32>
    %c8_i32_159 = arith.constant 8 : i32
    %c0_160 = arith.constant 0 : index
    %c0_161 = arith.constant 0 : index
    %c0_162 = arith.constant 0 : index
    %336 = vector.load %arg13[%c0_160, %c0_161, %c0_162] : memref<3x2x512xf32, #tpu.memory_space<vmem>>, vector<1x2x512xf32>
    %337 = vector.shape_cast %336 : vector<1x2x512xf32> to vector<2x512xf32>
    %338 = vector.shape_cast %325 : vector<2x512xf32> to vector<1x2x512xf32>
    tpu.vector_store %arg13[%c0_160, %c0_161, %c0_162], %338 {strides = array<i32>} : memref<3x2x512xf32, #tpu.memory_space<vmem>>, vector<1x2x512xf32>,
    %c1_163 = arith.constant 1 : index
    %c0_164 = arith.constant 0 : index
    %c0_165 = arith.constant 0 : index
    %339 = vector.load %arg13[%c1_163, %c0_164, %c0_165] : memref<3x2x512xf32, #tpu.memory_space<vmem>>, vector<1x2x512xf32>
    %340 = vector.shape_cast %339 : vector<1x2x512xf32> to vector<2x512xf32>
    %341 = vector.shape_cast %335 : vector<2x512xf32> to vector<1x2x512xf32>
    tpu.vector_store %arg13[%c1_163, %c0_164, %c0_165], %341 {strides = array<i32>} : memref<3x2x512xf32, #tpu.memory_space<vmem>>, vector<1x2x512xf32>,
    %c2_166 = arith.constant 2 : index
    %c0_167 = arith.constant 0 : index
    %c0_168 = arith.constant 0 : index
    %342 = vector.load %arg13[%c2_166, %c0_167, %c0_168] : memref<3x2x512xf32, #tpu.memory_space<vmem>>, vector<1x2x512xf32>
    %343 = vector.shape_cast %342 : vector<1x2x512xf32> to vector<2x512xf32>
    %344 = vector.shape_cast %332 : vector<2x512xf32> to vector<1x2x512xf32>
    tpu.vector_store %arg13[%c2_166, %c0_167, %c0_168], %344 {strides = array<i32>} : memref<3x2x512xf32, #tpu.memory_space<vmem>>, vector<1x2x512xf32>,
    %c0_169 = arith.constant 0 : index
    %c0_170 = arith.constant 0 : index
    %345 = vector.load %arg10[%c0_169, %c0_170] : memref<16x512xbf16, #tpu.memory_space<vmem>>, vector<16x512xbf16>
    %c0_171 = arith.constant 0 : index
    %c0_172 = arith.constant 0 : index
    %346 = vector.load %arg4[%c0_171, %c0_172] : memref<512x256xbf16, #tpu.memory_space<vmem>>, vector<512x256xbf16>
    %cst_173 = arith.constant dense<0.000000e+00> : vector<16x256xf32>
    %347 = tpu.matmul %345, %346, %cst_173 {dimension_numbers = #tpu.dot_dimension_numbers<[1], [0], [0], [1], [0, 0, 1, 1], [], []>} : vector<16x512xbf16>, vector<512x256xbf16>, vector<16x256xf32> -> vector<16x256xf32>
    %c0_174 = arith.constant 0 : index
    %c0_175 = arith.constant 0 : index
    %348 = vector.load %arg8[%c0_174, %c0_175] : memref<16x512xf32, #tpu.memory_space<vmem>>, vector<16x256xf32>
    tpu.vector_store %arg8[%c0_174, %c0_175], %347 {strides = array<i32>} : memref<16x512xf32, #tpu.memory_space<vmem>>, vector<16x256xf32>,
    %c0_176 = arith.constant 0 : index
    %c0_177 = arith.constant 0 : index
    %c0_178 = arith.constant 0 : index
    %349 = vector.load %arg14[%c0_176, %c0_177, %c0_178] : memref<3x2x256xf32, #tpu.memory_space<vmem>>, vector<1x2x256xf32>
    %350 = vector.shape_cast %349 : vector<1x2x256xf32> to vector<2x256xf32>
    %c1_179 = arith.constant 1 : index
    %c0_180 = arith.constant 0 : index
    %c0_181 = arith.constant 0 : index
    %351 = vector.load %arg14[%c1_179, %c0_180, %c0_181] : memref<3x2x256xf32, #tpu.memory_space<vmem>>, vector<1x2x256xf32>
    %352 = vector.shape_cast %351 : vector<1x2x256xf32> to vector<2x256xf32>
    %c2_182 = arith.constant 2 : index
    %c0_183 = arith.constant 0 : index
    %c0_184 = arith.constant 0 : index
    %353 = vector.load %arg14[%c2_182, %c0_183, %c0_184] : memref<3x2x256xf32, #tpu.memory_space<vmem>>, vector<1x2x256xf32>
    %354 = vector.shape_cast %353 : vector<1x2x256xf32> to vector<2x256xf32>
    %c0_i32_185 = arith.constant 0 : i32
    %c2_i32_186 = arith.constant 2 : i32
    %355 = arith.muli %c0_i32_185, %c2_i32_186 : i32
    %356 = arith.truncf %354 : vector<2x256xf32> to vector<2x256xbf16>
    %357 = arith.index_cast %355 : i32 to index
    %c0_187 = arith.constant 0 : index
    %358 = vector.load %arg11[%357, %c0_187] : memref<16x256xbf16, #tpu.memory_space<vmem>>, vector<2x256xbf16>
    tpu.vector_store %arg11[%357, %c0_187], %356 {strides = array<i32>} : memref<16x256xbf16, #tpu.memory_space<vmem>>, vector<2x256xbf16>,
    %359 = arith.index_cast %355 : i32 to index
    %c0_188 = arith.constant 0 : index
    %360 = vector.load %arg8[%359, %c0_188] : memref<16x512xf32, #tpu.memory_space<vmem>>, vector<2x256xf32>
    %cst_189 = arith.constant 7.500000e-01 : f32
    %361 = vector.broadcast %cst_189 : f32 to vector<2x256xf32>
    %362 = arith.mulf %361, %350 : vector<2x256xf32>
    %363 = arith.addf %362, %360 : vector<2x256xf32>
    %cst_190 = arith.constant 9.700000e-01 : f32
    %364 = vector.broadcast %cst_190 : f32 to vector<2x256xf32>
    %365 = arith.mulf %364, %352 : vector<2x256xf32>
    %366 = arith.addf %365, %363 : vector<2x256xf32>
    %cst_191 = arith.constant 1.250000e+00 : f32
    %367 = vector.broadcast %cst_191 : f32 to vector<2x256xf32>
    %368 = arith.cmpf oge, %366, %367 : vector<2x256xf32>
    %369 = arith.extui %368 : vector<2x256xi1> to vector<2x256xi32>
    %370 = arith.sitofp %369 : vector<2x256xi32> to vector<2x256xf32>
    %cst_192 = arith.constant 1.000000e+00 : f32
    %371 = vector.broadcast %cst_192 : f32 to vector<2x256xf32>
    %372 = arith.subf %371, %370 : vector<2x256xf32>
    %373 = arith.mulf %366, %372 : vector<2x256xf32>
    %c1_i32_193 = arith.constant 1 : i32
    %c2_i32_194 = arith.constant 2 : i32
    %374 = arith.muli %c1_i32_193, %c2_i32_194 : i32
    %375 = arith.truncf %370 : vector<2x256xf32> to vector<2x256xbf16>
    %376 = arith.index_cast %374 : i32 to index
    %c0_195 = arith.constant 0 : index
    %377 = vector.load %arg11[%376, %c0_195] : memref<16x256xbf16, #tpu.memory_space<vmem>>, vector<2x256xbf16>
    tpu.vector_store %arg11[%376, %c0_195], %375 {strides = array<i32>} : memref<16x256xbf16, #tpu.memory_space<vmem>>, vector<2x256xbf16>,
    %378 = arith.index_cast %374 : i32 to index
    %c0_196 = arith.constant 0 : index
    %379 = vector.load %arg8[%378, %c0_196] : memref<16x512xf32, #tpu.memory_space<vmem>>, vector<2x256xf32>
    %cst_197 = arith.constant 7.500000e-01 : f32
    %380 = vector.broadcast %cst_197 : f32 to vector<2x256xf32>
    %381 = arith.mulf %380, %363 : vector<2x256xf32>
    %382 = arith.addf %381, %379 : vector<2x256xf32>
    %cst_198 = arith.constant 9.700000e-01 : f32
    %383 = vector.broadcast %cst_198 : f32 to vector<2x256xf32>
    %384 = arith.mulf %383, %373 : vector<2x256xf32>
    %385 = arith.addf %384, %382 : vector<2x256xf32>
    %cst_199 = arith.constant 1.250000e+00 : f32
    %386 = vector.broadcast %cst_199 : f32 to vector<2x256xf32>
    %387 = arith.cmpf oge, %385, %386 : vector<2x256xf32>
    %388 = arith.extui %387 : vector<2x256xi1> to vector<2x256xi32>
    %389 = arith.sitofp %388 : vector<2x256xi32> to vector<2x256xf32>
    %cst_200 = arith.constant 1.000000e+00 : f32
    %390 = vector.broadcast %cst_200 : f32 to vector<2x256xf32>
    %391 = arith.subf %390, %389 : vector<2x256xf32>
    %392 = arith.mulf %385, %391 : vector<2x256xf32>
    %c2_i32_201 = arith.constant 2 : i32
    %c2_i32_202 = arith.constant 2 : i32
    %393 = arith.muli %c2_i32_201, %c2_i32_202 : i32
    %394 = arith.truncf %389 : vector<2x256xf32> to vector<2x256xbf16>
    %395 = arith.index_cast %393 : i32 to index
    %c0_203 = arith.constant 0 : index
    %396 = vector.load %arg11[%395, %c0_203] : memref<16x256xbf16, #tpu.memory_space<vmem>>, vector<2x256xbf16>
    tpu.vector_store %arg11[%395, %c0_203], %394 {strides = array<i32>} : memref<16x256xbf16, #tpu.memory_space<vmem>>, vector<2x256xbf16>,
    %397 = arith.index_cast %393 : i32 to index
    %c0_204 = arith.constant 0 : index
    %398 = vector.load %arg8[%397, %c0_204] : memref<16x512xf32, #tpu.memory_space<vmem>>, vector<2x256xf32>
    %cst_205 = arith.constant 7.500000e-01 : f32
    %399 = vector.broadcast %cst_205 : f32 to vector<2x256xf32>
    %400 = arith.mulf %399, %382 : vector<2x256xf32>
    %401 = arith.addf %400, %398 : vector<2x256xf32>
    %cst_206 = arith.constant 9.700000e-01 : f32
    %402 = vector.broadcast %cst_206 : f32 to vector<2x256xf32>
    %403 = arith.mulf %402, %392 : vector<2x256xf32>
    %404 = arith.addf %403, %401 : vector<2x256xf32>
    %cst_207 = arith.constant 1.250000e+00 : f32
    %405 = vector.broadcast %cst_207 : f32 to vector<2x256xf32>
    %406 = arith.cmpf oge, %404, %405 : vector<2x256xf32>
    %407 = arith.extui %406 : vector<2x256xi1> to vector<2x256xi32>
    %408 = arith.sitofp %407 : vector<2x256xi32> to vector<2x256xf32>
    %cst_208 = arith.constant 1.000000e+00 : f32
    %409 = vector.broadcast %cst_208 : f32 to vector<2x256xf32>
    %410 = arith.subf %409, %408 : vector<2x256xf32>
    %411 = arith.mulf %404, %410 : vector<2x256xf32>
    %c3_i32_209 = arith.constant 3 : i32
    %c2_i32_210 = arith.constant 2 : i32
    %412 = arith.muli %c3_i32_209, %c2_i32_210 : i32
    %413 = arith.truncf %408 : vector<2x256xf32> to vector<2x256xbf16>
    %414 = arith.index_cast %412 : i32 to index
    %c0_211 = arith.constant 0 : index
    %415 = vector.load %arg11[%414, %c0_211] : memref<16x256xbf16, #tpu.memory_space<vmem>>, vector<2x256xbf16>
    tpu.vector_store %arg11[%414, %c0_211], %413 {strides = array<i32>} : memref<16x256xbf16, #tpu.memory_space<vmem>>, vector<2x256xbf16>,
    %416 = arith.index_cast %412 : i32 to index
    %c0_212 = arith.constant 0 : index
    %417 = vector.load %arg8[%416, %c0_212] : memref<16x512xf32, #tpu.memory_space<vmem>>, vector<2x256xf32>
    %cst_213 = arith.constant 7.500000e-01 : f32
    %418 = vector.broadcast %cst_213 : f32 to vector<2x256xf32>
    %419 = arith.mulf %418, %401 : vector<2x256xf32>
    %420 = arith.addf %419, %417 : vector<2x256xf32>
    %cst_214 = arith.constant 9.700000e-01 : f32
    %421 = vector.broadcast %cst_214 : f32 to vector<2x256xf32>
    %422 = arith.mulf %421, %411 : vector<2x256xf32>
    %423 = arith.addf %422, %420 : vector<2x256xf32>
    %cst_215 = arith.constant 1.250000e+00 : f32
    %424 = vector.broadcast %cst_215 : f32 to vector<2x256xf32>
    %425 = arith.cmpf oge, %423, %424 : vector<2x256xf32>
    %426 = arith.extui %425 : vector<2x256xi1> to vector<2x256xi32>
    %427 = arith.sitofp %426 : vector<2x256xi32> to vector<2x256xf32>
    %cst_216 = arith.constant 1.000000e+00 : f32
    %428 = vector.broadcast %cst_216 : f32 to vector<2x256xf32>
    %429 = arith.subf %428, %427 : vector<2x256xf32>
    %430 = arith.mulf %423, %429 : vector<2x256xf32>
    %c4_i32_217 = arith.constant 4 : i32
    %c2_i32_218 = arith.constant 2 : i32
    %431 = arith.muli %c4_i32_217, %c2_i32_218 : i32
    %432 = arith.truncf %427 : vector<2x256xf32> to vector<2x256xbf16>
    %433 = arith.index_cast %431 : i32 to index
    %c0_219 = arith.constant 0 : index
    %434 = vector.load %arg11[%433, %c0_219] : memref<16x256xbf16, #tpu.memory_space<vmem>>, vector<2x256xbf16>
    tpu.vector_store %arg11[%433, %c0_219], %432 {strides = array<i32>} : memref<16x256xbf16, #tpu.memory_space<vmem>>, vector<2x256xbf16>,
    %435 = arith.index_cast %431 : i32 to index
    %c0_220 = arith.constant 0 : index
    %436 = vector.load %arg8[%435, %c0_220] : memref<16x512xf32, #tpu.memory_space<vmem>>, vector<2x256xf32>
    %cst_221 = arith.constant 7.500000e-01 : f32
    %437 = vector.broadcast %cst_221 : f32 to vector<2x256xf32>
    %438 = arith.mulf %437, %420 : vector<2x256xf32>
    %439 = arith.addf %438, %436 : vector<2x256xf32>
    %cst_222 = arith.constant 9.700000e-01 : f32
    %440 = vector.broadcast %cst_222 : f32 to vector<2x256xf32>
    %441 = arith.mulf %440, %430 : vector<2x256xf32>
    %442 = arith.addf %441, %439 : vector<2x256xf32>
    %cst_223 = arith.constant 1.250000e+00 : f32
    %443 = vector.broadcast %cst_223 : f32 to vector<2x256xf32>
    %444 = arith.cmpf oge, %442, %443 : vector<2x256xf32>
    %445 = arith.extui %444 : vector<2x256xi1> to vector<2x256xi32>
    %446 = arith.sitofp %445 : vector<2x256xi32> to vector<2x256xf32>
    %cst_224 = arith.constant 1.000000e+00 : f32
    %447 = vector.broadcast %cst_224 : f32 to vector<2x256xf32>
    %448 = arith.subf %447, %446 : vector<2x256xf32>
    %449 = arith.mulf %442, %448 : vector<2x256xf32>
    %c5_i32_225 = arith.constant 5 : i32
    %c2_i32_226 = arith.constant 2 : i32
    %450 = arith.muli %c5_i32_225, %c2_i32_226 : i32
    %451 = arith.truncf %446 : vector<2x256xf32> to vector<2x256xbf16>
    %452 = arith.index_cast %450 : i32 to index
    %c0_227 = arith.constant 0 : index
    %453 = vector.load %arg11[%452, %c0_227] : memref<16x256xbf16, #tpu.memory_space<vmem>>, vector<2x256xbf16>
    tpu.vector_store %arg11[%452, %c0_227], %451 {strides = array<i32>} : memref<16x256xbf16, #tpu.memory_space<vmem>>, vector<2x256xbf16>,
    %454 = arith.index_cast %450 : i32 to index
    %c0_228 = arith.constant 0 : index
    %455 = vector.load %arg8[%454, %c0_228] : memref<16x512xf32, #tpu.memory_space<vmem>>, vector<2x256xf32>
    %cst_229 = arith.constant 7.500000e-01 : f32
    %456 = vector.broadcast %cst_229 : f32 to vector<2x256xf32>
    %457 = arith.mulf %456, %439 : vector<2x256xf32>
    %458 = arith.addf %457, %455 : vector<2x256xf32>
    %cst_230 = arith.constant 9.700000e-01 : f32
    %459 = vector.broadcast %cst_230 : f32 to vector<2x256xf32>
    %460 = arith.mulf %459, %449 : vector<2x256xf32>
    %461 = arith.addf %460, %458 : vector<2x256xf32>
    %cst_231 = arith.constant 1.250000e+00 : f32
    %462 = vector.broadcast %cst_231 : f32 to vector<2x256xf32>
    %463 = arith.cmpf oge, %461, %462 : vector<2x256xf32>
    %464 = arith.extui %463 : vector<2x256xi1> to vector<2x256xi32>
    %465 = arith.sitofp %464 : vector<2x256xi32> to vector<2x256xf32>
    %cst_232 = arith.constant 1.000000e+00 : f32
    %466 = vector.broadcast %cst_232 : f32 to vector<2x256xf32>
    %467 = arith.subf %466, %465 : vector<2x256xf32>
    %468 = arith.mulf %461, %467 : vector<2x256xf32>
    %c6_i32_233 = arith.constant 6 : i32
    %c2_i32_234 = arith.constant 2 : i32
    %469 = arith.muli %c6_i32_233, %c2_i32_234 : i32
    %470 = arith.truncf %465 : vector<2x256xf32> to vector<2x256xbf16>
    %471 = arith.index_cast %469 : i32 to index
    %c0_235 = arith.constant 0 : index
    %472 = vector.load %arg11[%471, %c0_235] : memref<16x256xbf16, #tpu.memory_space<vmem>>, vector<2x256xbf16>
    tpu.vector_store %arg11[%471, %c0_235], %470 {strides = array<i32>} : memref<16x256xbf16, #tpu.memory_space<vmem>>, vector<2x256xbf16>,
    %473 = arith.index_cast %469 : i32 to index
    %c0_236 = arith.constant 0 : index
    %474 = vector.load %arg8[%473, %c0_236] : memref<16x512xf32, #tpu.memory_space<vmem>>, vector<2x256xf32>
    %cst_237 = arith.constant 7.500000e-01 : f32
    %475 = vector.broadcast %cst_237 : f32 to vector<2x256xf32>
    %476 = arith.mulf %475, %458 : vector<2x256xf32>
    %477 = arith.addf %476, %474 : vector<2x256xf32>
    %cst_238 = arith.constant 9.700000e-01 : f32
    %478 = vector.broadcast %cst_238 : f32 to vector<2x256xf32>
    %479 = arith.mulf %478, %468 : vector<2x256xf32>
    %480 = arith.addf %479, %477 : vector<2x256xf32>
    %cst_239 = arith.constant 1.250000e+00 : f32
    %481 = vector.broadcast %cst_239 : f32 to vector<2x256xf32>
    %482 = arith.cmpf oge, %480, %481 : vector<2x256xf32>
    %483 = arith.extui %482 : vector<2x256xi1> to vector<2x256xi32>
    %484 = arith.sitofp %483 : vector<2x256xi32> to vector<2x256xf32>
    %cst_240 = arith.constant 1.000000e+00 : f32
    %485 = vector.broadcast %cst_240 : f32 to vector<2x256xf32>
    %486 = arith.subf %485, %484 : vector<2x256xf32>
    %487 = arith.mulf %480, %486 : vector<2x256xf32>
    %c7_i32_241 = arith.constant 7 : i32
    %c2_i32_242 = arith.constant 2 : i32
    %488 = arith.muli %c7_i32_241, %c2_i32_242 : i32
    %489 = arith.truncf %484 : vector<2x256xf32> to vector<2x256xbf16>
    %490 = arith.index_cast %488 : i32 to index
    %c0_243 = arith.constant 0 : index
    %491 = vector.load %arg11[%490, %c0_243] : memref<16x256xbf16, #tpu.memory_space<vmem>>, vector<2x256xbf16>
    tpu.vector_store %arg11[%490, %c0_243], %489 {strides = array<i32>} : memref<16x256xbf16, #tpu.memory_space<vmem>>, vector<2x256xbf16>,
    %492 = arith.index_cast %488 : i32 to index
    %c0_244 = arith.constant 0 : index
    %493 = vector.load %arg8[%492, %c0_244] : memref<16x512xf32, #tpu.memory_space<vmem>>, vector<2x256xf32>
    %cst_245 = arith.constant 7.500000e-01 : f32
    %494 = vector.broadcast %cst_245 : f32 to vector<2x256xf32>
    %495 = arith.mulf %494, %477 : vector<2x256xf32>
    %496 = arith.addf %495, %493 : vector<2x256xf32>
    %cst_246 = arith.constant 9.700000e-01 : f32
    %497 = vector.broadcast %cst_246 : f32 to vector<2x256xf32>
    %498 = arith.mulf %497, %487 : vector<2x256xf32>
    %499 = arith.addf %498, %496 : vector<2x256xf32>
    %cst_247 = arith.constant 1.250000e+00 : f32
    %500 = vector.broadcast %cst_247 : f32 to vector<2x256xf32>
    %501 = arith.cmpf oge, %499, %500 : vector<2x256xf32>
    %502 = arith.extui %501 : vector<2x256xi1> to vector<2x256xi32>
    %503 = arith.sitofp %502 : vector<2x256xi32> to vector<2x256xf32>
    %cst_248 = arith.constant 1.000000e+00 : f32
    %504 = vector.broadcast %cst_248 : f32 to vector<2x256xf32>
    %505 = arith.subf %504, %503 : vector<2x256xf32>
    %506 = arith.mulf %499, %505 : vector<2x256xf32>
    %c8_i32_249 = arith.constant 8 : i32
    %c0_250 = arith.constant 0 : index
    %c0_251 = arith.constant 0 : index
    %c0_252 = arith.constant 0 : index
    %507 = vector.load %arg14[%c0_250, %c0_251, %c0_252] : memref<3x2x256xf32, #tpu.memory_space<vmem>>, vector<1x2x256xf32>
    %508 = vector.shape_cast %507 : vector<1x2x256xf32> to vector<2x256xf32>
    %509 = vector.shape_cast %496 : vector<2x256xf32> to vector<1x2x256xf32>
    tpu.vector_store %arg14[%c0_250, %c0_251, %c0_252], %509 {strides = array<i32>} : memref<3x2x256xf32, #tpu.memory_space<vmem>>, vector<1x2x256xf32>,
    %c1_253 = arith.constant 1 : index
    %c0_254 = arith.constant 0 : index
    %c0_255 = arith.constant 0 : index
    %510 = vector.load %arg14[%c1_253, %c0_254, %c0_255] : memref<3x2x256xf32, #tpu.memory_space<vmem>>, vector<1x2x256xf32>
    %511 = vector.shape_cast %510 : vector<1x2x256xf32> to vector<2x256xf32>
    %512 = vector.shape_cast %506 : vector<2x256xf32> to vector<1x2x256xf32>
    tpu.vector_store %arg14[%c1_253, %c0_254, %c0_255], %512 {strides = array<i32>} : memref<3x2x256xf32, #tpu.memory_space<vmem>>, vector<1x2x256xf32>,
    %c2_256 = arith.constant 2 : index
    %c0_257 = arith.constant 0 : index
    %c0_258 = arith.constant 0 : index
    %513 = vector.load %arg14[%c2_256, %c0_257, %c0_258] : memref<3x2x256xf32, #tpu.memory_space<vmem>>, vector<1x2x256xf32>
    %514 = vector.shape_cast %513 : vector<1x2x256xf32> to vector<2x256xf32>
    %515 = vector.shape_cast %503 : vector<2x256xf32> to vector<1x2x256xf32>
    tpu.vector_store %arg14[%c2_256, %c0_257, %c0_258], %515 {strides = array<i32>} : memref<3x2x256xf32, #tpu.memory_space<vmem>>, vector<1x2x256xf32>,
    %c0_259 = arith.constant 0 : index
    %c128 = arith.constant 128 : index
    %516 = vector.load %arg11[%c0_259, %c128] : memref<16x256xbf16, #tpu.memory_space<vmem>>, vector<16x128xbf16>
    %c0_260 = arith.constant 0 : index
    %c0_261 = arith.constant 0 : index
    %517 = vector.load %arg7[%c0_260, %c0_261] : memref<16x128xbf16, #tpu.memory_space<vmem>>, vector<16x128xbf16>
    tpu.vector_store %arg7[%c0_260, %c0_261], %516 {strides = array<i32>} : memref<16x128xbf16, #tpu.memory_space<vmem>>, vector<16x128xbf16>,
    %c0_262 = arith.constant 0 : index
    %c0_263 = arith.constant 0 : index
    %518 = vector.load %arg11[%c0_262, %c0_263] : memref<16x256xbf16, #tpu.memory_space<vmem>>, vector<16x128xbf16>
    %c0_264 = arith.constant 0 : index
    %c0_265 = arith.constant 0 : index
    %519 = vector.load %arg5[%c0_264, %c0_265] : memref<128x128xbf16, #tpu.memory_space<vmem>>, vector<128x128xbf16>
    %cst_266 = arith.constant dense<0.000000e+00> : vector<16x128xf32>
    %520 = tpu.matmul %518, %519, %cst_266 {dimension_numbers = #tpu.dot_dimension_numbers<[1], [0], [0], [1], [0, 0, 1, 1], [], []>} : vector<16x128xbf16>, vector<128x128xbf16>, vector<16x128xf32> -> vector<16x128xf32>
    %c0_267 = arith.constant 0 : index
    %c0_268 = arith.constant 0 : index
    %521 = vector.load %arg8[%c0_267, %c0_268] : memref<16x512xf32, #tpu.memory_space<vmem>>, vector<16x128xf32>
    tpu.vector_store %arg8[%c0_267, %c0_268], %520 {strides = array<i32>} : memref<16x512xf32, #tpu.memory_space<vmem>>, vector<16x128xf32>,
    %c0_269 = arith.constant 0 : index
    %c0_270 = arith.constant 0 : index
    %c0_271 = arith.constant 0 : index
    %522 = vector.load %arg15[%c0_269, %c0_270, %c0_271] : memref<3x2x128xf32, #tpu.memory_space<vmem>>, vector<1x2x128xf32>
    %523 = vector.shape_cast %522 : vector<1x2x128xf32> to vector<2x128xf32>
    %c1_272 = arith.constant 1 : index
    %c0_273 = arith.constant 0 : index
    %c0_274 = arith.constant 0 : index
    %524 = vector.load %arg15[%c1_272, %c0_273, %c0_274] : memref<3x2x128xf32, #tpu.memory_space<vmem>>, vector<1x2x128xf32>
    %525 = vector.shape_cast %524 : vector<1x2x128xf32> to vector<2x128xf32>
    %c2_275 = arith.constant 2 : index
    %c0_276 = arith.constant 0 : index
    %c0_277 = arith.constant 0 : index
    %526 = vector.load %arg15[%c2_275, %c0_276, %c0_277] : memref<3x2x128xf32, #tpu.memory_space<vmem>>, vector<1x2x128xf32>
    %527 = vector.shape_cast %526 : vector<1x2x128xf32> to vector<2x128xf32>
    %c0_i32_278 = arith.constant 0 : i32
    %c2_i32_279 = arith.constant 2 : i32
    %528 = arith.muli %c0_i32_278, %c2_i32_279 : i32
    %529 = arith.truncf %527 : vector<2x128xf32> to vector<2x128xbf16>
    %530 = arith.index_cast %528 : i32 to index
    %c0_280 = arith.constant 0 : index
    %531 = vector.load %arg6[%530, %c0_280] : memref<16x128xbf16, #tpu.memory_space<vmem>>, vector<2x128xbf16>
    tpu.vector_store %arg6[%530, %c0_280], %529 {strides = array<i32>} : memref<16x128xbf16, #tpu.memory_space<vmem>>, vector<2x128xbf16>,
    %532 = arith.index_cast %528 : i32 to index
    %c0_281 = arith.constant 0 : index
    %533 = vector.load %arg8[%532, %c0_281] : memref<16x512xf32, #tpu.memory_space<vmem>>, vector<2x128xf32>
    %cst_282 = arith.constant 7.500000e-01 : f32
    %534 = vector.broadcast %cst_282 : f32 to vector<2x128xf32>
    %535 = arith.mulf %534, %523 : vector<2x128xf32>
    %536 = arith.addf %535, %533 : vector<2x128xf32>
    %cst_283 = arith.constant 9.700000e-01 : f32
    %537 = vector.broadcast %cst_283 : f32 to vector<2x128xf32>
    %538 = arith.mulf %537, %525 : vector<2x128xf32>
    %539 = arith.addf %538, %536 : vector<2x128xf32>
    %cst_284 = arith.constant 1.250000e+00 : f32
    %540 = vector.broadcast %cst_284 : f32 to vector<2x128xf32>
    %541 = arith.cmpf oge, %539, %540 : vector<2x128xf32>
    %542 = arith.extui %541 : vector<2x128xi1> to vector<2x128xi32>
    %543 = arith.sitofp %542 : vector<2x128xi32> to vector<2x128xf32>
    %cst_285 = arith.constant 1.000000e+00 : f32
    %544 = vector.broadcast %cst_285 : f32 to vector<2x128xf32>
    %545 = arith.subf %544, %543 : vector<2x128xf32>
    %546 = arith.mulf %539, %545 : vector<2x128xf32>
    %c1_i32_286 = arith.constant 1 : i32
    %c2_i32_287 = arith.constant 2 : i32
    %547 = arith.muli %c1_i32_286, %c2_i32_287 : i32
    %548 = arith.truncf %543 : vector<2x128xf32> to vector<2x128xbf16>
    %549 = arith.index_cast %547 : i32 to index
    %c0_288 = arith.constant 0 : index
    %550 = vector.load %arg6[%549, %c0_288] : memref<16x128xbf16, #tpu.memory_space<vmem>>, vector<2x128xbf16>
    tpu.vector_store %arg6[%549, %c0_288], %548 {strides = array<i32>} : memref<16x128xbf16, #tpu.memory_space<vmem>>, vector<2x128xbf16>,
    %551 = arith.index_cast %547 : i32 to index
    %c0_289 = arith.constant 0 : index
    %552 = vector.load %arg8[%551, %c0_289] : memref<16x512xf32, #tpu.memory_space<vmem>>, vector<2x128xf32>
    %cst_290 = arith.constant 7.500000e-01 : f32
    %553 = vector.broadcast %cst_290 : f32 to vector<2x128xf32>
    %554 = arith.mulf %553, %536 : vector<2x128xf32>
    %555 = arith.addf %554, %552 : vector<2x128xf32>
    %cst_291 = arith.constant 9.700000e-01 : f32
    %556 = vector.broadcast %cst_291 : f32 to vector<2x128xf32>
    %557 = arith.mulf %556, %546 : vector<2x128xf32>
    %558 = arith.addf %557, %555 : vector<2x128xf32>
    %cst_292 = arith.constant 1.250000e+00 : f32
    %559 = vector.broadcast %cst_292 : f32 to vector<2x128xf32>
    %560 = arith.cmpf oge, %558, %559 : vector<2x128xf32>
    %561 = arith.extui %560 : vector<2x128xi1> to vector<2x128xi32>
    %562 = arith.sitofp %561 : vector<2x128xi32> to vector<2x128xf32>
    %cst_293 = arith.constant 1.000000e+00 : f32
    %563 = vector.broadcast %cst_293 : f32 to vector<2x128xf32>
    %564 = arith.subf %563, %562 : vector<2x128xf32>
    %565 = arith.mulf %558, %564 : vector<2x128xf32>
    %c2_i32_294 = arith.constant 2 : i32
    %c2_i32_295 = arith.constant 2 : i32
    %566 = arith.muli %c2_i32_294, %c2_i32_295 : i32
    %567 = arith.truncf %562 : vector<2x128xf32> to vector<2x128xbf16>
    %568 = arith.index_cast %566 : i32 to index
    %c0_296 = arith.constant 0 : index
    %569 = vector.load %arg6[%568, %c0_296] : memref<16x128xbf16, #tpu.memory_space<vmem>>, vector<2x128xbf16>
    tpu.vector_store %arg6[%568, %c0_296], %567 {strides = array<i32>} : memref<16x128xbf16, #tpu.memory_space<vmem>>, vector<2x128xbf16>,
    %570 = arith.index_cast %566 : i32 to index
    %c0_297 = arith.constant 0 : index
    %571 = vector.load %arg8[%570, %c0_297] : memref<16x512xf32, #tpu.memory_space<vmem>>, vector<2x128xf32>
    %cst_298 = arith.constant 7.500000e-01 : f32
    %572 = vector.broadcast %cst_298 : f32 to vector<2x128xf32>
    %573 = arith.mulf %572, %555 : vector<2x128xf32>
    %574 = arith.addf %573, %571 : vector<2x128xf32>
    %cst_299 = arith.constant 9.700000e-01 : f32
    %575 = vector.broadcast %cst_299 : f32 to vector<2x128xf32>
    %576 = arith.mulf %575, %565 : vector<2x128xf32>
    %577 = arith.addf %576, %574 : vector<2x128xf32>
    %cst_300 = arith.constant 1.250000e+00 : f32
    %578 = vector.broadcast %cst_300 : f32 to vector<2x128xf32>
    %579 = arith.cmpf oge, %577, %578 : vector<2x128xf32>
    %580 = arith.extui %579 : vector<2x128xi1> to vector<2x128xi32>
    %581 = arith.sitofp %580 : vector<2x128xi32> to vector<2x128xf32>
    %cst_301 = arith.constant 1.000000e+00 : f32
    %582 = vector.broadcast %cst_301 : f32 to vector<2x128xf32>
    %583 = arith.subf %582, %581 : vector<2x128xf32>
    %584 = arith.mulf %577, %583 : vector<2x128xf32>
    %c3_i32_302 = arith.constant 3 : i32
    %c2_i32_303 = arith.constant 2 : i32
    %585 = arith.muli %c3_i32_302, %c2_i32_303 : i32
    %586 = arith.truncf %581 : vector<2x128xf32> to vector<2x128xbf16>
    %587 = arith.index_cast %585 : i32 to index
    %c0_304 = arith.constant 0 : index
    %588 = vector.load %arg6[%587, %c0_304] : memref<16x128xbf16, #tpu.memory_space<vmem>>, vector<2x128xbf16>
    tpu.vector_store %arg6[%587, %c0_304], %586 {strides = array<i32>} : memref<16x128xbf16, #tpu.memory_space<vmem>>, vector<2x128xbf16>,
    %589 = arith.index_cast %585 : i32 to index
    %c0_305 = arith.constant 0 : index
    %590 = vector.load %arg8[%589, %c0_305] : memref<16x512xf32, #tpu.memory_space<vmem>>, vector<2x128xf32>
    %cst_306 = arith.constant 7.500000e-01 : f32
    %591 = vector.broadcast %cst_306 : f32 to vector<2x128xf32>
    %592 = arith.mulf %591, %574 : vector<2x128xf32>
    %593 = arith.addf %592, %590 : vector<2x128xf32>
    %cst_307 = arith.constant 9.700000e-01 : f32
    %594 = vector.broadcast %cst_307 : f32 to vector<2x128xf32>
    %595 = arith.mulf %594, %584 : vector<2x128xf32>
    %596 = arith.addf %595, %593 : vector<2x128xf32>
    %cst_308 = arith.constant 1.250000e+00 : f32
    %597 = vector.broadcast %cst_308 : f32 to vector<2x128xf32>
    %598 = arith.cmpf oge, %596, %597 : vector<2x128xf32>
    %599 = arith.extui %598 : vector<2x128xi1> to vector<2x128xi32>
    %600 = arith.sitofp %599 : vector<2x128xi32> to vector<2x128xf32>
    %cst_309 = arith.constant 1.000000e+00 : f32
    %601 = vector.broadcast %cst_309 : f32 to vector<2x128xf32>
    %602 = arith.subf %601, %600 : vector<2x128xf32>
    %603 = arith.mulf %596, %602 : vector<2x128xf32>
    %c4_i32_310 = arith.constant 4 : i32
    %c2_i32_311 = arith.constant 2 : i32
    %604 = arith.muli %c4_i32_310, %c2_i32_311 : i32
    %605 = arith.truncf %600 : vector<2x128xf32> to vector<2x128xbf16>
    %606 = arith.index_cast %604 : i32 to index
    %c0_312 = arith.constant 0 : index
    %607 = vector.load %arg6[%606, %c0_312] : memref<16x128xbf16, #tpu.memory_space<vmem>>, vector<2x128xbf16>
    tpu.vector_store %arg6[%606, %c0_312], %605 {strides = array<i32>} : memref<16x128xbf16, #tpu.memory_space<vmem>>, vector<2x128xbf16>,
    %608 = arith.index_cast %604 : i32 to index
    %c0_313 = arith.constant 0 : index
    %609 = vector.load %arg8[%608, %c0_313] : memref<16x512xf32, #tpu.memory_space<vmem>>, vector<2x128xf32>
    %cst_314 = arith.constant 7.500000e-01 : f32
    %610 = vector.broadcast %cst_314 : f32 to vector<2x128xf32>
    %611 = arith.mulf %610, %593 : vector<2x128xf32>
    %612 = arith.addf %611, %609 : vector<2x128xf32>
    %cst_315 = arith.constant 9.700000e-01 : f32
    %613 = vector.broadcast %cst_315 : f32 to vector<2x128xf32>
    %614 = arith.mulf %613, %603 : vector<2x128xf32>
    %615 = arith.addf %614, %612 : vector<2x128xf32>
    %cst_316 = arith.constant 1.250000e+00 : f32
    %616 = vector.broadcast %cst_316 : f32 to vector<2x128xf32>
    %617 = arith.cmpf oge, %615, %616 : vector<2x128xf32>
    %618 = arith.extui %617 : vector<2x128xi1> to vector<2x128xi32>
    %619 = arith.sitofp %618 : vector<2x128xi32> to vector<2x128xf32>
    %cst_317 = arith.constant 1.000000e+00 : f32
    %620 = vector.broadcast %cst_317 : f32 to vector<2x128xf32>
    %621 = arith.subf %620, %619 : vector<2x128xf32>
    %622 = arith.mulf %615, %621 : vector<2x128xf32>
    %c5_i32_318 = arith.constant 5 : i32
    %c2_i32_319 = arith.constant 2 : i32
    %623 = arith.muli %c5_i32_318, %c2_i32_319 : i32
    %624 = arith.truncf %619 : vector<2x128xf32> to vector<2x128xbf16>
    %625 = arith.index_cast %623 : i32 to index
    %c0_320 = arith.constant 0 : index
    %626 = vector.load %arg6[%625, %c0_320] : memref<16x128xbf16, #tpu.memory_space<vmem>>, vector<2x128xbf16>
    tpu.vector_store %arg6[%625, %c0_320], %624 {strides = array<i32>} : memref<16x128xbf16, #tpu.memory_space<vmem>>, vector<2x128xbf16>,
    %627 = arith.index_cast %623 : i32 to index
    %c0_321 = arith.constant 0 : index
    %628 = vector.load %arg8[%627, %c0_321] : memref<16x512xf32, #tpu.memory_space<vmem>>, vector<2x128xf32>
    %cst_322 = arith.constant 7.500000e-01 : f32
    %629 = vector.broadcast %cst_322 : f32 to vector<2x128xf32>
    %630 = arith.mulf %629, %612 : vector<2x128xf32>
    %631 = arith.addf %630, %628 : vector<2x128xf32>
    %cst_323 = arith.constant 9.700000e-01 : f32
    %632 = vector.broadcast %cst_323 : f32 to vector<2x128xf32>
    %633 = arith.mulf %632, %622 : vector<2x128xf32>
    %634 = arith.addf %633, %631 : vector<2x128xf32>
    %cst_324 = arith.constant 1.250000e+00 : f32
    %635 = vector.broadcast %cst_324 : f32 to vector<2x128xf32>
    %636 = arith.cmpf oge, %634, %635 : vector<2x128xf32>
    %637 = arith.extui %636 : vector<2x128xi1> to vector<2x128xi32>
    %638 = arith.sitofp %637 : vector<2x128xi32> to vector<2x128xf32>
    %cst_325 = arith.constant 1.000000e+00 : f32
    %639 = vector.broadcast %cst_325 : f32 to vector<2x128xf32>
    %640 = arith.subf %639, %638 : vector<2x128xf32>
    %641 = arith.mulf %634, %640 : vector<2x128xf32>
    %c6_i32_326 = arith.constant 6 : i32
    %c2_i32_327 = arith.constant 2 : i32
    %642 = arith.muli %c6_i32_326, %c2_i32_327 : i32
    %643 = arith.truncf %638 : vector<2x128xf32> to vector<2x128xbf16>
    %644 = arith.index_cast %642 : i32 to index
    %c0_328 = arith.constant 0 : index
    %645 = vector.load %arg6[%644, %c0_328] : memref<16x128xbf16, #tpu.memory_space<vmem>>, vector<2x128xbf16>
    tpu.vector_store %arg6[%644, %c0_328], %643 {strides = array<i32>} : memref<16x128xbf16, #tpu.memory_space<vmem>>, vector<2x128xbf16>,
    %646 = arith.index_cast %642 : i32 to index
    %c0_329 = arith.constant 0 : index
    %647 = vector.load %arg8[%646, %c0_329] : memref<16x512xf32, #tpu.memory_space<vmem>>, vector<2x128xf32>
    %cst_330 = arith.constant 7.500000e-01 : f32
    %648 = vector.broadcast %cst_330 : f32 to vector<2x128xf32>
    %649 = arith.mulf %648, %631 : vector<2x128xf32>
    %650 = arith.addf %649, %647 : vector<2x128xf32>
    %cst_331 = arith.constant 9.700000e-01 : f32
    %651 = vector.broadcast %cst_331 : f32 to vector<2x128xf32>
    %652 = arith.mulf %651, %641 : vector<2x128xf32>
    %653 = arith.addf %652, %650 : vector<2x128xf32>
    %cst_332 = arith.constant 1.250000e+00 : f32
    %654 = vector.broadcast %cst_332 : f32 to vector<2x128xf32>
    %655 = arith.cmpf oge, %653, %654 : vector<2x128xf32>
    %656 = arith.extui %655 : vector<2x128xi1> to vector<2x128xi32>
    %657 = arith.sitofp %656 : vector<2x128xi32> to vector<2x128xf32>
    %cst_333 = arith.constant 1.000000e+00 : f32
    %658 = vector.broadcast %cst_333 : f32 to vector<2x128xf32>
    %659 = arith.subf %658, %657 : vector<2x128xf32>
    %660 = arith.mulf %653, %659 : vector<2x128xf32>
    %c7_i32_334 = arith.constant 7 : i32
    %c2_i32_335 = arith.constant 2 : i32
    %661 = arith.muli %c7_i32_334, %c2_i32_335 : i32
    %662 = arith.truncf %657 : vector<2x128xf32> to vector<2x128xbf16>
    %663 = arith.index_cast %661 : i32 to index
    %c0_336 = arith.constant 0 : index
    %664 = vector.load %arg6[%663, %c0_336] : memref<16x128xbf16, #tpu.memory_space<vmem>>, vector<2x128xbf16>
    tpu.vector_store %arg6[%663, %c0_336], %662 {strides = array<i32>} : memref<16x128xbf16, #tpu.memory_space<vmem>>, vector<2x128xbf16>,
    %665 = arith.index_cast %661 : i32 to index
    %c0_337 = arith.constant 0 : index
    %666 = vector.load %arg8[%665, %c0_337] : memref<16x512xf32, #tpu.memory_space<vmem>>, vector<2x128xf32>
    %cst_338 = arith.constant 7.500000e-01 : f32
    %667 = vector.broadcast %cst_338 : f32 to vector<2x128xf32>
    %668 = arith.mulf %667, %650 : vector<2x128xf32>
    %669 = arith.addf %668, %666 : vector<2x128xf32>
    %cst_339 = arith.constant 9.700000e-01 : f32
    %670 = vector.broadcast %cst_339 : f32 to vector<2x128xf32>
    %671 = arith.mulf %670, %660 : vector<2x128xf32>
    %672 = arith.addf %671, %669 : vector<2x128xf32>
    %cst_340 = arith.constant 1.250000e+00 : f32
    %673 = vector.broadcast %cst_340 : f32 to vector<2x128xf32>
    %674 = arith.cmpf oge, %672, %673 : vector<2x128xf32>
    %675 = arith.extui %674 : vector<2x128xi1> to vector<2x128xi32>
    %676 = arith.sitofp %675 : vector<2x128xi32> to vector<2x128xf32>
    %cst_341 = arith.constant 1.000000e+00 : f32
    %677 = vector.broadcast %cst_341 : f32 to vector<2x128xf32>
    %678 = arith.subf %677, %676 : vector<2x128xf32>
    %679 = arith.mulf %672, %678 : vector<2x128xf32>
    %c8_i32_342 = arith.constant 8 : i32
    %c0_343 = arith.constant 0 : index
    %c0_344 = arith.constant 0 : index
    %c0_345 = arith.constant 0 : index
    %680 = vector.load %arg15[%c0_343, %c0_344, %c0_345] : memref<3x2x128xf32, #tpu.memory_space<vmem>>, vector<1x2x128xf32>
    %681 = vector.shape_cast %680 : vector<1x2x128xf32> to vector<2x128xf32>
    %682 = vector.shape_cast %669 : vector<2x128xf32> to vector<1x2x128xf32>
    tpu.vector_store %arg15[%c0_343, %c0_344, %c0_345], %682 {strides = array<i32>} : memref<3x2x128xf32, #tpu.memory_space<vmem>>, vector<1x2x128xf32>,
    %c1_346 = arith.constant 1 : index
    %c0_347 = arith.constant 0 : index
    %c0_348 = arith.constant 0 : index
    %683 = vector.load %arg15[%c1_346, %c0_347, %c0_348] : memref<3x2x128xf32, #tpu.memory_space<vmem>>, vector<1x2x128xf32>
    %684 = vector.shape_cast %683 : vector<1x2x128xf32> to vector<2x128xf32>
    %685 = vector.shape_cast %679 : vector<2x128xf32> to vector<1x2x128xf32>
    tpu.vector_store %arg15[%c1_346, %c0_347, %c0_348], %685 {strides = array<i32>} : memref<3x2x128xf32, #tpu.memory_space<vmem>>, vector<1x2x128xf32>,
    %c2_349 = arith.constant 2 : index
    %c0_350 = arith.constant 0 : index
    %c0_351 = arith.constant 0 : index
    %686 = vector.load %arg15[%c2_349, %c0_350, %c0_351] : memref<3x2x128xf32, #tpu.memory_space<vmem>>, vector<1x2x128xf32>
    %687 = vector.shape_cast %686 : vector<1x2x128xf32> to vector<2x128xf32>
    %688 = vector.shape_cast %676 : vector<2x128xf32> to vector<1x2x128xf32>
    tpu.vector_store %arg15[%c2_349, %c0_350, %c0_351], %688 {strides = array<i32>} : memref<3x2x128xf32, #tpu.memory_space<vmem>>, vector<1x2x128xf32>,
    return
  }
  func.func @transform_0(%arg0: i32) -> (i32, i32) {
    %c0_i32 = arith.constant 0 : i32
    %c0_i32_0 = arith.constant 0 : i32
    return %arg0, %c0_i32 : i32, i32
  }
  func.func @transform_1(%arg0: i32) -> (i32, i32) {
    %c0_i32 = arith.constant 0 : i32
    %c0_i32_0 = arith.constant 0 : i32
    %c0_i32_1 = arith.constant 0 : i32
    return %c0_i32, %c0_i32_0 : i32, i32
  }
  func.func @transform_2(%arg0: i32) -> (i32, i32) {
    %c0_i32 = arith.constant 0 : i32
    %c0_i32_0 = arith.constant 0 : i32
    %c0_i32_1 = arith.constant 0 : i32
    return %c0_i32, %c0_i32_0 : i32, i32
  }
  func.func @transform_3(%arg0: i32) -> (i32, i32) {
    %c0_i32 = arith.constant 0 : i32
    %c0_i32_0 = arith.constant 0 : i32
    %c0_i32_1 = arith.constant 0 : i32
    return %c0_i32, %c0_i32_0 : i32, i32
  }
  func.func @transform_4(%arg0: i32) -> (i32, i32) {
    %c0_i32 = arith.constant 0 : i32
    %c0_i32_0 = arith.constant 0 : i32
    %c0_i32_1 = arith.constant 0 : i32
    return %c0_i32, %c0_i32_0 : i32, i32
  }
  func.func @transform_5(%arg0: i32) -> (i32, i32) {
    %c0_i32 = arith.constant 0 : i32
    %c0_i32_0 = arith.constant 0 : i32
    return %arg0, %c0_i32 : i32, i32
  }
  func.func @transform_6(%arg0: i32) -> (i32, i32) {
    %c0_i32 = arith.constant 0 : i32
    %c0_i32_0 = arith.constant 0 : i32
    return %arg0, %c0_i32 : i32, i32
  }
}

</mosaic_0001>

<bundles_post_ra>
// kernel: network_forward.1
= control target key start
LH: loop header
LB: loop body
LE: loop exit
PB: predicated region body
PF: predicated region fallthrough
CT: control target
= control target key end

     0   :  { %12 = vsyncpa [#allocation11], 0  ;;  %s10754_s0 = inlined_call_operand.vmem [shape: bf16[16,2432], index: 0, kind: input, shape index: {}]   ;;  %s10755_s1 = inlined_call_operand.hbm [shape: bf16[2432,512], index: 1, kind: input, shape index: {}]   ;;  %s10756_s2 = inlined_call_operand.hbm [shape: bf16[512,512], index: 2, kind: input, shape index: {}]   ;;  %s10757_s3 = inlined_call_operand.hbm [shape: bf16[512,256], index: 3, kind: input, shape index: {}]   ;;  %s10758_s4 = inlined_call_operand.hbm [shape: bf16[128,128], index: 4, kind: input, shape index: {}]   ;;  %s10759_s5 = inlined_call_operand.vmem [shape: bf16[16,128], index: 5, kind: output, shape index: {0}]   ;;  %s10760_s6 = inlined_call_operand.vmem [shape: bf16[16,128], index: 6, kind: output, shape index: {1}]  }
   0x1   :  { %13 = vsyncpa [#allocation13], 0 }
   0x2   :  { %14 = vsyncpa [#allocation16], 0  ;;  %s10352_s21 = smov [#allocation12]   ;;  %s10353_s23 = smov [#allocation10]  }
   0x3   :  { %s34_s22 = sshll.u32 %s10352_s21, 4  ;;  %s22_s24 = sshll.u32 %s10353_s23, 4  ;;  %s35_s22 = int_to_ptr.vmem [resolvable:$true] %s34_s22  ;;  %s10401_s24 = int_to_ptr.vmem [resolvable:$true] %s22_s24 }
   0x4   :  { %s10258_s27 = scalar_lea.hbm %s10756_s2, 16384 }
   0x5   :  { %p10259_p0 = scmp.ne.s32.totalorder %s10756_s2, %s10258_s27  ;;  %p10262_p1 = scmp.lt.u32.totalorder %s10258_s27, %s10756_s2 }
   0x7   :  { %p10264_p2 = pnand %p10262_p1, %p10259_p0 }
   0x9   :  { %10267 = shalt.err (!%p10264_p2)
}
   0xa   :  { %s10268_s8 = scalar_lea.vmem %s35_s22, 16384  ;;  %p10273_p4 = scmp.lt.s32.totalorder %s35_s22, %s35_s22 }
   0xb   :  { %p10269_p3 = scmp.ne.s32.totalorder %s35_s22, %s10268_s8  ;;  %p10274_p5 = scmp.lt.s32.totalorder %s10268_s8, %s10268_s8 }
   0xd   :  { %p10275_p6 = por %p10274_p5, %p10273_p4 }
   0xf   :  { %p10276_p7 = pnand %p10275_p6, %p10269_p3 }
  0x11   :  { %10279 = shalt.err (!%p10276_p7)
}
  0x12   :  { %s10354_s9 = smov 256   ;;  %s10355_s10 = smov 16  }
  0x13   :  { %40 = dma.hbm_to_vmem [thread:$0]  %s10756_s2, 16384, %s35_s22, [#allocation13], %s10354_s9, %s10354_s9, %s10355_s10  }
  0x14   :  { %s10280_s15 = scalar_lea.hbm %s10755_s1, 77824 }
  0x15   :  { %p10281_p8 = scmp.ne.s32.totalorder %s10755_s1, %s10280_s15  ;;  %p10284_p9 = scmp.lt.u32.totalorder %s10280_s15, %s10755_s1 }
  0x17   :  { %p10286_p10 = pnand %p10284_p9, %p10281_p8 }
  0x19   :  { %10289 = shalt.err (!%p10286_p10)
}
  0x1a   :  { %s10290_s20 = scalar_lea.vmem %s10401_s24, 77824  ;;  %p10295_p12 = scmp.lt.s32.totalorder %s10401_s24, %s10401_s24 }
  0x1b   :  { %p10291_p11 = scmp.ne.s32.totalorder %s10401_s24, %s10290_s20  ;;  %p10296_p13 = scmp.lt.s32.totalorder %s10290_s20, %s10290_s20 }
  0x1d   :  { %p10297_p0 = por %p10296_p13, %p10295_p12 }
  0x1f   :  { %p10298_p1 = pnand %p10297_p0, %p10291_p11 }
  0x21   :  { %10301 = shalt.err (!%p10298_p1)
}
  0x22   :  { %28 = dma.hbm_to_vmem [thread:$0]  %s10755_s1, 77824, %s10401_s24, [#allocation11], %s10354_s9, %s10354_s9, %s10355_s10  }
  0x23   :  { %s10356_s22 = smov [#allocation14]   ;;  %s10302_s27 = scalar_lea.hbm %s10757_s3, 8192 }
  0x24   :  { %s46_s23 = sshll.u32 %s10356_s22, 4  ;;  %p10303_p2 = scmp.ne.s32.totalorder %s10757_s3, %s10302_s27  ;;  %s47_s23 = int_to_ptr.vmem [resolvable:$true] %s46_s23 }
  0x25   :  { %p10306_p3 = scmp.lt.u32.totalorder %s10302_s27, %s10757_s3 }
  0x27   :  { %p10308_p4 = pnand %p10306_p3, %p10303_p2 }
  0x29   :  { %10311 = shalt.err (!%p10308_p4)
}
  0x2a   :  { %s10312_s8 = scalar_lea.vmem %s47_s23, 8192  ;;  %p10317_p6 = scmp.lt.s32.totalorder %s47_s23, %s47_s23 }
  0x2b   :  { %p10313_p5 = scmp.ne.s32.totalorder %s47_s23, %s10312_s8  ;;  %p10318_p7 = scmp.lt.s32.totalorder %s10312_s8, %s10312_s8 }
  0x2d   :  { %p10319_p8 = por %p10318_p7, %p10317_p6 }
  0x2f   :  { %p10320_p9 = pnand %p10319_p8, %p10313_p5 }
  0x31   :  { %10323 = shalt.err (!%p10320_p9)
}
  0x32   :  { %s10357_s1 = smov 128   ;;  %s10358_s24 = smov 8  }
  0x33   :  { %52 = dma.hbm_to_vmem [thread:$0]  %s10757_s3, 8192, %s47_s23, [#allocation13], %s10357_s1, %s10357_s1, %s10358_s24  }
  0x34   :  { %s10359_s11 = smov [#allocation15]   ;;  %s10324_s15 = scalar_lea.hbm %s10758_s4, 1024 }
  0x35   :  { %s58_s12 = sshll.u32 %s10359_s11, 4  ;;  %p10325_p10 = scmp.ne.s32.totalorder %s10758_s4, %s10324_s15  ;;  %s59_s12 = int_to_ptr.vmem [resolvable:$true] %s58_s12 }
  0x36   :  { %p10328_p11 = scmp.lt.u32.totalorder %s10324_s15, %s10758_s4 }
  0x38   :  { %p10330_p12 = pnand %p10328_p11, %p10325_p10 }
  0x3a   :  { %10333 = shalt.err (!%p10330_p12)
}
  0x3b   :  { %s10334_s20 = scalar_lea.vmem %s59_s12, 1024  ;;  %p10339_p0 = scmp.lt.s32.totalorder %s59_s12, %s59_s12 }
  0x3c   :  { %p10335_p13 = scmp.ne.s32.totalorder %s59_s12, %s10334_s20  ;;  %p10340_p1 = scmp.lt.s32.totalorder %s10334_s20, %s10334_s20 }
  0x3e   :  { %p10341_p2 = por %p10340_p1, %p10339_p0 }
  0x40   :  { %p10342_p3 = pnand %p10341_p2, %p10335_p13 }
  0x42   :  { %10345 = shalt.err (!%p10342_p3)
}
  0x43   :  { %s10360_s3 = smov 64   ;;  %s10361_s2 = smov 4  }
  0x44   :  { %64 = dma.hbm_to_vmem [thread:$0]  %s10758_s4, 1024, %s59_s12, [#allocation16], %s10360_s3, %s10360_s3, %s10361_s2  }
  0x45   :  { %10346 = dma.done.wait [#allocation11], 77824  }
  0x46   :  { %10347 = vsyncadd [#allocation11], 4294889472 }
  0x47   :  { %10348 = dma.done.wait [#allocation13], 24576  }
  0x48   :  { %10349 = vsyncadd [#allocation13], 4294942720 }
  0x49   :  { %10350 = dma.done.wait [#allocation16], 1024  }
  0x4a   :  { %10351 = vsyncadd [#allocation16], 4294966272  ;;  %v9012_v0 = vld [vmem:[#allocation10 + $0x4] ss:$16 sps:$4 sm:$0xff]   ;;  %v9016_v2 = vld [vmem:[#allocation10] ss:$16 sps:$4 sm:$0xff]  }
  0x4b   :  { %v9014_v1 = vld [vmem:[#allocation10 + $0x204] ss:$16 sps:$4 sm:$0xff]   ;;  %3858 = vmatprep.subr.bf16.mxu1 %v9012_v0  ;;  %v9017_v3 = vld [vmem:[#allocation10 + $0x200] ss:$16 sps:$4 sm:$0xff]   ;;  %vm10365_vm14 = vmmov 0  }
  0x4c   :  { %3901 = vmatprep.subr.bf16.mxu0 %v9014_v1  ;;  %v9018_v4 = vld [vmem:[#allocation10 + $0x24] ss:$16 sps:$4 sm:$0xff]   ;;  %3859 = vmatpush1.bf16.msra.mxu1 %v9016_v2  ;;  %v9022_v6 = vld [vmem:[#allocation10 + $0x20] ss:$16 sps:$4 sm:$0xff]  }
  0x4d   :  { %3902 = vmatpush1.bf16.msra.mxu0 %v9017_v3  ;;  %v9020_v5 = vld [vmem:[#allocation10 + $0x224] ss:$16 sps:$4 sm:$0xff]   ;;  %3860 = vmatprep.subr.bf16.mxu1 %v9018_v4  ;;  %v9023_v7 = vld [vmem:[#allocation10 + $0x220] ss:$16 sps:$4 sm:$0xff]   ;;  %v9119_v3 = vld [vmem:[#allocation10 + $0xc] ss:$16 sps:$4 sm:$0xff]  }
  0x4e   :  { %3903 = vmatprep.subr.bf16.mxu0 %v9020_v5  ;;  %v9024_v8 = vld [vmem:[#allocation10 + $0x44] ss:$16 sps:$4 sm:$0xff]   ;;  %v9028_v10 = vld [vmem:[#allocation10 + $0x40] ss:$16 sps:$4 sm:$0xff]  }
  0x4f   :  { %v9026_v9 = vld [vmem:[#allocation10 + $0x244] ss:$16 sps:$4 sm:$0xff]   ;;  %v9029_v11 = vld [vmem:[#allocation10 + $0x240] ss:$16 sps:$4 sm:$0xff]  }
  0x50   :  { %3861 = vmatpush1.bf16.msra.mxu1 %v9022_v6  ;;  %v9030_v12 = vld [vmem:[#allocation10 + $0x64] ss:$16 sps:$4 sm:$0xff]   ;;  %v9034_v14 = vld [vmem:[#allocation10 + $0x60] ss:$16 sps:$4 sm:$0xff]  }
  0x51   :  { %3904 = vmatpush1.bf16.msra.mxu0 %v9023_v7  ;;  %3862 = vmatprep.subr.bf16.mxu1 %v9024_v8  ;;  %v9032_v13 = vld [vmem:[#allocation10 + $0x264] ss:$16 sps:$4 sm:$0xff]   ;;  %v9035_v15 = vld [vmem:[#allocation10 + $0x260] ss:$16 sps:$4 sm:$0xff]   ;;  %v9117_v7 = vld [vmem:[#allocation10 + $0x8] ss:$16 sps:$4 sm:$0xff]  }
  0x52   :  { %3905 = vmatprep.subr.bf16.mxu0 %v9026_v9  ;;  %v9036_v16 = vld [vmem:[#allocation10 + $0x84] ss:$16 sps:$4 sm:$0xff]   ;;  %v9040_v18 = vld [vmem:[#allocation10 + $0x80] ss:$16 sps:$4 sm:$0xff]   ;;  %v9125_v9 = vld [vmem:[#allocation10 + $0x2c] ss:$16 sps:$4 sm:$0xff]  }
  0x53   :  { %v9038_v17 = vld [vmem:[#allocation10 + $0x284] ss:$16 sps:$4 sm:$0xff]   ;;  %v9041_v19 = vld [vmem:[#allocation10 + $0x280] ss:$16 sps:$4 sm:$0xff]  }
  0x54   :  { %3863 = vmatpush1.bf16.msra.mxu1 %v9028_v10  ;;  %v9042_v20 = vld [vmem:[#allocation10 + $0xa4] ss:$16 sps:$4 sm:$0xff]   ;;  %v9046_v22 = vld [vmem:[#allocation10 + $0xa0] ss:$16 sps:$4 sm:$0xff]  }
  0x55   :  { %3906 = vmatpush1.bf16.msra.mxu0 %v9029_v11  ;;  %3864 = vmatprep.subr.bf16.mxu1 %v9030_v12  ;;  %v9044_v21 = vld [vmem:[#allocation10 + $0x2a4] ss:$16 sps:$4 sm:$0xff]   ;;  %v9047_v23 = vld [vmem:[#allocation10 + $0x2a0] ss:$16 sps:$4 sm:$0xff]   ;;  %v9123_v11 = vld [vmem:[#allocation10 + $0x28] ss:$16 sps:$4 sm:$0xff]  }
  0x56   :  { %3907 = vmatprep.subr.bf16.mxu0 %v9032_v13  ;;  %v9048_v24 = vld [vmem:[#allocation10 + $0xc4] ss:$16 sps:$4 sm:$0xff]   ;;  %v9052_v26 = vld [vmem:[#allocation10 + $0xc0] ss:$16 sps:$4 sm:$0xff]   ;;  %v9131_v13 = vld [vmem:[#allocation10 + $0x4c] ss:$16 sps:$4 sm:$0xff]  }
  0x57   :  { %v9050_v25 = vld [vmem:[#allocation10 + $0x2c4] ss:$16 sps:$4 sm:$0xff]   ;;  %v9053_v27 = vld [vmem:[#allocation10 + $0x2c0] ss:$16 sps:$4 sm:$0xff]  }
  0x58   :  { %3865 = vmatpush1.bf16.msra.mxu1 %v9034_v14  ;;  %v9054_v28 = vld [vmem:[#allocation10 + $0xe4] ss:$16 sps:$4 sm:$0xff]   ;;  %v9058_v30 = vld [vmem:[#allocation10 + $0xe0] ss:$16 sps:$4 sm:$0xff]  }
  0x59   :  { %3908 = vmatpush1.bf16.msra.mxu0 %v9035_v15  ;;  %3866 = vmatprep.subr.bf16.mxu1 %v9036_v16  ;;  %v9056_v29 = vld [vmem:[#allocation10 + $0x2e4] ss:$16 sps:$4 sm:$0xff]   ;;  %v9059_v31 = vld [vmem:[#allocation10 + $0x2e0] ss:$16 sps:$4 sm:$0xff]   ;;  %v9129_v15 = vld [vmem:[#allocation10 + $0x48] ss:$16 sps:$4 sm:$0xff]  }
  0x5a   :  { %3909 = vmatprep.subr.bf16.mxu0 %v9038_v17  ;;  %v9060_v32 = vld [vmem:[#allocation10 + $0x104] ss:$16 sps:$4 sm:$0xff]   ;;  %v9064_v34 = vld [vmem:[#allocation10 + $0x100] ss:$16 sps:$4 sm:$0xff]   ;;  %v9137_v17 = vld [vmem:[#allocation10 + $0x6c] ss:$16 sps:$4 sm:$0xff]  }
  0x5b   :  { %v9062_v33 = vld [vmem:[#allocation10 + $0x304] ss:$16 sps:$4 sm:$0xff]   ;;  %v9065_v35 = vld [vmem:[#allocation10 + $0x300] ss:$16 sps:$4 sm:$0xff]  }
  0x5c   :  { %3867 = vmatpush1.bf16.msra.mxu1 %v9040_v18  ;;  %v9066_v36 = vld [vmem:[#allocation10 + $0x124] ss:$16 sps:$4 sm:$0xff]   ;;  %v9070_v38 = vld [vmem:[#allocation10 + $0x120] ss:$16 sps:$4 sm:$0xff]  }
  0x5d   :  { %3910 = vmatpush1.bf16.msra.mxu0 %v9041_v19  ;;  %3868 = vmatprep.subr.bf16.mxu1 %v9042_v20  ;;  %v9068_v37 = vld [vmem:[#allocation10 + $0x324] ss:$16 sps:$4 sm:$0xff]   ;;  %v9071_v39 = vld [vmem:[#allocation10 + $0x320] ss:$16 sps:$4 sm:$0xff]   ;;  %v9135_v19 = vld [vmem:[#allocation10 + $0x68] ss:$16 sps:$4 sm:$0xff]  }
  0x5e   :  { %3911 = vmatprep.subr.bf16.mxu0 %v9044_v21  ;;  %v9072_v40 = vld [vmem:[#allocation10 + $0x144] ss:$16 sps:$4 sm:$0xff]   ;;  %v9076_v42 = vld [vmem:[#allocation10 + $0x140] ss:$16 sps:$4 sm:$0xff]   ;;  %v9143_v21 = vld [vmem:[#allocation10 + $0x8c] ss:$16 sps:$4 sm:$0xff]  }
  0x5f   :  { %v9074_v41 = vld [vmem:[#allocation10 + $0x344] ss:$16 sps:$4 sm:$0xff]   ;;  %v9077_v43 = vld [vmem:[#allocation10 + $0x340] ss:$16 sps:$4 sm:$0xff]  }
  0x60   :  { %3869 = vmatpush1.bf16.msra.mxu1 %v9046_v22  ;;  %v9078_v44 = vld [vmem:[#allocation10 + $0x164] ss:$16 sps:$4 sm:$0xff]   ;;  %v9082_v46 = vld [vmem:[#allocation10 + $0x160] ss:$16 sps:$4 sm:$0xff]  }
  0x61   :  { %3912 = vmatpush1.bf16.msra.mxu0 %v9047_v23  ;;  %3870 = vmatprep.subr.bf16.mxu1 %v9048_v24  ;;  %v9080_v45 = vld [vmem:[#allocation10 + $0x364] ss:$16 sps:$4 sm:$0xff]   ;;  %v9083_v47 = vld [vmem:[#allocation10 + $0x360] ss:$16 sps:$4 sm:$0xff]   ;;  %v9141_v23 = vld [vmem:[#allocation10 + $0x88] ss:$16 sps:$4 sm:$0xff]  }
  0x62   :  { %3913 = vmatprep.subr.bf16.mxu0 %v9050_v25  ;;  %v9084_v48 = vld [vmem:[#allocation10 + $0x184] ss:$16 sps:$4 sm:$0xff]   ;;  %v9088_v52 = vld [vmem:[#allocation10 + $0x180] ss:$16 sps:$4 sm:$0xff]   ;;  %v9149_v25 = vld [vmem:[#allocation10 + $0xac] ss:$16 sps:$4 sm:$0xff]  }
  0x63   :  { %v9110_v49 = vld [vmem:[%s10754_s0 + $0x4] ss:$76 sps:$4 sm:$0xff]   ;;  %v10462_v51 = vld [vmem:[%s10754_s0 + $0xc] ss:$76 sps:$4 sm:$0xff]   ;;  %v10473_v5 = vld [vmem:[%s10754_s0 + $0x8] ss:$76 sps:$4 sm:$0xff]  }
  0x64   :  { %3871 = vmatpush1.bf16.msra.mxu1 %v9052_v26  ;;  %v9086_v50 = vld [vmem:[#allocation10 + $0x384] ss:$16 sps:$4 sm:$0xff]   ;;  %3890 = vmatprep.mubr.bf16.mxu1 %v9110_v49  ;;  %v9089_v53 = vld [vmem:[#allocation10 + $0x380] ss:$16 sps:$4 sm:$0xff]  }
  0x65   :  { %3914 = vmatpush1.bf16.msra.mxu0 %v9053_v27  ;;  %3872 = vmatprep.subr.bf16.mxu1 %v9054_v28  ;;  %v9090_v54 = vld [vmem:[#allocation10 + $0x1a4] ss:$16 sps:$4 sm:$0xff]   ;;  %v9094_v56 = vld [vmem:[#allocation10 + $0x1a0] ss:$16 sps:$4 sm:$0xff]   ;;  %v9147_v27 = vld [vmem:[#allocation10 + $0xa8] ss:$16 sps:$4 sm:$0xff]  }
  0x66   :  { %3915 = vmatprep.subr.bf16.mxu0 %v9056_v29  ;;  %3933 = vmatprep.mubr.bf16.mxu0 %v10462_v51  ;;  %v9092_v55 = vld [vmem:[#allocation10 + $0x3a4] ss:$16 sps:$4 sm:$0xff]   ;;  %v9095_v57 = vld [vmem:[#allocation10 + $0x3a0] ss:$16 sps:$4 sm:$0xff]   ;;  %v9155_v29 = vld [vmem:[#allocation10 + $0xcc] ss:$16 sps:$4 sm:$0xff]  }
  0x67   :  { %v9096_v58 = vld [vmem:[#allocation10 + $0x1c4] ss:$16 sps:$4 sm:$0xff]   ;;  %v9100_v60 = vld [vmem:[#allocation10 + $0x1c0] ss:$16 sps:$4 sm:$0xff]  }
  0x68   :  { %3873 = vmatpush1.bf16.msra.mxu1 %v9058_v30  ;;  %v9098_v59 = vld [vmem:[#allocation10 + $0x3c4] ss:$16 sps:$4 sm:$0xff]   ;;  %v9101_v61 = vld [vmem:[#allocation10 + $0x3c0] ss:$16 sps:$4 sm:$0xff]  }
  0x69   :  { %3916 = vmatpush1.bf16.msra.mxu0 %v9059_v31  ;;  %3874 = vmatprep.subr.bf16.mxu1 %v9060_v32  ;;  %v9102_v62 = vld [vmem:[#allocation10 + $0x1e4] ss:$16 sps:$4 sm:$0xff]   ;;  %v9106_v0 = vld [vmem:[#allocation10 + $0x1e0] ss:$16 sps:$4 sm:$0xff]   ;;  %v9153_v31 = vld [vmem:[#allocation10 + $0xc8] ss:$16 sps:$4 sm:$0xff]  }
  0x6a   :  { %3917 = vmatprep.subr.bf16.mxu0 %v9062_v33  ;;  %v9104_v63 = vld [vmem:[#allocation10 + $0x3e4] ss:$16 sps:$4 sm:$0xff]   ;;  %v9107_v1 = vld [vmem:[#allocation10 + $0x3e0] ss:$16 sps:$4 sm:$0xff]   ;;  %v9161_v33 = vld [vmem:[#allocation10 + $0xec] ss:$16 sps:$4 sm:$0xff]  }
  0x6b   :  { %v9116_v2 = vld [vmem:[#allocation10 + $0x404] ss:$16 sps:$4 sm:$0xff]   ;;  %v10468_v4 = vld [vmem:[%s10754_s0] ss:$76 sps:$4 sm:$0xff]  }
  0x6c   :  { %3875 = vmatpush1.bf16.msra.mxu1 %v9064_v34  ;;  %v9114_v6 = vld [vmem:[#allocation10 + $0x400] ss:$16 sps:$4 sm:$0xff]   ;;  %v9122_v8 = vld [vmem:[#allocation10 + $0x424] ss:$16 sps:$4 sm:$0xff]  }
  0x6d   :  { %3918 = vmatpush1.bf16.msra.mxu0 %v9065_v35  ;;  %3876 = vmatprep.subr.bf16.mxu1 %v9066_v36  ;;  %v9120_v10 = vld [vmem:[#allocation10 + $0x420] ss:$16 sps:$4 sm:$0xff]   ;;  %v9128_v12 = vld [vmem:[#allocation10 + $0x444] ss:$16 sps:$4 sm:$0xff]   ;;  %v9159_v36 = vld [vmem:[#allocation10 + $0xe8] ss:$16 sps:$4 sm:$0xff]  }
  0x6e   :  { %3919 = vmatprep.subr.bf16.mxu0 %v9068_v37  ;;  %v9126_v14 = vld [vmem:[#allocation10 + $0x440] ss:$16 sps:$4 sm:$0xff]   ;;  %v9134_v16 = vld [vmem:[#allocation10 + $0x464] ss:$16 sps:$4 sm:$0xff]  }
  0x6f   :  { %v9132_v18 = vld [vmem:[#allocation10 + $0x460] ss:$16 sps:$4 sm:$0xff]   ;;  %v9140_v20 = vld [vmem:[#allocation10 + $0x484] ss:$16 sps:$4 sm:$0xff]  }
  0x70   :  { %3877 = vmatpush1.bf16.msra.mxu1 %v9070_v38  ;;  %v9138_v22 = vld [vmem:[#allocation10 + $0x480] ss:$16 sps:$4 sm:$0xff]   ;;  %v9146_v24 = vld [vmem:[#allocation10 + $0x4a4] ss:$16 sps:$4 sm:$0xff]   ;;  %v9167_v38 = vld [vmem:[#allocation10 + $0x10c] ss:$16 sps:$4 sm:$0xff]  }
  0x71   :  { %3920 = vmatpush1.bf16.msra.mxu0 %v9071_v39  ;;  %3878 = vmatprep.subr.bf16.mxu1 %v9072_v40  ;;  %v9144_v26 = vld [vmem:[#allocation10 + $0x4a0] ss:$16 sps:$4 sm:$0xff]   ;;  %v9152_v28 = vld [vmem:[#allocation10 + $0x4c4] ss:$16 sps:$4 sm:$0xff]   ;;  %v9165_v40 = vld [vmem:[#allocation10 + $0x108] ss:$16 sps:$4 sm:$0xff]  }
  0x72   :  { %3921 = vmatprep.subr.bf16.mxu0 %v9074_v41  ;;  %v9150_v30 = vld [vmem:[#allocation10 + $0x4c0] ss:$16 sps:$4 sm:$0xff]   ;;  %v9158_v32 = vld [vmem:[#allocation10 + $0x4e4] ss:$16 sps:$4 sm:$0xff]  }
  0x73   :  { %v10480_v34 = vld [vmem:[%s10754_s0 + $0x14] ss:$76 sps:$4 sm:$0xff]  }
  0x74   :  { %3879 = vmatpush1.bf16.msra.mxu1 %v9076_v42  ;;  %v9156_v35 = vld [vmem:[#allocation10 + $0x4e0] ss:$16 sps:$4 sm:$0xff]   ;;  %v9164_v37 = vld [vmem:[#allocation10 + $0x504] ss:$16 sps:$4 sm:$0xff]   ;;  %v9173_v42 = vld [vmem:[#allocation10 + $0x12c] ss:$16 sps:$4 sm:$0xff]  }
  0x75   :  { %3922 = vmatpush1.bf16.msra.mxu0 %v9077_v43  ;;  %3880 = vmatprep.subr.bf16.mxu1 %v9078_v44  ;;  %v9162_v39 = vld [vmem:[#allocation10 + $0x500] ss:$16 sps:$4 sm:$0xff]   ;;  %v9170_v41 = vld [vmem:[#allocation10 + $0x524] ss:$16 sps:$4 sm:$0xff]   ;;  %v9171_v44 = vld [vmem:[#allocation10 + $0x128] ss:$16 sps:$4 sm:$0xff]  }
  0x76   :  { %3923 = vmatprep.subr.bf16.mxu0 %v9080_v45  ;;  %v9168_v43 = vld [vmem:[#allocation10 + $0x520] ss:$16 sps:$4 sm:$0xff]   ;;  %v9176_v45 = vld [vmem:[#allocation10 + $0x544] ss:$16 sps:$4 sm:$0xff]  }
  0x78   :  { %3881 = vmatpush1.bf16.msra.mxu1 %v9082_v46  ;;  %v9179_v46 = vld [vmem:[#allocation10 + $0x14c] ss:$16 sps:$4 sm:$0xff]  }
  0x79   :  { %3924 = vmatpush1.bf16.msra.mxu0 %v9083_v47  ;;  %3882 = vmatprep.subr.bf16.mxu1 %v9084_v48  ;;  %v9174_v47 = vld [vmem:[#allocation10 + $0x540] ss:$16 sps:$4 sm:$0xff]   ;;  %v9177_v48 = vld [vmem:[#allocation10 + $0x148] ss:$16 sps:$4 sm:$0xff]  }
  0x7a   :  { %3925 = vmatprep.subr.bf16.mxu0 %v9086_v50  ;;  %v9185_v50 = vld [vmem:[#allocation10 + $0x16c] ss:$16 sps:$4 sm:$0xff]  }
  0x7c   :  { %3883 = vmatpush1.bf16.msra.mxu1 %v9088_v52  ;;  %v9180_v52 = vld [vmem:[#allocation10 + $0x560] ss:$16 sps:$4 sm:$0xff]  }
  0x7d   :  { %3926 = vmatpush1.bf16.msra.mxu0 %v9089_v53  ;;  %3884 = vmatprep.subr.bf16.mxu1 %v9090_v54  ;;  %v9183_v53 = vld [vmem:[#allocation10 + $0x168] ss:$16 sps:$4 sm:$0xff]   ;;  %v9188_v54 = vld [vmem:[#allocation10 + $0x584] ss:$16 sps:$4 sm:$0xff]  }
  0x7e   :  { %3927 = vmatprep.subr.bf16.mxu0 %v9092_v55  ;;  %v9191_v55 = vld [vmem:[#allocation10 + $0x18c] ss:$16 sps:$4 sm:$0xff]  }
  0x80   :  { %3885 = vmatpush1.bf16.msra.mxu1 %v9094_v56  ;;  %v9186_v56 = vld [vmem:[#allocation10 + $0x580] ss:$16 sps:$4 sm:$0xff]  }
  0x81   :  { %3928 = vmatpush1.bf16.msra.mxu0 %v9095_v57  ;;  %3886 = vmatprep.subr.bf16.mxu1 %v9096_v58  ;;  %v9189_v57 = vld [vmem:[#allocation10 + $0x188] ss:$16 sps:$4 sm:$0xff]   ;;  %v9194_v58 = vld [vmem:[#allocation10 + $0x5a4] ss:$16 sps:$4 sm:$0xff]  }
  0x82   :  { %3929 = vmatprep.subr.bf16.mxu0 %v9098_v59  ;;  %v9197_v59 = vld [vmem:[#allocation10 + $0x1ac] ss:$16 sps:$4 sm:$0xff]  }
  0x84   :  { %3887 = vmatpush1.bf16.msra.mxu1 %v9100_v60  ;;  %v9192_v60 = vld [vmem:[#allocation10 + $0x5a0] ss:$16 sps:$4 sm:$0xff]  }
  0x85   :  { %3930 = vmatpush1.bf16.msra.mxu0 %v9101_v61  ;;  %3888 = vmatprep.subr.bf16.mxu1 %v9102_v62  ;;  %v9195_v61 = vld [vmem:[#allocation10 + $0x1a8] ss:$16 sps:$4 sm:$0xff]   ;;  %v9200_v62 = vld [vmem:[#allocation10 + $0x5c4] ss:$16 sps:$4 sm:$0xff]  }
  0x86   :  { %3931 = vmatprep.subr.bf16.mxu0 %v9104_v63  ;;  %v9203_v63 = vld [vmem:[#allocation10 + $0x1cc] ss:$16 sps:$4 sm:$0xff]  }
  0x88   :  { %3889 = vmatpush1.bf16.msra.mxu1 %v9106_v0  ;;  %v9198_v0 = vld [vmem:[#allocation10 + $0x5c0] ss:$16 sps:$4 sm:$0xff]  }
  0x89   :  { %3932 = vmatpush1.bf16.msra.mxu0 %v9107_v1  ;;  %4288 = vmatprep.subr.bf16.mxu1 %v9119_v3  ;;  %v9201_v1 = vld [vmem:[#allocation10 + $0x1c8] ss:$16 sps:$4 sm:$0xff]   ;;  %v9209_v3 = vld [vmem:[#allocation10 + $0x1ec] ss:$16 sps:$4 sm:$0xff]  }
  0x8a   :  { %3944 = vmatprep.subr.bf16.mxu0 %v9116_v2  ;;  %v9206_v2 = vld [vmem:[#allocation10 + $0x5e4] ss:$16 sps:$4 sm:$0xff]  }
  0x8b   :  { %3891 = vmatmul.mubr.bf16.vlgmr.msra.gmra.mrb[0].mxu1 %v10468_v4 }
  0x8c   :  { %3934 = vmatmul.mubr.bf16.vlgmr.msra.gmra.mrb[0].mxu0 %v10473_v5  ;;  %4289 = vmatpush1.bf16.msra.mxu1 %v9117_v7  ;;  %v9207_v7 = vld [vmem:[#allocation10 + $0x1e8] ss:$16 sps:$4 sm:$0xff]  }
  0x8d   :  { %3945 = vmatpush1.bf16.msra.mxu0 %v9114_v6  ;;  %4290 = vmatprep.subr.bf16.mxu1 %v9125_v9  ;;  %v9204_v6 = vld [vmem:[#allocation10 + $0x5e0] ss:$16 sps:$4 sm:$0xff]   ;;  %v9218_v9 = vld [vmem:[#allocation10 + $0x20c] ss:$16 sps:$4 sm:$0xff]  }
  0x8e   :  { %3946 = vmatprep.subr.bf16.mxu0 %v9122_v8  ;;  %4320 = vmatprep.mubr.bf16.mxu1 %v9110_v49  ;;  %v9182_v49 = vld [vmem:[#allocation10 + $0x564] ss:$16 sps:$4 sm:$0xff]  }
  0x8f   :  { %3976 = vmatprep.mubr.bf16.mxu0 %v10480_v34  ;;  %v9215_v8 = vld [vmem:[#allocation10 + $0x604] ss:$16 sps:$4 sm:$0xff]  }
  0x90   :  { %4291 = vmatpush1.bf16.msra.mxu1 %v9123_v11  ;;  %v9213_v11 = vld [vmem:[#allocation10 + $0x600] ss:$16 sps:$4 sm:$0xff]  }
  0x91   :  { %3947 = vmatpush1.bf16.msra.mxu0 %v9120_v10  ;;  %4292 = vmatprep.subr.bf16.mxu1 %v9131_v13  ;;  %v10486_v10 = vld [vmem:[%s10754_s0 + $0x10] ss:$76 sps:$4 sm:$0xff]   ;;  %v9221_v13 = vld [vmem:[#allocation10 + $0x624] ss:$16 sps:$4 sm:$0xff]  }
  0x92   :  { %3948 = vmatprep.subr.bf16.mxu0 %v9128_v12  ;;  %v9216_v12 = vld [vmem:[#allocation10 + $0x208] ss:$16 sps:$4 sm:$0xff]  }
  0x94   :  { %4293 = vmatpush1.bf16.msra.mxu1 %v9129_v15  ;;  %v9219_v15 = vld [vmem:[#allocation10 + $0x620] ss:$16 sps:$4 sm:$0xff]  }
  0x95   :  { %3949 = vmatpush1.bf16.msra.mxu0 %v9126_v14  ;;  %4294 = vmatprep.subr.bf16.mxu1 %v9137_v17  ;;  %v9224_v14 = vld [vmem:[#allocation10 + $0x22c] ss:$16 sps:$4 sm:$0xff]   ;;  %v9227_v17 = vld [vmem:[#allocation10 + $0x644] ss:$16 sps:$4 sm:$0xff]  }
  0x96   :  { %3950 = vmatprep.subr.bf16.mxu0 %v9134_v16  ;;  %v9222_v16 = vld [vmem:[#allocation10 + $0x228] ss:$16 sps:$4 sm:$0xff]  }
  0x98   :  { %4295 = vmatpush1.bf16.msra.mxu1 %v9135_v19  ;;  %v10493_v19 = vld [vmem:[%s10754_s0 + $0x1c] ss:$76 sps:$4 sm:$0xff]  }
  0x99   :  { %3951 = vmatpush1.bf16.msra.mxu0 %v9132_v18  ;;  %4296 = vmatprep.subr.bf16.mxu1 %v9143_v21  ;;  %v9230_v18 = vld [vmem:[#allocation10 + $0x24c] ss:$16 sps:$4 sm:$0xff]   ;;  %v9228_v21 = vld [vmem:[#allocation10 + $0x248] ss:$16 sps:$4 sm:$0xff]  }
  0x9a   :  { %3952 = vmatprep.subr.bf16.mxu0 %v9140_v20  ;;  %v9225_v20 = vld [vmem:[#allocation10 + $0x640] ss:$16 sps:$4 sm:$0xff]  }
  0x9c   :  { %4297 = vmatpush1.bf16.msra.mxu1 %v9141_v23  ;;  %v9231_v23 = vld [vmem:[#allocation10 + $0x660] ss:$16 sps:$4 sm:$0xff]  }
  0x9d   :  { %3953 = vmatpush1.bf16.msra.mxu0 %v9138_v22  ;;  %4298 = vmatprep.subr.bf16.mxu1 %v9149_v25  ;;  %v9236_v22 = vld [vmem:[#allocation10 + $0x26c] ss:$16 sps:$4 sm:$0xff]   ;;  %v9239_v25 = vld [vmem:[#allocation10 + $0x684] ss:$16 sps:$4 sm:$0xff]  }
  0x9e   :  { %3954 = vmatprep.subr.bf16.mxu0 %v9146_v24  ;;  %v9234_v24 = vld [vmem:[#allocation10 + $0x268] ss:$16 sps:$4 sm:$0xff]  }
  0xa0   :  { %4299 = vmatpush1.bf16.msra.mxu1 %v9147_v27  ;;  %v9237_v27 = vld [vmem:[#allocation10 + $0x680] ss:$16 sps:$4 sm:$0xff]  }
  0xa1   :  { %3955 = vmatpush1.bf16.msra.mxu0 %v9144_v26  ;;  %4300 = vmatprep.subr.bf16.mxu1 %v9155_v29  ;;  %v9242_v26 = vld [vmem:[#allocation10 + $0x28c] ss:$16 sps:$4 sm:$0xff]  }
  0xa2   :  { %3956 = vmatprep.subr.bf16.mxu0 %v9152_v28  ;;  %v9245_v28 = vld [vmem:[#allocation10 + $0x6a4] ss:$16 sps:$4 sm:$0xff]   ;;  %v9248_v29 = vld [vmem:[#allocation10 + $0x2ac] ss:$16 sps:$4 sm:$0xff]  }
  0xa4   :  { %4301 = vmatpush1.bf16.msra.mxu1 %v9153_v31  ;;  %v9246_v31 = vld [vmem:[#allocation10 + $0x2a8] ss:$16 sps:$4 sm:$0xff]  }
  0xa5   :  { %3957 = vmatpush1.bf16.msra.mxu0 %v9150_v30  ;;  %4302 = vmatprep.subr.bf16.mxu1 %v9161_v33  ;;  %v9243_v30 = vld [vmem:[#allocation10 + $0x6a0] ss:$16 sps:$4 sm:$0xff]   ;;  %v9254_v33 = vld [vmem:[#allocation10 + $0x2cc] ss:$16 sps:$4 sm:$0xff]  }
  0xa6   :  { %3958 = vmatprep.subr.bf16.mxu0 %v9158_v32  ;;  %v9251_v32 = vld [vmem:[#allocation10 + $0x6c4] ss:$16 sps:$4 sm:$0xff]  }
  0xa8   :  { %4303 = vmatpush1.bf16.msra.mxu1 %v9159_v36  ;;  %v9252_v36 = vld [vmem:[#allocation10 + $0x2c8] ss:$16 sps:$4 sm:$0xff]  }
  0xa9   :  { %3959 = vmatpush1.bf16.msra.mxu0 %v9156_v35  ;;  %4304 = vmatprep.subr.bf16.mxu1 %v9167_v38  ;;  %v9249_v35 = vld [vmem:[#allocation10 + $0x6c0] ss:$16 sps:$4 sm:$0xff]   ;;  %v9260_v38 = vld [vmem:[#allocation10 + $0x2ec] ss:$16 sps:$4 sm:$0xff]  }
  0xaa   :  { %3960 = vmatprep.subr.bf16.mxu0 %v9164_v37  ;;  %v9257_v37 = vld [vmem:[#allocation10 + $0x6e4] ss:$16 sps:$4 sm:$0xff]  }
  0xac   :  { %4305 = vmatpush1.bf16.msra.mxu1 %v9165_v40  ;;  %v9258_v40 = vld [vmem:[#allocation10 + $0x2e8] ss:$16 sps:$4 sm:$0xff]  }
  0xad   :  { %3961 = vmatpush1.bf16.msra.mxu0 %v9162_v39  ;;  %4306 = vmatprep.subr.bf16.mxu1 %v9173_v42  ;;  %v9255_v39 = vld [vmem:[#allocation10 + $0x6e0] ss:$16 sps:$4 sm:$0xff]   ;;  %v9266_v42 = vld [vmem:[#allocation10 + $0x30c] ss:$16 sps:$4 sm:$0xff]  }
  0xae   :  { %3962 = vmatprep.subr.bf16.mxu0 %v9170_v41  ;;  %v9263_v41 = vld [vmem:[#allocation10 + $0x704] ss:$16 sps:$4 sm:$0xff]  }
  0xb0   :  { %4307 = vmatpush1.bf16.msra.mxu1 %v9171_v44  ;;  %v9264_v44 = vld [vmem:[#allocation10 + $0x308] ss:$16 sps:$4 sm:$0xff]  }
  0xb1   :  { %3963 = vmatpush1.bf16.msra.mxu0 %v9168_v43  ;;  %4308 = vmatprep.subr.bf16.mxu1 %v9179_v46  ;;  %v9261_v43 = vld [vmem:[#allocation10 + $0x700] ss:$16 sps:$4 sm:$0xff]   ;;  %v9272_v46 = vld [vmem:[#allocation10 + $0x32c] ss:$16 sps:$4 sm:$0xff]  }
  0xb2   :  { %3964 = vmatprep.subr.bf16.mxu0 %v9176_v45  ;;  %v9269_v45 = vld [vmem:[#allocation10 + $0x724] ss:$16 sps:$4 sm:$0xff]  }
  0xb4   :  { %4309 = vmatpush1.bf16.msra.mxu1 %v9177_v48  ;;  %v9270_v48 = vld [vmem:[#allocation10 + $0x328] ss:$16 sps:$4 sm:$0xff]  }
  0xb5   :  { %3965 = vmatpush1.bf16.msra.mxu0 %v9174_v47  ;;  %4310 = vmatprep.subr.bf16.mxu1 %v9185_v50  ;;  %v9267_v47 = vld [vmem:[#allocation10 + $0x720] ss:$16 sps:$4 sm:$0xff]   ;;  %v9278_v50 = vld [vmem:[#allocation10 + $0x34c] ss:$16 sps:$4 sm:$0xff]  }
  0xb6   :  { %3966 = vmatprep.subr.bf16.mxu0 %v9182_v49  ;;  %v9275_v49 = vld [vmem:[#allocation10 + $0x744] ss:$16 sps:$4 sm:$0xff]  }
  0xb8   :  { %4311 = vmatpush1.bf16.msra.mxu1 %v9183_v53  ;;  %v9276_v53 = vld [vmem:[#allocation10 + $0x348] ss:$16 sps:$4 sm:$0xff]  }
  0xb9   :  { %3967 = vmatpush1.bf16.msra.mxu0 %v9180_v52  ;;  %4312 = vmatprep.subr.bf16.mxu1 %v9191_v55  ;;  %v9273_v52 = vld [vmem:[#allocation10 + $0x740] ss:$16 sps:$4 sm:$0xff]   ;;  %v9284_v55 = vld [vmem:[#allocation10 + $0x36c] ss:$16 sps:$4 sm:$0xff]  }
  0xba   :  { %3968 = vmatprep.subr.bf16.mxu0 %v9188_v54  ;;  %v9281_v54 = vld [vmem:[#allocation10 + $0x764] ss:$16 sps:$4 sm:$0xff]  }
  0xbc   :  { %4313 = vmatpush1.bf16.msra.mxu1 %v9189_v57  ;;  %v9282_v57 = vld [vmem:[#allocation10 + $0x368] ss:$16 sps:$4 sm:$0xff]  }
  0xbd   :  { %3969 = vmatpush1.bf16.msra.mxu0 %v9186_v56  ;;  %4314 = vmatprep.subr.bf16.mxu1 %v9197_v59  ;;  %v9279_v56 = vld [vmem:[#allocation10 + $0x760] ss:$16 sps:$4 sm:$0xff]   ;;  %v9290_v59 = vld [vmem:[#allocation10 + $0x38c] ss:$16 sps:$4 sm:$0xff]  }
  0xbe   :  { %3970 = vmatprep.subr.bf16.mxu0 %v9194_v58  ;;  %v9287_v58 = vld [vmem:[#allocation10 + $0x784] ss:$16 sps:$4 sm:$0xff]  }
  0xc0   :  { %4315 = vmatpush1.bf16.msra.mxu1 %v9195_v61  ;;  %v9288_v61 = vld [vmem:[#allocation10 + $0x388] ss:$16 sps:$4 sm:$0xff]  }
  0xc1   :  { %3971 = vmatpush1.bf16.msra.mxu0 %v9192_v60  ;;  %4316 = vmatprep.subr.bf16.mxu1 %v9203_v63  ;;  %v9285_v60 = vld [vmem:[#allocation10 + $0x780] ss:$16 sps:$4 sm:$0xff]   ;;  %v9296_v63 = vld [vmem:[#allocation10 + $0x3ac] ss:$16 sps:$4 sm:$0xff]  }
  0xc2   :  { %3972 = vmatprep.subr.bf16.mxu0 %v9200_v62  ;;  %v9293_v62 = vld [vmem:[#allocation10 + $0x7a4] ss:$16 sps:$4 sm:$0xff]  }
  0xc4   :  { %4317 = vmatpush1.bf16.msra.mxu1 %v9201_v1  ;;  %v9294_v1 = vld [vmem:[#allocation10 + $0x3a8] ss:$16 sps:$4 sm:$0xff]  }
  0xc5   :  { %3973 = vmatpush1.bf16.msra.mxu0 %v9198_v0  ;;  %4318 = vmatprep.subr.bf16.mxu1 %v9209_v3  ;;  %v9291_v0 = vld [vmem:[#allocation10 + $0x7a0] ss:$16 sps:$4 sm:$0xff]   ;;  %v9302_v3 = vld [vmem:[#allocation10 + $0x3cc] ss:$16 sps:$4 sm:$0xff]  }
  0xc6   :  { %3974 = vmatprep.subr.bf16.mxu0 %v9206_v2  ;;  %v9299_v2 = vld [vmem:[#allocation10 + $0x7c4] ss:$16 sps:$4 sm:$0xff]  }
  0xc8   :  { %4319 = vmatpush1.bf16.msra.mxu1 %v9207_v7  ;;  %v9300_v7 = vld [vmem:[#allocation10 + $0x3c8] ss:$16 sps:$4 sm:$0xff]  }
  0xc9   :  { %3975 = vmatpush1.bf16.msra.mxu0 %v9204_v6  ;;  %4331 = vmatprep.subr.bf16.mxu1 %v9218_v9  ;;  %v9297_v6 = vld [vmem:[#allocation10 + $0x7c0] ss:$16 sps:$4 sm:$0xff]   ;;  %v9308_v9 = vld [vmem:[#allocation10 + $0x3ec] ss:$16 sps:$4 sm:$0xff]  }
  0xca   :  { %3987 = vmatprep.subr.bf16.mxu0 %v9215_v8  ;;  %v9305_v8 = vld [vmem:[#allocation10 + $0x7e4] ss:$16 sps:$4 sm:$0xff]  }
  0xcb   :  { %4321 = vmatmul.mubr.bf16.vlgmr.msra.gmra.mrb[4].mxu1 %v10468_v4  ;;  %v9233_v4 = vld [vmem:[#allocation10 + $0x664] ss:$16 sps:$4 sm:$0xff]  }
  0xcc   :  { %3977 = vmatmul.mubr.bf16.vlgmr.msra.gmra.mrb[0].mxu0 %v10486_v10  ;;  %4332 = vmatpush1.bf16.msra.mxu1 %v9216_v12  ;;  %v9306_v12 = vld [vmem:[#allocation10 + $0x3e8] ss:$16 sps:$4 sm:$0xff]  }
  0xcd   :  { %3988 = vmatpush1.bf16.msra.mxu0 %v9213_v11  ;;  %4333 = vmatprep.subr.bf16.mxu1 %v9224_v14  ;;  %v9303_v11 = vld [vmem:[#allocation10 + $0x7e0] ss:$16 sps:$4 sm:$0xff]   ;;  %v9317_v14 = vld [vmem:[#allocation10 + $0x40c] ss:$16 sps:$4 sm:$0xff]  }
  0xce   :  { %3989 = vmatprep.subr.bf16.mxu0 %v9221_v13  ;;  %4363 = vmatprep.mubr.bf16.mxu1 %v10462_v51  ;;  %v9240_v51 = vld [vmem:[#allocation10 + $0x288] ss:$16 sps:$4 sm:$0xff]   ;;  %v9314_v13 = vld [vmem:[#allocation10 + $0x804] ss:$16 sps:$4 sm:$0xff]  }
  0xcf   :  { %4019 = vmatprep.mubr.bf16.mxu0 %v10493_v19 }
  0xd0   :  { %4334 = vmatpush1.bf16.msra.mxu1 %v9222_v16  ;;  %v9312_v16 = vld [vmem:[#allocation10 + $0x800] ss:$16 sps:$4 sm:$0xff]  }
  0xd1   :  { %3990 = vmatpush1.bf16.msra.mxu0 %v9219_v15  ;;  %4335 = vmatprep.subr.bf16.mxu1 %v9230_v18  ;;  %v10500_v15 = vld [vmem:[%s10754_s0 + $0x18] ss:$76 sps:$4 sm:$0xff]  }
  0xd2   :  { %3991 = vmatprep.subr.bf16.mxu0 %v9227_v17  ;;  %v9315_v17 = vld [vmem:[#allocation10 + $0x408] ss:$16 sps:$4 sm:$0xff]   ;;  %v9320_v18 = vld [vmem:[#allocation10 + $0x824] ss:$16 sps:$4 sm:$0xff]  }
  0xd4   :  { %4336 = vmatpush1.bf16.msra.mxu1 %v9228_v21  ;;  %v10505_v21 = vld [vmem:[%s10754_s0 + $0x24] ss:$76 sps:$4 sm:$0xff]  }
  0xd5   :  { %3992 = vmatpush1.bf16.msra.mxu0 %v9225_v20  ;;  %4337 = vmatprep.subr.bf16.mxu1 %v9236_v22  ;;  %v9323_v20 = vld [vmem:[#allocation10 + $0x42c] ss:$16 sps:$4 sm:$0xff]   ;;  %v9321_v22 = vld [vmem:[#allocation10 + $0x428] ss:$16 sps:$4 sm:$0xff]  }
  0xd6   :  { %3993 = vmatprep.subr.bf16.mxu0 %v9233_v4  ;;  %v9318_v4 = vld [vmem:[#allocation10 + $0x820] ss:$16 sps:$4 sm:$0xff]  }
  0xd8   :  { %4338 = vmatpush1.bf16.msra.mxu1 %v9234_v24  ;;  %v9329_v24 = vld [vmem:[#allocation10 + $0x44c] ss:$16 sps:$4 sm:$0xff]  }
  0xd9   :  { %3994 = vmatpush1.bf16.msra.mxu0 %v9231_v23  ;;  %4339 = vmatprep.subr.bf16.mxu1 %v9242_v26  ;;  %v9326_v23 = vld [vmem:[#allocation10 + $0x844] ss:$16 sps:$4 sm:$0xff]   ;;  %v9327_v26 = vld [vmem:[#allocation10 + $0x448] ss:$16 sps:$4 sm:$0xff]  }
  0xda   :  { %3995 = vmatprep.subr.bf16.mxu0 %v9239_v25  ;;  %v9324_v25 = vld [vmem:[#allocation10 + $0x840] ss:$16 sps:$4 sm:$0xff]  }
  0xdc   :  { %4340 = vmatpush1.bf16.msra.mxu1 %v9240_v51  ;;  %v9330_v51 = vld [vmem:[#allocation10 + $0x860] ss:$16 sps:$4 sm:$0xff]  }
  0xdd   :  { %3996 = vmatpush1.bf16.msra.mxu0 %v9237_v27  ;;  %4341 = vmatprep.subr.bf16.mxu1 %v9248_v29  ;;  %v9332_v27 = vld [vmem:[#allocation10 + $0x864] ss:$16 sps:$4 sm:$0xff]  }
  0xde   :  { %3997 = vmatprep.subr.bf16.mxu0 %v9245_v28  ;;  %v9333_v28 = vld [vmem:[#allocation10 + $0x468] ss:$16 sps:$4 sm:$0xff]   ;;  %v9338_v29 = vld [vmem:[#allocation10 + $0x884] ss:$16 sps:$4 sm:$0xff]  }
  0xe0   :  { %4342 = vmatpush1.bf16.msra.mxu1 %v9246_v31  ;;  %v9336_v31 = vld [vmem:[#allocation10 + $0x880] ss:$16 sps:$4 sm:$0xff]  }
  0xe1   :  { %3998 = vmatpush1.bf16.msra.mxu0 %v9243_v30  ;;  %4343 = vmatprep.subr.bf16.mxu1 %v9254_v33  ;;  %v9341_v30 = vld [vmem:[#allocation10 + $0x48c] ss:$16 sps:$4 sm:$0xff]  }
  0xe2   :  { %3999 = vmatprep.subr.bf16.mxu0 %v9251_v32  ;;  %v9339_v32 = vld [vmem:[#allocation10 + $0x488] ss:$16 sps:$4 sm:$0xff]   ;;  %v9347_v33 = vld [vmem:[#allocation10 + $0x4ac] ss:$16 sps:$4 sm:$0xff]  }
  0xe4   :  { %4344 = vmatpush1.bf16.msra.mxu1 %v9252_v36  ;;  %v9345_v36 = vld [vmem:[#allocation10 + $0x4a8] ss:$16 sps:$4 sm:$0xff]  }
  0xe5   :  { %4000 = vmatpush1.bf16.msra.mxu0 %v9249_v35  ;;  %4345 = vmatprep.subr.bf16.mxu1 %v9260_v38  ;;  %v9342_v35 = vld [vmem:[#allocation10 + $0x8a0] ss:$16 sps:$4 sm:$0xff]   ;;  %v9353_v38 = vld [vmem:[#allocation10 + $0x4cc] ss:$16 sps:$4 sm:$0xff]  }
  0xe6   :  { %4001 = vmatprep.subr.bf16.mxu0 %v9257_v37  ;;  %v9350_v37 = vld [vmem:[#allocation10 + $0x8c4] ss:$16 sps:$4 sm:$0xff]  }
  0xe8   :  { %4346 = vmatpush1.bf16.msra.mxu1 %v9258_v40  ;;  %v9351_v40 = vld [vmem:[#allocation10 + $0x4c8] ss:$16 sps:$4 sm:$0xff]  }
  0xe9   :  { %4002 = vmatpush1.bf16.msra.mxu0 %v9255_v39  ;;  %4347 = vmatprep.subr.bf16.mxu1 %v9266_v42  ;;  %v9348_v39 = vld [vmem:[#allocation10 + $0x8c0] ss:$16 sps:$4 sm:$0xff]   ;;  %v9359_v42 = vld [vmem:[#allocation10 + $0x4ec] ss:$16 sps:$4 sm:$0xff]  }
  0xea   :  { %4003 = vmatprep.subr.bf16.mxu0 %v9263_v41  ;;  %v9356_v41 = vld [vmem:[#allocation10 + $0x8e4] ss:$16 sps:$4 sm:$0xff]  }
  0xec   :  { %4348 = vmatpush1.bf16.msra.mxu1 %v9264_v44  ;;  %v9357_v44 = vld [vmem:[#allocation10 + $0x4e8] ss:$16 sps:$4 sm:$0xff]  }
  0xed   :  { %4004 = vmatpush1.bf16.msra.mxu0 %v9261_v43  ;;  %4349 = vmatprep.subr.bf16.mxu1 %v9272_v46  ;;  %v9354_v43 = vld [vmem:[#allocation10 + $0x8e0] ss:$16 sps:$4 sm:$0xff]   ;;  %v9365_v46 = vld [vmem:[#allocation10 + $0x50c] ss:$16 sps:$4 sm:$0xff]  }
  0xee   :  { %4005 = vmatprep.subr.bf16.mxu0 %v9269_v45  ;;  %v9362_v45 = vld [vmem:[#allocation10 + $0x904] ss:$16 sps:$4 sm:$0xff]  }
  0xf0   :  { %4350 = vmatpush1.bf16.msra.mxu1 %v9270_v48  ;;  %v9363_v48 = vld [vmem:[#allocation10 + $0x508] ss:$16 sps:$4 sm:$0xff]  }
  0xf1   :  { %4006 = vmatpush1.bf16.msra.mxu0 %v9267_v47  ;;  %4351 = vmatprep.subr.bf16.mxu1 %v9278_v50  ;;  %v9360_v47 = vld [vmem:[#allocation10 + $0x900] ss:$16 sps:$4 sm:$0xff]   ;;  %v9371_v50 = vld [vmem:[#allocation10 + $0x52c] ss:$16 sps:$4 sm:$0xff]  }
  0xf2   :  { %4007 = vmatprep.subr.bf16.mxu0 %v9275_v49  ;;  %v9368_v49 = vld [vmem:[#allocation10 + $0x924] ss:$16 sps:$4 sm:$0xff]  }
  0xf4   :  { %4352 = vmatpush1.bf16.msra.mxu1 %v9276_v53  ;;  %v9369_v53 = vld [vmem:[#allocation10 + $0x528] ss:$16 sps:$4 sm:$0xff]  }
  0xf5   :  { %4008 = vmatpush1.bf16.msra.mxu0 %v9273_v52  ;;  %4353 = vmatprep.subr.bf16.mxu1 %v9284_v55  ;;  %v9366_v52 = vld [vmem:[#allocation10 + $0x920] ss:$16 sps:$4 sm:$0xff]   ;;  %v9377_v55 = vld [vmem:[#allocation10 + $0x54c] ss:$16 sps:$4 sm:$0xff]  }
  0xf6   :  { %4009 = vmatprep.subr.bf16.mxu0 %v9281_v54  ;;  %v9374_v54 = vld [vmem:[#allocation10 + $0x944] ss:$16 sps:$4 sm:$0xff]  }
  0xf8   :  { %4354 = vmatpush1.bf16.msra.mxu1 %v9282_v57  ;;  %v9375_v57 = vld [vmem:[#allocation10 + $0x548] ss:$16 sps:$4 sm:$0xff]  }
  0xf9   :  { %4010 = vmatpush1.bf16.msra.mxu0 %v9279_v56  ;;  %4355 = vmatprep.subr.bf16.mxu1 %v9290_v59  ;;  %v9372_v56 = vld [vmem:[#allocation10 + $0x940] ss:$16 sps:$4 sm:$0xff]   ;;  %v9383_v59 = vld [vmem:[#allocation10 + $0x56c] ss:$16 sps:$4 sm:$0xff]  }
  0xfa   :  { %4011 = vmatprep.subr.bf16.mxu0 %v9287_v58  ;;  %v9380_v58 = vld [vmem:[#allocation10 + $0x964] ss:$16 sps:$4 sm:$0xff]  }
  0xfc   :  { %4356 = vmatpush1.bf16.msra.mxu1 %v9288_v61  ;;  %v9381_v61 = vld [vmem:[#allocation10 + $0x568] ss:$16 sps:$4 sm:$0xff]  }
  0xfd   :  { %4012 = vmatpush1.bf16.msra.mxu0 %v9285_v60  ;;  %4357 = vmatprep.subr.bf16.mxu1 %v9296_v63  ;;  %v9378_v60 = vld [vmem:[#allocation10 + $0x960] ss:$16 sps:$4 sm:$0xff]   ;;  %v9389_v63 = vld [vmem:[#allocation10 + $0x58c] ss:$16 sps:$4 sm:$0xff]  }
  0xfe   :  { %4013 = vmatprep.subr.bf16.mxu0 %v9293_v62  ;;  %v9386_v62 = vld [vmem:[#allocation10 + $0x984] ss:$16 sps:$4 sm:$0xff]  }
 0x100   :  { %4358 = vmatpush1.bf16.msra.mxu1 %v9294_v1  ;;  %v9387_v1 = vld [vmem:[#allocation10 + $0x588] ss:$16 sps:$4 sm:$0xff]  }
 0x101   :  { %4014 = vmatpush1.bf16.msra.mxu0 %v9291_v0  ;;  %4359 = vmatprep.subr.bf16.mxu1 %v9302_v3  ;;  %v9384_v0 = vld [vmem:[#allocation10 + $0x980] ss:$16 sps:$4 sm:$0xff]   ;;  %v9395_v3 = vld [vmem:[#allocation10 + $0x5ac] ss:$16 sps:$4 sm:$0xff]  }
 0x102   :  { %4015 = vmatprep.subr.bf16.mxu0 %v9299_v2  ;;  %v9392_v2 = vld [vmem:[#allocation10 + $0x9a4] ss:$16 sps:$4 sm:$0xff]  }
 0x104   :  { %4360 = vmatpush1.bf16.msra.mxu1 %v9300_v7  ;;  %v9393_v7 = vld [vmem:[#allocation10 + $0x5a8] ss:$16 sps:$4 sm:$0xff]  }
 0x105   :  { %4016 = vmatpush1.bf16.msra.mxu0 %v9297_v6  ;;  %4361 = vmatprep.subr.bf16.mxu1 %v9308_v9  ;;  %v9390_v6 = vld [vmem:[#allocation10 + $0x9a0] ss:$16 sps:$4 sm:$0xff]   ;;  %v9401_v9 = vld [vmem:[#allocation10 + $0x5cc] ss:$16 sps:$4 sm:$0xff]  }
 0x106   :  { %4017 = vmatprep.subr.bf16.mxu0 %v9305_v8  ;;  %v9398_v8 = vld [vmem:[#allocation10 + $0x9c4] ss:$16 sps:$4 sm:$0xff]  }
 0x108   :  { %4362 = vmatpush1.bf16.msra.mxu1 %v9306_v12  ;;  %v9399_v12 = vld [vmem:[#allocation10 + $0x5c8] ss:$16 sps:$4 sm:$0xff]  }
 0x109   :  { %4018 = vmatpush1.bf16.msra.mxu0 %v9303_v11  ;;  %4374 = vmatprep.subr.bf16.mxu1 %v9317_v14  ;;  %v9396_v11 = vld [vmem:[#allocation10 + $0x9c0] ss:$16 sps:$4 sm:$0xff]   ;;  %v9407_v14 = vld [vmem:[#allocation10 + $0x5ec] ss:$16 sps:$4 sm:$0xff]  }
 0x10a   :  { %4030 = vmatprep.subr.bf16.mxu0 %v9314_v13  ;;  %v9404_v13 = vld [vmem:[#allocation10 + $0x9e4] ss:$16 sps:$4 sm:$0xff]  }
 0x10b   :  { %4364 = vmatmul.mubr.bf16.vlgmr.msra.gmra.mrb[4].mxu1 %v10473_v5  ;;  %v9335_v5 = vld [vmem:[#allocation10 + $0x46c] ss:$16 sps:$4 sm:$0xff]  }
 0x10c   :  { %4020 = vmatmul.mubr.bf16.vlgmr.msra.gmra.mrb[0].mxu0 %v10500_v15  ;;  %4375 = vmatpush1.bf16.msra.mxu1 %v9315_v17  ;;  %v9405_v17 = vld [vmem:[#allocation10 + $0x5e8] ss:$16 sps:$4 sm:$0xff]  }
 0x10d   :  { %4031 = vmatpush1.bf16.msra.mxu0 %v9312_v16  ;;  %4376 = vmatprep.subr.bf16.mxu1 %v9323_v20  ;;  %v9402_v16 = vld [vmem:[#allocation10 + $0x9e0] ss:$16 sps:$4 sm:$0xff]   ;;  %v9416_v20 = vld [vmem:[#allocation10 + $0x60c] ss:$16 sps:$4 sm:$0xff]  }
 0x10e   :  { %4032 = vmatprep.subr.bf16.mxu0 %v9320_v18  ;;  %4062 = vmatprep.mubr.bf16.mxu0 %v10505_v21  ;;  %v9413_v18 = vld [vmem:[#allocation10 + $0xa04] ss:$16 sps:$4 sm:$0xff]  }
 0x10f   :  { %4406 = vmatprep.mubr.bf16.mxu1 %v10480_v34  ;;  %v9344_v34 = vld [vmem:[#allocation10 + $0x8a4] ss:$16 sps:$4 sm:$0xff]  }
 0x110   :  { %4377 = vmatpush1.bf16.msra.mxu1 %v9321_v22  ;;  %v9411_v22 = vld [vmem:[#allocation10 + $0xa00] ss:$16 sps:$4 sm:$0xff]  }
 0x111   :  { %4033 = vmatpush1.bf16.msra.mxu0 %v9318_v4  ;;  %4378 = vmatprep.subr.bf16.mxu1 %v9329_v24  ;;  %v9408_v4 = vld [vmem:[%s10754_s0 + $0x20] ss:$76 sps:$4 sm:$0xff]   ;;  %v9419_v24 = vld [vmem:[#allocation10 + $0xa24] ss:$16 sps:$4 sm:$0xff]  }
 0x112   :  { %4034 = vmatprep.subr.bf16.mxu0 %v9326_v23  ;;  %v9414_v23 = vld [vmem:[#allocation10 + $0x608] ss:$16 sps:$4 sm:$0xff]  }
 0x114   :  { %4379 = vmatpush1.bf16.msra.mxu1 %v9327_v26  ;;  %v9509_v26 = vld [vmem:[%s10754_s0 + $0x2c] ss:$76 sps:$4 sm:$0xff]  }
 0x115   :  { %4035 = vmatpush1.bf16.msra.mxu0 %v9324_v25  ;;  %4380 = vmatprep.subr.bf16.mxu1 %v9335_v5  ;;  %v9422_v25 = vld [vmem:[#allocation10 + $0x62c] ss:$16 sps:$4 sm:$0xff]   ;;  %v9420_v5 = vld [vmem:[#allocation10 + $0x628] ss:$16 sps:$4 sm:$0xff]  }
 0x116   :  { %4036 = vmatprep.subr.bf16.mxu0 %v9332_v27  ;;  %v9417_v27 = vld [vmem:[#allocation10 + $0xa20] ss:$16 sps:$4 sm:$0xff]  }
 0x118   :  { %4381 = vmatpush1.bf16.msra.mxu1 %v9333_v28  ;;  %v9428_v28 = vld [vmem:[#allocation10 + $0x64c] ss:$16 sps:$4 sm:$0xff]  }
 0x119   :  { %4037 = vmatpush1.bf16.msra.mxu0 %v9330_v51  ;;  %4382 = vmatprep.subr.bf16.mxu1 %v9341_v30  ;;  %v9425_v51 = vld [vmem:[#allocation10 + $0xa44] ss:$16 sps:$4 sm:$0xff]   ;;  %v9426_v30 = vld [vmem:[#allocation10 + $0x648] ss:$16 sps:$4 sm:$0xff]  }
 0x11a   :  { %4038 = vmatprep.subr.bf16.mxu0 %v9338_v29  ;;  %v9423_v29 = vld [vmem:[#allocation10 + $0xa40] ss:$16 sps:$4 sm:$0xff]  }
 0x11c   :  { %4383 = vmatpush1.bf16.msra.mxu1 %v9339_v32  ;;  %v9434_v32 = vld [vmem:[#allocation10 + $0x66c] ss:$16 sps:$4 sm:$0xff]  }
 0x11d   :  { %4039 = vmatpush1.bf16.msra.mxu0 %v9336_v31  ;;  %4384 = vmatprep.subr.bf16.mxu1 %v9347_v33  ;;  %v9431_v31 = vld [vmem:[#allocation10 + $0xa64] ss:$16 sps:$4 sm:$0xff]  }
 0x11e   :  { %4040 = vmatprep.subr.bf16.mxu0 %v9344_v34  ;;  %v9432_v34 = vld [vmem:[#allocation10 + $0x668] ss:$16 sps:$4 sm:$0xff]   ;;  %v9437_v33 = vld [vmem:[#allocation10 + $0xa84] ss:$16 sps:$4 sm:$0xff]  }
 0x120   :  { %4385 = vmatpush1.bf16.msra.mxu1 %v9345_v36  ;;  %v9435_v36 = vld [vmem:[#allocation10 + $0xa80] ss:$16 sps:$4 sm:$0xff]  }
 0x121   :  { %4041 = vmatpush1.bf16.msra.mxu0 %v9342_v35  ;;  %4386 = vmatprep.subr.bf16.mxu1 %v9353_v38  ;;  %v9440_v35 = vld [vmem:[#allocation10 + $0x68c] ss:$16 sps:$4 sm:$0xff]  }
 0x122   :  { %4042 = vmatprep.subr.bf16.mxu0 %v9350_v37  ;;  %v9438_v37 = vld [vmem:[#allocation10 + $0x688] ss:$16 sps:$4 sm:$0xff]   ;;  %v9446_v38 = vld [vmem:[#allocation10 + $0x6ac] ss:$16 sps:$4 sm:$0xff]  }
 0x124   :  { %4387 = vmatpush1.bf16.msra.mxu1 %v9351_v40  ;;  %v9444_v40 = vld [vmem:[#allocation10 + $0x6a8] ss:$16 sps:$4 sm:$0xff]  }
 0x125   :  { %4043 = vmatpush1.bf16.msra.mxu0 %v9348_v39  ;;  %4388 = vmatprep.subr.bf16.mxu1 %v9359_v42  ;;  %v9441_v39 = vld [vmem:[#allocation10 + $0xaa0] ss:$16 sps:$4 sm:$0xff]   ;;  %v9452_v42 = vld [vmem:[#allocation10 + $0x6cc] ss:$16 sps:$4 sm:$0xff]  }
 0x126   :  { %4044 = vmatprep.subr.bf16.mxu0 %v9356_v41  ;;  %v9449_v41 = vld [vmem:[#allocation10 + $0xac4] ss:$16 sps:$4 sm:$0xff]  }
 0x128   :  { %4389 = vmatpush1.bf16.msra.mxu1 %v9357_v44 }
 0x129   :  { %4045 = vmatpush1.bf16.msra.mxu0 %v9354_v43  ;;  %4390 = vmatprep.subr.bf16.mxu1 %v9365_v46  ;;  %v9450_v46 = vld [vmem:[#allocation10 + $0x6c8] ss:$16 sps:$4 sm:$0xff]  }
 0x12a   :  { %4046 = vmatprep.subr.bf16.mxu0 %v9362_v45  ;;  %v9447_v45 = vld [vmem:[#allocation10 + $0xac0] ss:$16 sps:$4 sm:$0xff]  }
 0x12c   :  { %4391 = vmatpush1.bf16.msra.mxu1 %v9363_v48  ;;  %v9455_v48 = vld [vmem:[#allocation10 + $0xae4] ss:$16 sps:$4 sm:$0xff]  }
 0x12d   :  { %4047 = vmatpush1.bf16.msra.mxu0 %v9360_v47  ;;  %4392 = vmatprep.subr.bf16.mxu1 %v9371_v50  ;;  %v9458_v50 = vld [vmem:[#allocation10 + $0x6ec] ss:$16 sps:$4 sm:$0xff]  }
 0x12e   :  { %4048 = vmatprep.subr.bf16.mxu0 %v9368_v49 }
 0x130   :  { %4393 = vmatpush1.bf16.msra.mxu1 %v9369_v53  ;;  %v9456_v53 = vld [vmem:[#allocation10 + $0x6e8] ss:$16 sps:$4 sm:$0xff]  }
 0x131   :  { %4049 = vmatpush1.bf16.msra.mxu0 %v9366_v52  ;;  %4394 = vmatprep.subr.bf16.mxu1 %v9377_v55  ;;  %v9453_v52 = vld [vmem:[#allocation10 + $0xae0] ss:$16 sps:$4 sm:$0xff]   ;;  %v9464_v55 = vld [vmem:[#allocation10 + $0x70c] ss:$16 sps:$4 sm:$0xff]  }
 0x132   :  { %4050 = vmatprep.subr.bf16.mxu0 %v9374_v54  ;;  %v9461_v54 = vld [vmem:[#allocation10 + $0xb04] ss:$16 sps:$4 sm:$0xff]  }
 0x134   :  { %4395 = vmatpush1.bf16.msra.mxu1 %v9375_v57  ;;  %v9462_v57 = vld [vmem:[#allocation10 + $0x708] ss:$16 sps:$4 sm:$0xff]  }
 0x135   :  { %4051 = vmatpush1.bf16.msra.mxu0 %v9372_v56  ;;  %4396 = vmatprep.subr.bf16.mxu1 %v9383_v59  ;;  %v9459_v56 = vld [vmem:[#allocation10 + $0xb00] ss:$16 sps:$4 sm:$0xff]   ;;  %v9470_v59 = vld [vmem:[#allocation10 + $0x72c] ss:$16 sps:$4 sm:$0xff]  }
 0x136   :  { %4052 = vmatprep.subr.bf16.mxu0 %v9380_v58  ;;  %v9467_v58 = vld [vmem:[#allocation10 + $0xb24] ss:$16 sps:$4 sm:$0xff]  }
 0x138   :  { %4397 = vmatpush1.bf16.msra.mxu1 %v9381_v61  ;;  %v9468_v61 = vld [vmem:[#allocation10 + $0x728] ss:$16 sps:$4 sm:$0xff]  }
 0x139   :  { %4053 = vmatpush1.bf16.msra.mxu0 %v9378_v60  ;;  %4398 = vmatprep.subr.bf16.mxu1 %v9389_v63  ;;  %v9465_v60 = vld [vmem:[#allocation10 + $0xb20] ss:$16 sps:$4 sm:$0xff]   ;;  %v9476_v63 = vld [vmem:[#allocation10 + $0x74c] ss:$16 sps:$4 sm:$0xff]  }
 0x13a   :  { %4054 = vmatprep.subr.bf16.mxu0 %v9386_v62  ;;  %v9473_v62 = vld [vmem:[#allocation10 + $0xb44] ss:$16 sps:$4 sm:$0xff]  }
 0x13c   :  { %4399 = vmatpush1.bf16.msra.mxu1 %v9387_v1  ;;  %v9474_v1 = vld [vmem:[#allocation10 + $0x748] ss:$16 sps:$4 sm:$0xff]  }
 0x13d   :  { %4055 = vmatpush1.bf16.msra.mxu0 %v9384_v0  ;;  %4400 = vmatprep.subr.bf16.mxu1 %v9395_v3  ;;  %v9471_v0 = vld [vmem:[#allocation10 + $0xb40] ss:$16 sps:$4 sm:$0xff]   ;;  %v9482_v3 = vld [vmem:[#allocation10 + $0x76c] ss:$16 sps:$4 sm:$0xff]  }
 0x13e   :  { %4056 = vmatprep.subr.bf16.mxu0 %v9392_v2  ;;  %v9479_v2 = vld [vmem:[#allocation10 + $0xb64] ss:$16 sps:$4 sm:$0xff]  }
 0x140   :  { %4401 = vmatpush1.bf16.msra.mxu1 %v9393_v7  ;;  %v9480_v7 = vld [vmem:[#allocation10 + $0x768] ss:$16 sps:$4 sm:$0xff]  }
 0x141   :  { %4057 = vmatpush1.bf16.msra.mxu0 %v9390_v6  ;;  %4402 = vmatprep.subr.bf16.mxu1 %v9401_v9  ;;  %v9477_v6 = vld [vmem:[#allocation10 + $0xb60] ss:$16 sps:$4 sm:$0xff]   ;;  %v9488_v9 = vld [vmem:[#allocation10 + $0x78c] ss:$16 sps:$4 sm:$0xff]  }
 0x142   :  { %4058 = vmatprep.subr.bf16.mxu0 %v9398_v8  ;;  %v9485_v8 = vld [vmem:[#allocation10 + $0xb84] ss:$16 sps:$4 sm:$0xff]  }
 0x144   :  { %4403 = vmatpush1.bf16.msra.mxu1 %v9399_v12  ;;  %v9486_v12 = vld [vmem:[#allocation10 + $0x788] ss:$16 sps:$4 sm:$0xff]  }
 0x145   :  { %4059 = vmatpush1.bf16.msra.mxu0 %v9396_v11  ;;  %4404 = vmatprep.subr.bf16.mxu1 %v9407_v14  ;;  %v9483_v11 = vld [vmem:[#allocation10 + $0xb80] ss:$16 sps:$4 sm:$0xff]   ;;  %v9494_v14 = vld [vmem:[#allocation10 + $0x7ac] ss:$16 sps:$4 sm:$0xff]  }
 0x146   :  { %4060 = vmatprep.subr.bf16.mxu0 %v9404_v13  ;;  %v9491_v13 = vld [vmem:[#allocation10 + $0xba4] ss:$16 sps:$4 sm:$0xff]  }
 0x148   :  { %4405 = vmatpush1.bf16.msra.mxu1 %v9405_v17  ;;  %v9492_v17 = vld [vmem:[#allocation10 + $0x7a8] ss:$16 sps:$4 sm:$0xff]  }
 0x149   :  { %4061 = vmatpush1.bf16.msra.mxu0 %v9402_v16  ;;  %4417 = vmatprep.subr.bf16.mxu1 %v9416_v20  ;;  %v9489_v16 = vld [vmem:[#allocation10 + $0xba0] ss:$16 sps:$4 sm:$0xff]   ;;  %v9500_v20 = vld [vmem:[#allocation10 + $0x7cc] ss:$16 sps:$4 sm:$0xff]  }
 0x14a   :  { %4073 = vmatprep.subr.bf16.mxu0 %v9413_v18  ;;  %v9497_v18 = vld [vmem:[#allocation10 + $0xbc4] ss:$16 sps:$4 sm:$0xff]  }
 0x14b   :  { %4407 = vmatmul.mubr.bf16.vlgmr.msra.gmra.mrb[4].mxu1 %v10486_v10  ;;  %v9429_v10 = vld [vmem:[#allocation10 + $0xa60] ss:$16 sps:$4 sm:$0xff]  }
 0x14c   :  { %4063 = vmatmul.mubr.bf16.vlgmr.msra.gmra.mrb[0].mxu0 %v9408_v4  ;;  %4418 = vmatpush1.bf16.msra.mxu1 %v9414_v23  ;;  %v9495_v4 = vld [vmem:[#allocation10 + $0xbc0] ss:$16 sps:$4 sm:$0xff]   ;;  %v9503_v23 = vld [vmem:[#allocation10 + $0xbe4] ss:$16 sps:$4 sm:$0xff]  }
 0x14d   :  { %4074 = vmatpush1.bf16.msra.mxu0 %v9411_v22  ;;  %4419 = vmatprep.subr.bf16.mxu1 %v9422_v25  ;;  %v9498_v22 = vld [vmem:[#allocation10 + $0x7c8] ss:$16 sps:$4 sm:$0xff]   ;;  %v9501_v25 = vld [vmem:[#allocation10 + $0xbe0] ss:$16 sps:$4 sm:$0xff]  }
 0x14e   :  { %4075 = vmatprep.subr.bf16.mxu0 %v9419_v24  ;;  %4105 = vmatprep.mubr.bf16.mxu0 %v9509_v26  ;;  %v9506_v24 = vld [vmem:[#allocation10 + $0x7ec] ss:$16 sps:$4 sm:$0xff]   ;;  %v9504_v26 = vld [vmem:[#allocation10 + $0x7e8] ss:$16 sps:$4 sm:$0xff]  }
 0x14f   :  { %4449 = vmatprep.mubr.bf16.mxu1 %v10493_v19  ;;  %v9443_v19 = vld [vmem:[#allocation10 + $0xaa4] ss:$16 sps:$4 sm:$0xff]  }
 0x150   :  { %4420 = vmatpush1.bf16.msra.mxu1 %v9420_v5  ;;  %v9512_v5 = vld [vmem:[#allocation10 + $0xc04] ss:$16 sps:$4 sm:$0xff]  }
 0x151   :  { %4076 = vmatpush1.bf16.msra.mxu0 %v9417_v27  ;;  %4421 = vmatprep.subr.bf16.mxu1 %v9428_v28  ;;  %v9507_v27 = vld [vmem:[%s10754_s0 + $0x28] ss:$76 sps:$4 sm:$0xff]  }
 0x152   :  { %4077 = vmatprep.subr.bf16.mxu0 %v9425_v51  ;;  %v9515_v51 = vld [vmem:[#allocation10 + $0x80c] ss:$16 sps:$4 sm:$0xff]   ;;  %v9510_v28 = vld [vmem:[#allocation10 + $0xc00] ss:$16 sps:$4 sm:$0xff]  }
 0x154   :  { %4422 = vmatpush1.bf16.msra.mxu1 %v9426_v30  ;;  %v9518_v30 = vld [vmem:[#allocation10 + $0xc24] ss:$16 sps:$4 sm:$0xff]  }
 0x155   :  { %4078 = vmatpush1.bf16.msra.mxu0 %v9423_v29  ;;  %4423 = vmatprep.subr.bf16.mxu1 %v9434_v32  ;;  %v9513_v29 = vld [vmem:[#allocation10 + $0x808] ss:$16 sps:$4 sm:$0xff]   ;;  %v9608_v32 = vld [vmem:[%s10754_s0 + $0x34] ss:$76 sps:$4 sm:$0xff]  }
 0x156   :  { %4079 = vmatprep.subr.bf16.mxu0 %v9431_v31  ;;  %v9521_v31 = vld [vmem:[#allocation10 + $0x82c] ss:$16 sps:$4 sm:$0xff]  }
 0x158   :  { %4424 = vmatpush1.bf16.msra.mxu1 %v9432_v34  ;;  %v9519_v34 = vld [vmem:[#allocation10 + $0x828] ss:$16 sps:$4 sm:$0xff]  }
 0x159   :  { %4080 = vmatpush1.bf16.msra.mxu0 %v9429_v10  ;;  %4425 = vmatprep.subr.bf16.mxu1 %v9440_v35  ;;  %v9516_v10 = vld [vmem:[#allocation10 + $0xc20] ss:$16 sps:$4 sm:$0xff]   ;;  %v9527_v35 = vld [vmem:[#allocation10 + $0x84c] ss:$16 sps:$4 sm:$0xff]  }
 0x15a   :  { %4081 = vmatprep.subr.bf16.mxu0 %v9437_v33  ;;  %v9524_v33 = vld [vmem:[#allocation10 + $0xc44] ss:$16 sps:$4 sm:$0xff]  }
 0x15c   :  { %4426 = vmatpush1.bf16.msra.mxu1 %v9438_v37  ;;  %v9525_v37 = vld [vmem:[#allocation10 + $0x848] ss:$16 sps:$4 sm:$0xff]  }
 0x15d   :  { %4082 = vmatpush1.bf16.msra.mxu0 %v9435_v36  ;;  %4427 = vmatprep.subr.bf16.mxu1 %v9446_v38  ;;  %v9522_v36 = vld [vmem:[#allocation10 + $0xc40] ss:$16 sps:$4 sm:$0xff]   ;;  %v9533_v38 = vld [vmem:[#allocation10 + $0x86c] ss:$16 sps:$4 sm:$0xff]  }
 0x15e   :  { %4083 = vmatprep.subr.bf16.mxu0 %v9443_v19  ;;  %v10519_v43 = vpop.f32.mrb[0].mxu1  ;;  %v9530_v19 = vld [vmem:[#allocation10 + $0xc64] ss:$16 sps:$4 sm:$0xff]  }
 0x15f   :  { %v10521_v44 = vpop.f32.mrb[1].mxu1 }
 0x160   :  { %v10523_v47 = vpop.f32.mrb[2].mxu1  ;;  %4428 = vmatpush1.bf16.msra.mxu1 %v9444_v40  ;;  %v9536_v40 = vld [vmem:[#allocation10 + $0xc84] ss:$16 sps:$4 sm:$0xff]  }
 0x161   :  { %4084 = vmatpush1.bf16.msra.mxu0 %v9441_v39  ;;  %v10525_v49 = vpop.f32.mrb[3].mxu1  ;;  %4429 = vmatprep.subr.bf16.mxu1 %v9452_v42  ;;  %v9531_v39 = vld [vmem:[#allocation10 + $0x868] ss:$16 sps:$4 sm:$0xff]   ;;  %v9534_v42 = vld [vmem:[#allocation10 + $0xc80] ss:$16 sps:$4 sm:$0xff]  }
 0x162   :  { %4085 = vmatprep.subr.bf16.mxu0 %v9449_v41  ;;  %v9539_v41 = vld [vmem:[#allocation10 + $0x88c] ss:$16 sps:$4 sm:$0xff]  }
 0x164   :  { %4430 = vmatpush1.bf16.msra.mxu1 %v9450_v46  ;;  %v9545_v46 = vld [vmem:[#allocation10 + $0x8ac] ss:$16 sps:$4 sm:$0xff]  }
 0x165   :  { %4086 = vmatpush1.bf16.msra.mxu0 %v9447_v45  ;;  %4431 = vmatprep.subr.bf16.mxu1 %v9458_v50  ;;  %v9542_v45 = vld [vmem:[#allocation10 + $0xca4] ss:$16 sps:$4 sm:$0xff]   ;;  %v9543_v50 = vld [vmem:[#allocation10 + $0x8a8] ss:$16 sps:$4 sm:$0xff]  }
 0x166   :  { %4087 = vmatprep.subr.bf16.mxu0 %v9455_v48  ;;  %v9540_v48 = vld [vmem:[#allocation10 + $0xca0] ss:$16 sps:$4 sm:$0xff]  }
 0x168   :  { %4432 = vmatpush1.bf16.msra.mxu1 %v9456_v53  ;;  %v9551_v53 = vld [vmem:[#allocation10 + $0x8cc] ss:$16 sps:$4 sm:$0xff]  }
 0x169   :  { %4088 = vmatpush1.bf16.msra.mxu0 %v9453_v52  ;;  %4433 = vmatprep.subr.bf16.mxu1 %v9464_v55  ;;  %v9548_v52 = vld [vmem:[#allocation10 + $0xcc4] ss:$16 sps:$4 sm:$0xff]   ;;  %v9549_v55 = vld [vmem:[#allocation10 + $0x8c8] ss:$16 sps:$4 sm:$0xff]  }
 0x16a   :  { %4089 = vmatprep.subr.bf16.mxu0 %v9461_v54  ;;  %v9546_v54 = vld [vmem:[#allocation10 + $0xcc0] ss:$16 sps:$4 sm:$0xff]  }
 0x16c   :  { %4434 = vmatpush1.bf16.msra.mxu1 %v9462_v57  ;;  %v9557_v57 = vld [vmem:[#allocation10 + $0x8ec] ss:$16 sps:$4 sm:$0xff]  }
 0x16d   :  { %4090 = vmatpush1.bf16.msra.mxu0 %v9459_v56  ;;  %4435 = vmatprep.subr.bf16.mxu1 %v9470_v59  ;;  %v9554_v56 = vld [vmem:[#allocation10 + $0xce4] ss:$16 sps:$4 sm:$0xff]   ;;  %v9555_v59 = vld [vmem:[#allocation10 + $0x8e8] ss:$16 sps:$4 sm:$0xff]  }
 0x16e   :  { %4091 = vmatprep.subr.bf16.mxu0 %v9467_v58  ;;  %v9552_v58 = vld [vmem:[#allocation10 + $0xce0] ss:$16 sps:$4 sm:$0xff]  }
 0x170   :  { %4436 = vmatpush1.bf16.msra.mxu1 %v9468_v61  ;;  %v9563_v61 = vld [vmem:[#allocation10 + $0x90c] ss:$16 sps:$4 sm:$0xff]  }
 0x171   :  { %4092 = vmatpush1.bf16.msra.mxu0 %v9465_v60  ;;  %4437 = vmatprep.subr.bf16.mxu1 %v9476_v63  ;;  %v9560_v60 = vld [vmem:[#allocation10 + $0xd04] ss:$16 sps:$4 sm:$0xff]   ;;  %v9561_v63 = vld [vmem:[#allocation10 + $0x908] ss:$16 sps:$4 sm:$0xff]  }
 0x172   :  { %4093 = vmatprep.subr.bf16.mxu0 %v9473_v62  ;;  %v9558_v62 = vld [vmem:[#allocation10 + $0xd00] ss:$16 sps:$4 sm:$0xff]  }
 0x174   :  { %4438 = vmatpush1.bf16.msra.mxu1 %v9474_v1  ;;  %v9569_v1 = vld [vmem:[#allocation10 + $0x92c] ss:$16 sps:$4 sm:$0xff]  }
 0x175   :  { %4094 = vmatpush1.bf16.msra.mxu0 %v9471_v0  ;;  %4439 = vmatprep.subr.bf16.mxu1 %v9482_v3  ;;  %v9566_v0 = vld [vmem:[#allocation10 + $0xd24] ss:$16 sps:$4 sm:$0xff]   ;;  %v9567_v3 = vld [vmem:[#allocation10 + $0x928] ss:$16 sps:$4 sm:$0xff]  }
 0x176   :  { %4095 = vmatprep.subr.bf16.mxu0 %v9479_v2  ;;  %v9564_v2 = vld [vmem:[#allocation10 + $0xd20] ss:$16 sps:$4 sm:$0xff]  }
 0x178   :  { %4440 = vmatpush1.bf16.msra.mxu1 %v9480_v7  ;;  %v9575_v7 = vld [vmem:[#allocation10 + $0x94c] ss:$16 sps:$4 sm:$0xff]  }
 0x179   :  { %4096 = vmatpush1.bf16.msra.mxu0 %v9477_v6  ;;  %4441 = vmatprep.subr.bf16.mxu1 %v9488_v9  ;;  %v9572_v6 = vld [vmem:[#allocation10 + $0xd44] ss:$16 sps:$4 sm:$0xff]   ;;  %v9573_v9 = vld [vmem:[#allocation10 + $0x948] ss:$16 sps:$4 sm:$0xff]  }
 0x17a   :  { %4097 = vmatprep.subr.bf16.mxu0 %v9485_v8  ;;  %v9570_v8 = vld [vmem:[#allocation10 + $0xd40] ss:$16 sps:$4 sm:$0xff]  }
 0x17c   :  { %4442 = vmatpush1.bf16.msra.mxu1 %v9486_v12  ;;  %v9581_v12 = vld [vmem:[#allocation10 + $0x96c] ss:$16 sps:$4 sm:$0xff]  }
 0x17d   :  { %4098 = vmatpush1.bf16.msra.mxu0 %v9483_v11  ;;  %4443 = vmatprep.subr.bf16.mxu1 %v9494_v14  ;;  %v9578_v11 = vld [vmem:[#allocation10 + $0xd64] ss:$16 sps:$4 sm:$0xff]   ;;  %v9579_v14 = vld [vmem:[#allocation10 + $0x968] ss:$16 sps:$4 sm:$0xff]  }
 0x17e   :  { %4099 = vmatprep.subr.bf16.mxu0 %v9491_v13  ;;  %v9576_v13 = vld [vmem:[#allocation10 + $0xd60] ss:$16 sps:$4 sm:$0xff]  }
 0x180   :  { %4444 = vmatpush1.bf16.msra.mxu1 %v9492_v17  ;;  %v9587_v17 = vld [vmem:[#allocation10 + $0x98c] ss:$16 sps:$4 sm:$0xff]  }
 0x181   :  { %4100 = vmatpush1.bf16.msra.mxu0 %v9489_v16  ;;  %4445 = vmatprep.subr.bf16.mxu1 %v9500_v20  ;;  %v9584_v16 = vld [vmem:[#allocation10 + $0xd84] ss:$16 sps:$4 sm:$0xff]   ;;  %v9585_v20 = vld [vmem:[#allocation10 + $0x988] ss:$16 sps:$4 sm:$0xff]  }
 0x182   :  { %4101 = vmatprep.subr.bf16.mxu0 %v9497_v18  ;;  %v9582_v18 = vld [vmem:[#allocation10 + $0xd80] ss:$16 sps:$4 sm:$0xff]  }
 0x184   :  { %4446 = vmatpush1.bf16.msra.mxu1 %v9498_v22  ;;  %v9593_v22 = vld [vmem:[#allocation10 + $0x9ac] ss:$16 sps:$4 sm:$0xff]  }
 0x185   :  { %4102 = vmatpush1.bf16.msra.mxu0 %v9495_v4  ;;  %4447 = vmatprep.subr.bf16.mxu1 %v9506_v24  ;;  %v9590_v4 = vld [vmem:[#allocation10 + $0xda4] ss:$16 sps:$4 sm:$0xff]   ;;  %v9591_v24 = vld [vmem:[#allocation10 + $0x9a8] ss:$16 sps:$4 sm:$0xff]  }
 0x186   :  { %4103 = vmatprep.subr.bf16.mxu0 %v9503_v23  ;;  %v9588_v23 = vld [vmem:[#allocation10 + $0xda0] ss:$16 sps:$4 sm:$0xff]  }
 0x188   :  { %4448 = vmatpush1.bf16.msra.mxu1 %v9504_v26  ;;  %v9599_v26 = vld [vmem:[#allocation10 + $0x9cc] ss:$16 sps:$4 sm:$0xff]  }
 0x189   :  { %4104 = vmatpush1.bf16.msra.mxu0 %v9501_v25  ;;  %4460 = vmatprep.subr.bf16.mxu1 %v9515_v51  ;;  %v9596_v25 = vld [vmem:[#allocation10 + $0xdc4] ss:$16 sps:$4 sm:$0xff]  }
 0x18a   :  { %4116 = vmatprep.subr.bf16.mxu0 %v9512_v5  ;;  %v9597_v5 = vld [vmem:[#allocation10 + $0x9c8] ss:$16 sps:$4 sm:$0xff]   ;;  %v9602_v51 = vld [vmem:[#allocation10 + $0xde4] ss:$16 sps:$4 sm:$0xff]  }
 0x18b   :  { %4450 = vmatmul.mubr.bf16.vlgmr.msra.gmra.mrb[4].mxu1 %v10500_v15  ;;  %v9528_v15 = vld [vmem:[#allocation10 + $0xc60] ss:$16 sps:$4 sm:$0xff]  }
 0x18c   :  { %4106 = vmatmul.mubr.bf16.vlgmr.msra.gmra.mrb[0].mxu0 %v9507_v27  ;;  %4461 = vmatpush1.bf16.msra.mxu1 %v9513_v29  ;;  %v9594_v27 = vld [vmem:[#allocation10 + $0xdc0] ss:$16 sps:$4 sm:$0xff]  }
 0x18d   :  { %4117 = vmatpush1.bf16.msra.mxu0 %v9510_v28  ;;  %4462 = vmatprep.subr.bf16.mxu1 %v9521_v31  ;;  %v9605_v28 = vld [vmem:[#allocation10 + $0x9ec] ss:$16 sps:$4 sm:$0xff]   ;;  %v9600_v29 = vld [vmem:[#allocation10 + $0xde0] ss:$16 sps:$4 sm:$0xff]  }
 0x18e   :  { %4118 = vmatprep.subr.bf16.mxu0 %v9518_v30  ;;  %4148 = vmatprep.mubr.bf16.mxu0 %v9608_v32  ;;  %v9603_v30 = vld [vmem:[#allocation10 + $0x9e8] ss:$16 sps:$4 sm:$0xff]   ;;  %v9611_v32 = vld [vmem:[#allocation10 + $0xe04] ss:$16 sps:$4 sm:$0xff]  }
 0x18f   :  { %4492 = vmatprep.mubr.bf16.mxu1 %v10505_v21  ;;  %v9537_v21 = vld [vmem:[#allocation10 + $0x888] ss:$16 sps:$4 sm:$0xff]  }
 0x190   :  { %4463 = vmatpush1.bf16.msra.mxu1 %v9519_v34  ;;  %v10538_v31 = vld [vmem:[%s10754_s0 + $0x30] ss:$76 sps:$4 sm:$0xff]  }
 0x191   :  { %4119 = vmatpush1.bf16.msra.mxu0 %v9516_v10  ;;  %4464 = vmatprep.subr.bf16.mxu1 %v9527_v35  ;;  %v9614_v10 = vld [vmem:[#allocation10 + $0xa0c] ss:$16 sps:$4 sm:$0xff]   ;;  %v9609_v34 = vld [vmem:[#allocation10 + $0xe00] ss:$16 sps:$4 sm:$0xff]   ;;  %v9617_v35 = vld [vmem:[#allocation10 + $0xe24] ss:$16 sps:$4 sm:$0xff]  }
 0x192   :  { %4120 = vmatprep.subr.bf16.mxu0 %v9524_v33  ;;  %v9612_v33 = vld [vmem:[#allocation10 + $0xa08] ss:$16 sps:$4 sm:$0xff]  }
 0x194   :  { %4465 = vmatpush1.bf16.msra.mxu1 %v9525_v37  ;;  %v10543_v37 = vld [vmem:[%s10754_s0 + $0x3c] ss:$76 sps:$4 sm:$0xff]  }
 0x195   :  { %4121 = vmatpush1.bf16.msra.mxu0 %v9522_v36  ;;  %4466 = vmatprep.subr.bf16.mxu1 %v9533_v38  ;;  %v9620_v36 = vld [vmem:[#allocation10 + $0xa2c] ss:$16 sps:$4 sm:$0xff]   ;;  %v9615_v38 = vld [vmem:[#allocation10 + $0xe20] ss:$16 sps:$4 sm:$0xff]  }
 0x196   :  { %4122 = vmatprep.subr.bf16.mxu0 %v9530_v19  ;;  %v10254_v19 = vld [vmem:[%s10754_s0 + $0x20] ss:$76 sps:$4 sm:$0xff]  }
 0x198   :  { %4467 = vmatpush1.bf16.msra.mxu1 %v9531_v39  ;;  %v9623_v39 = vld [vmem:[#allocation10 + $0xe44] ss:$16 sps:$4 sm:$0xff]  }
 0x199   :  { %4123 = vmatpush1.bf16.msra.mxu0 %v9528_v15  ;;  %4468 = vmatprep.subr.bf16.mxu1 %v9539_v41  ;;  %v9618_v15 = vld [vmem:[#allocation10 + $0xa28] ss:$16 sps:$4 sm:$0xff]  }
 0x19a   :  { %4124 = vmatprep.subr.bf16.mxu0 %v9536_v40  ;;  %v9626_v40 = vld [vmem:[#allocation10 + $0xa4c] ss:$16 sps:$4 sm:$0xff]  }
 0x19b   :  { %v10255_v41 = vld [vmem:[%s10754_s0 + $0x2c] ss:$76 sps:$4 sm:$0xff]  }
 0x19c   :  { %4469 = vmatpush1.bf16.msra.mxu1 %v9537_v21  ;;  %v9624_v21 = vld [vmem:[#allocation10 + $0xa48] ss:$16 sps:$4 sm:$0xff]  }
 0x19d   :  { %4125 = vmatpush1.bf16.msra.mxu0 %v9534_v42  ;;  %4470 = vmatprep.subr.bf16.mxu1 %v9545_v46  ;;  %v9621_v42 = vld [vmem:[#allocation10 + $0xe40] ss:$16 sps:$4 sm:$0xff]   ;;  %v9632_v46 = vld [vmem:[#allocation10 + $0xa6c] ss:$16 sps:$4 sm:$0xff]  }
 0x19e   :  { %4126 = vmatprep.subr.bf16.mxu0 %v9542_v45  ;;  %v9629_v45 = vld [vmem:[#allocation10 + $0xe64] ss:$16 sps:$4 sm:$0xff]  }
 0x1a0   :  { %4471 = vmatpush1.bf16.msra.mxu1 %v9543_v50  ;;  %v9630_v50 = vld [vmem:[#allocation10 + $0xa68] ss:$16 sps:$4 sm:$0xff]  }
 0x1a1   :  { %4127 = vmatpush1.bf16.msra.mxu0 %v9540_v48  ;;  %4472 = vmatprep.subr.bf16.mxu1 %v9551_v53  ;;  %v9627_v48 = vld [vmem:[#allocation10 + $0xe60] ss:$16 sps:$4 sm:$0xff]   ;;  %v9638_v53 = vld [vmem:[#allocation10 + $0xa8c] ss:$16 sps:$4 sm:$0xff]  }
 0x1a2   :  { %4128 = vmatprep.subr.bf16.mxu0 %v9548_v52  ;;  %v9635_v52 = vld [vmem:[#allocation10 + $0xe84] ss:$16 sps:$4 sm:$0xff]  }
 0x1a4   :  { %4473 = vmatpush1.bf16.msra.mxu1 %v9549_v55  ;;  %v9636_v55 = vld [vmem:[#allocation10 + $0xa88] ss:$16 sps:$4 sm:$0xff]  }
 0x1a5   :  { %4129 = vmatpush1.bf16.msra.mxu0 %v9546_v54  ;;  %4474 = vmatprep.subr.bf16.mxu1 %v9557_v57  ;;  %v9633_v54 = vld [vmem:[#allocation10 + $0xe80] ss:$16 sps:$4 sm:$0xff]   ;;  %v9644_v57 = vld [vmem:[#allocation10 + $0xaac] ss:$16 sps:$4 sm:$0xff]  }
 0x1a6   :  { %4130 = vmatprep.subr.bf16.mxu0 %v9554_v56  ;;  %v9641_v56 = vld [vmem:[#allocation10 + $0xea4] ss:$16 sps:$4 sm:$0xff]  }
 0x1a8   :  { %4475 = vmatpush1.bf16.msra.mxu1 %v9555_v59  ;;  %v9642_v59 = vld [vmem:[#allocation10 + $0xaa8] ss:$16 sps:$4 sm:$0xff]  }
 0x1a9   :  { %4131 = vmatpush1.bf16.msra.mxu0 %v9552_v58  ;;  %4476 = vmatprep.subr.bf16.mxu1 %v9563_v61  ;;  %v9639_v58 = vld [vmem:[#allocation10 + $0xea0] ss:$16 sps:$4 sm:$0xff]   ;;  %v9650_v61 = vld [vmem:[#allocation10 + $0xacc] ss:$16 sps:$4 sm:$0xff]  }
 0x1aa   :  { %4132 = vmatprep.subr.bf16.mxu0 %v9560_v60  ;;  %v9647_v60 = vld [vmem:[#allocation10 + $0xec4] ss:$16 sps:$4 sm:$0xff]  }
 0x1ac   :  { %4477 = vmatpush1.bf16.msra.mxu1 %v9561_v63  ;;  %v9648_v63 = vld [vmem:[#allocation10 + $0xac8] ss:$16 sps:$4 sm:$0xff]  }
 0x1ad   :  { %4133 = vmatpush1.bf16.msra.mxu0 %v9558_v62  ;;  %4478 = vmatprep.subr.bf16.mxu1 %v9569_v1  ;;  %v9645_v62 = vld [vmem:[#allocation10 + $0xec0] ss:$16 sps:$4 sm:$0xff]   ;;  %v9656_v1 = vld [vmem:[#allocation10 + $0xaec] ss:$16 sps:$4 sm:$0xff]  }
 0x1ae   :  { %4134 = vmatprep.subr.bf16.mxu0 %v9566_v0  ;;  %v9653_v0 = vld [vmem:[#allocation10 + $0xee4] ss:$16 sps:$4 sm:$0xff]  }
 0x1b0   :  { %4479 = vmatpush1.bf16.msra.mxu1 %v9567_v3  ;;  %v9654_v3 = vld [vmem:[#allocation10 + $0xae8] ss:$16 sps:$4 sm:$0xff]  }
 0x1b1   :  { %4135 = vmatpush1.bf16.msra.mxu0 %v9564_v2  ;;  %4480 = vmatprep.subr.bf16.mxu1 %v9575_v7  ;;  %v9651_v2 = vld [vmem:[#allocation10 + $0xee0] ss:$16 sps:$4 sm:$0xff]   ;;  %v9662_v7 = vld [vmem:[#allocation10 + $0xb0c] ss:$16 sps:$4 sm:$0xff]  }
 0x1b2   :  { %4136 = vmatprep.subr.bf16.mxu0 %v9572_v6  ;;  %v9659_v6 = vld [vmem:[#allocation10 + $0xf04] ss:$16 sps:$4 sm:$0xff]  }
 0x1b4   :  { %4481 = vmatpush1.bf16.msra.mxu1 %v9573_v9  ;;  %v9660_v9 = vld [vmem:[#allocation10 + $0xb08] ss:$16 sps:$4 sm:$0xff]  }
 0x1b5   :  { %4137 = vmatpush1.bf16.msra.mxu0 %v9570_v8  ;;  %4482 = vmatprep.subr.bf16.mxu1 %v9581_v12  ;;  %v9657_v8 = vld [vmem:[#allocation10 + $0xf00] ss:$16 sps:$4 sm:$0xff]   ;;  %v9668_v12 = vld [vmem:[#allocation10 + $0xb2c] ss:$16 sps:$4 sm:$0xff]  }
 0x1b6   :  { %4138 = vmatprep.subr.bf16.mxu0 %v9578_v11  ;;  %v9665_v11 = vld [vmem:[#allocation10 + $0xf24] ss:$16 sps:$4 sm:$0xff]  }
 0x1b8   :  { %4483 = vmatpush1.bf16.msra.mxu1 %v9579_v14  ;;  %v9666_v14 = vld [vmem:[#allocation10 + $0xb28] ss:$16 sps:$4 sm:$0xff]  }
 0x1b9   :  { %4139 = vmatpush1.bf16.msra.mxu0 %v9576_v13  ;;  %4484 = vmatprep.subr.bf16.mxu1 %v9587_v17  ;;  %v9663_v13 = vld [vmem:[#allocation10 + $0xf20] ss:$16 sps:$4 sm:$0xff]   ;;  %v9674_v17 = vld [vmem:[#allocation10 + $0xb4c] ss:$16 sps:$4 sm:$0xff]  }
 0x1ba   :  { %4140 = vmatprep.subr.bf16.mxu0 %v9584_v16  ;;  %v9671_v16 = vld [vmem:[#allocation10 + $0xf44] ss:$16 sps:$4 sm:$0xff]  }
 0x1bc   :  { %4485 = vmatpush1.bf16.msra.mxu1 %v9585_v20  ;;  %v9672_v20 = vld [vmem:[#allocation10 + $0xb48] ss:$16 sps:$4 sm:$0xff]  }
 0x1bd   :  { %4141 = vmatpush1.bf16.msra.mxu0 %v9582_v18  ;;  %4486 = vmatprep.subr.bf16.mxu1 %v9593_v22  ;;  %v9669_v18 = vld [vmem:[#allocation10 + $0xf40] ss:$16 sps:$4 sm:$0xff]   ;;  %v9680_v22 = vld [vmem:[#allocation10 + $0xb6c] ss:$16 sps:$4 sm:$0xff]  }
 0x1be   :  { %4142 = vmatprep.subr.bf16.mxu0 %v9590_v4  ;;  %v9677_v4 = vld [vmem:[#allocation10 + $0xf64] ss:$16 sps:$4 sm:$0xff]  }
 0x1c0   :  { %4487 = vmatpush1.bf16.msra.mxu1 %v9591_v24  ;;  %v9678_v24 = vld [vmem:[#allocation10 + $0xb68] ss:$16 sps:$4 sm:$0xff]  }
 0x1c1   :  { %4143 = vmatpush1.bf16.msra.mxu0 %v9588_v23  ;;  %4488 = vmatprep.subr.bf16.mxu1 %v9599_v26  ;;  %v9675_v23 = vld [vmem:[#allocation10 + $0xf60] ss:$16 sps:$4 sm:$0xff]   ;;  %v9686_v26 = vld [vmem:[#allocation10 + $0xb8c] ss:$16 sps:$4 sm:$0xff]  }
 0x1c2   :  { %4144 = vmatprep.subr.bf16.mxu0 %v9596_v25  ;;  %v9683_v25 = vld [vmem:[#allocation10 + $0xf84] ss:$16 sps:$4 sm:$0xff]  }
 0x1c4   :  { %4489 = vmatpush1.bf16.msra.mxu1 %v9597_v5  ;;  %v9684_v5 = vld [vmem:[#allocation10 + $0xb88] ss:$16 sps:$4 sm:$0xff]  }
 0x1c5   :  { %4145 = vmatpush1.bf16.msra.mxu0 %v9594_v27  ;;  %4490 = vmatprep.subr.bf16.mxu1 %v9605_v28  ;;  %v9681_v27 = vld [vmem:[#allocation10 + $0xf80] ss:$16 sps:$4 sm:$0xff]   ;;  %v9692_v28 = vld [vmem:[#allocation10 + $0xbac] ss:$16 sps:$4 sm:$0xff]  }
 0x1c6   :  { %4146 = vmatprep.subr.bf16.mxu0 %v9602_v51  ;;  %v9689_v51 = vld [vmem:[#allocation10 + $0xfa4] ss:$16 sps:$4 sm:$0xff]  }
 0x1c8   :  { %4491 = vmatpush1.bf16.msra.mxu1 %v9603_v30  ;;  %v9690_v30 = vld [vmem:[#allocation10 + $0xba8] ss:$16 sps:$4 sm:$0xff]  }
 0x1c9   :  { %4147 = vmatpush1.bf16.msra.mxu0 %v9600_v29  ;;  %4503 = vmatprep.subr.bf16.mxu1 %v9614_v10  ;;  %v9687_v29 = vld [vmem:[#allocation10 + $0xfa0] ss:$16 sps:$4 sm:$0xff]   ;;  %v9698_v10 = vld [vmem:[#allocation10 + $0xbcc] ss:$16 sps:$4 sm:$0xff]  }
 0x1ca   :  { %4159 = vmatprep.subr.bf16.mxu0 %v9611_v32  ;;  %v9695_v32 = vld [vmem:[#allocation10 + $0xfc4] ss:$16 sps:$4 sm:$0xff]  }
 0x1cb   :  { %4493 = vmatmul.mubr.bf16.vlgmr.msra.gmra.mrb[4].mxu1 %v10254_v19  ;;  %v9699_v19 = vld [vmem:[#allocation10 + $0xfe0] ss:$16 sps:$4 sm:$0xff]  }
 0x1cc   :  { %4149 = vmatmul.mubr.bf16.vlgmr.msra.gmra.mrb[0].mxu0 %v10538_v31  ;;  %4504 = vmatpush1.bf16.msra.mxu1 %v9612_v33  ;;  %v9696_v33 = vld [vmem:[#allocation10 + $0xbc8] ss:$16 sps:$4 sm:$0xff]  }
 0x1cd   :  { %4160 = vmatpush1.bf16.msra.mxu0 %v9609_v34  ;;  %4505 = vmatprep.subr.bf16.mxu1 %v9620_v36  ;;  %v9693_v34 = vld [vmem:[#allocation10 + $0xfc0] ss:$16 sps:$4 sm:$0xff]   ;;  %v9704_v36 = vld [vmem:[#allocation10 + $0xbec] ss:$16 sps:$4 sm:$0xff]  }
 0x1ce   :  { %4161 = vmatprep.subr.bf16.mxu0 %v9617_v35  ;;  %4191 = vmatprep.mubr.bf16.mxu0 %v10543_v37  ;;  %v9701_v35 = vld [vmem:[#allocation10 + $0xfe4] ss:$16 sps:$4 sm:$0xff]  }
 0x1cf   :  { %4535 = vmatprep.mubr.bf16.mxu1 %v10255_v41  ;;  %v9708_v41 = vld [vmem:[#allocation10 + $0x1000] ss:$16 sps:$4 sm:$0xff]  }
 0x1d0   :  { %4506 = vmatpush1.bf16.msra.mxu1 %v9618_v15  ;;  %v9710_v15 = vld [vmem:[#allocation10 + $0x1004] ss:$16 sps:$4 sm:$0xff]  }
 0x1d1   :  { %4162 = vmatpush1.bf16.msra.mxu0 %v9615_v38  ;;  %4507 = vmatprep.subr.bf16.mxu1 %v9626_v40  ;;  %v9702_v38 = vld [vmem:[#allocation10 + $0xbe8] ss:$16 sps:$4 sm:$0xff]  }
 0x1d2   :  { %4163 = vmatprep.subr.bf16.mxu0 %v9623_v39  ;;  %v9713_v39 = vld [vmem:[#allocation10 + $0xc0c] ss:$16 sps:$4 sm:$0xff]   ;;  %v10556_v40 = vld [vmem:[%s10754_s0 + $0x38] ss:$76 sps:$4 sm:$0xff]  }
 0x1d4   :  { %4508 = vmatpush1.bf16.msra.mxu1 %v9624_v21  ;;  %v9716_v21 = vld [vmem:[#allocation10 + $0x1024] ss:$16 sps:$4 sm:$0xff]  }
 0x1d5   :  { %4164 = vmatpush1.bf16.msra.mxu0 %v9621_v42  ;;  %4509 = vmatprep.subr.bf16.mxu1 %v9632_v46  ;;  %v9711_v42 = vld [vmem:[#allocation10 + $0xc08] ss:$16 sps:$4 sm:$0xff]   ;;  %v10561_v46 = vld [vmem:[%s10754_s0 + $0x44] ss:$76 sps:$4 sm:$0xff]  }
 0x1d6   :  { %4165 = vmatprep.subr.bf16.mxu0 %v9629_v45  ;;  %v9719_v45 = vld [vmem:[#allocation10 + $0xc2c] ss:$16 sps:$4 sm:$0xff]  }
 0x1d8   :  { %4510 = vmatpush1.bf16.msra.mxu1 %v9630_v50  ;;  %v9717_v50 = vld [vmem:[#allocation10 + $0xc28] ss:$16 sps:$4 sm:$0xff]  }
 0x1d9   :  { %4166 = vmatpush1.bf16.msra.mxu0 %v9627_v48  ;;  %4511 = vmatprep.subr.bf16.mxu1 %v9638_v53  ;;  %v9714_v48 = vld [vmem:[#allocation10 + $0x1020] ss:$16 sps:$4 sm:$0xff]   ;;  %v9722_v53 = vld [vmem:[#allocation10 + $0x1044] ss:$16 sps:$4 sm:$0xff]  }
 0x1da   :  { %4167 = vmatprep.subr.bf16.mxu0 %v9635_v52  ;;  %v10256_v52 = vld [vmem:[%s10754_s0 + $0x28] ss:$76 sps:$4 sm:$0xff]  }
 0x1dc   :  { %4512 = vmatpush1.bf16.msra.mxu1 %v9636_v55  ;;  %v9720_v55 = vld [vmem:[#allocation10 + $0x1040] ss:$16 sps:$4 sm:$0xff]  }
 0x1dd   :  { %4168 = vmatpush1.bf16.msra.mxu0 %v9633_v54  ;;  %4513 = vmatprep.subr.bf16.mxu1 %v9644_v57  ;;  %v9725_v54 = vld [vmem:[#allocation10 + $0xc4c] ss:$16 sps:$4 sm:$0xff]  }
 0x1de   :  { %4169 = vmatprep.subr.bf16.mxu0 %v9641_v56  ;;  %v9723_v56 = vld [vmem:[#allocation10 + $0xc48] ss:$16 sps:$4 sm:$0xff]   ;;  %v10257_v57 = vld [vmem:[%s10754_s0 + $0x34] ss:$76 sps:$4 sm:$0xff]  }
 0x1e0   :  { %4514 = vmatpush1.bf16.msra.mxu1 %v9642_v59  ;;  %v9731_v59 = vld [vmem:[#allocation10 + $0xc6c] ss:$16 sps:$4 sm:$0xff]  }
 0x1e1   :  { %4170 = vmatpush1.bf16.msra.mxu0 %v9639_v58  ;;  %4515 = vmatprep.subr.bf16.mxu1 %v9650_v61  ;;  %v9728_v58 = vld [vmem:[#allocation10 + $0x1064] ss:$16 sps:$4 sm:$0xff]   ;;  %v9729_v61 = vld [vmem:[#allocation10 + $0xc68] ss:$16 sps:$4 sm:$0xff]  }
 0x1e2   :  { %4171 = vmatprep.subr.bf16.mxu0 %v9647_v60  ;;  %v9726_v60 = vld [vmem:[#allocation10 + $0x1060] ss:$16 sps:$4 sm:$0xff]  }
 0x1e4   :  { %4516 = vmatpush1.bf16.msra.mxu1 %v9648_v63  ;;  %v9737_v63 = vld [vmem:[#allocation10 + $0xc8c] ss:$16 sps:$4 sm:$0xff]  }
 0x1e5   :  { %4172 = vmatpush1.bf16.msra.mxu0 %v9645_v62  ;;  %4517 = vmatprep.subr.bf16.mxu1 %v9656_v1  ;;  %v9734_v62 = vld [vmem:[#allocation10 + $0x1084] ss:$16 sps:$4 sm:$0xff]   ;;  %v9735_v1 = vld [vmem:[#allocation10 + $0xc88] ss:$16 sps:$4 sm:$0xff]  }
 0x1e6   :  { %4173 = vmatprep.subr.bf16.mxu0 %v9653_v0  ;;  %v9732_v0 = vld [vmem:[#allocation10 + $0x1080] ss:$16 sps:$4 sm:$0xff]  }
 0x1e8   :  { %4518 = vmatpush1.bf16.msra.mxu1 %v9654_v3  ;;  %v9743_v3 = vld [vmem:[#allocation10 + $0xcac] ss:$16 sps:$4 sm:$0xff]  }
 0x1e9   :  { %4174 = vmatpush1.bf16.msra.mxu0 %v9651_v2  ;;  %4519 = vmatprep.subr.bf16.mxu1 %v9662_v7  ;;  %v9740_v2 = vld [vmem:[#allocation10 + $0x10a4] ss:$16 sps:$4 sm:$0xff]   ;;  %v9741_v7 = vld [vmem:[#allocation10 + $0xca8] ss:$16 sps:$4 sm:$0xff]  }
 0x1ea   :  { %4175 = vmatprep.subr.bf16.mxu0 %v9659_v6  ;;  %v9738_v6 = vld [vmem:[#allocation10 + $0x10a0] ss:$16 sps:$4 sm:$0xff]  }
 0x1ec   :  { %4520 = vmatpush1.bf16.msra.mxu1 %v9660_v9  ;;  %v9749_v9 = vld [vmem:[#allocation10 + $0xccc] ss:$16 sps:$4 sm:$0xff]  }
 0x1ed   :  { %4176 = vmatpush1.bf16.msra.mxu0 %v9657_v8  ;;  %4521 = vmatprep.subr.bf16.mxu1 %v9668_v12  ;;  %v9746_v8 = vld [vmem:[#allocation10 + $0x10c4] ss:$16 sps:$4 sm:$0xff]   ;;  %v9747_v12 = vld [vmem:[#allocation10 + $0xcc8] ss:$16 sps:$4 sm:$0xff]  }
 0x1ee   :  { %4177 = vmatprep.subr.bf16.mxu0 %v9665_v11  ;;  %v9744_v11 = vld [vmem:[#allocation10 + $0x10c0] ss:$16 sps:$4 sm:$0xff]  }
 0x1f0   :  { %4522 = vmatpush1.bf16.msra.mxu1 %v9666_v14  ;;  %v9755_v14 = vld [vmem:[#allocation10 + $0xcec] ss:$16 sps:$4 sm:$0xff]  }
 0x1f1   :  { %4178 = vmatpush1.bf16.msra.mxu0 %v9663_v13  ;;  %4523 = vmatprep.subr.bf16.mxu1 %v9674_v17  ;;  %v9752_v13 = vld [vmem:[#allocation10 + $0x10e4] ss:$16 sps:$4 sm:$0xff]   ;;  %v9753_v17 = vld [vmem:[#allocation10 + $0xce8] ss:$16 sps:$4 sm:$0xff]  }
 0x1f2   :  { %4179 = vmatprep.subr.bf16.mxu0 %v9671_v16  ;;  %v9750_v16 = vld [vmem:[#allocation10 + $0x10e0] ss:$16 sps:$4 sm:$0xff]  }
 0x1f4   :  { %4524 = vmatpush1.bf16.msra.mxu1 %v9672_v20  ;;  %v9761_v20 = vld [vmem:[#allocation10 + $0xd0c] ss:$16 sps:$4 sm:$0xff]  }
 0x1f5   :  { %4180 = vmatpush1.bf16.msra.mxu0 %v9669_v18  ;;  %4525 = vmatprep.subr.bf16.mxu1 %v9680_v22  ;;  %v9758_v18 = vld [vmem:[#allocation10 + $0x1104] ss:$16 sps:$4 sm:$0xff]   ;;  %v9759_v22 = vld [vmem:[#allocation10 + $0xd08] ss:$16 sps:$4 sm:$0xff]  }
 0x1f6   :  { %4181 = vmatprep.subr.bf16.mxu0 %v9677_v4  ;;  %v9756_v4 = vld [vmem:[#allocation10 + $0x1100] ss:$16 sps:$4 sm:$0xff]  }
 0x1f8   :  { %4526 = vmatpush1.bf16.msra.mxu1 %v9678_v24  ;;  %v9767_v24 = vld [vmem:[#allocation10 + $0xd2c] ss:$16 sps:$4 sm:$0xff]  }
 0x1f9   :  { %4182 = vmatpush1.bf16.msra.mxu0 %v9675_v23  ;;  %4527 = vmatprep.subr.bf16.mxu1 %v9686_v26  ;;  %v9764_v23 = vld [vmem:[#allocation10 + $0x1124] ss:$16 sps:$4 sm:$0xff]   ;;  %v9765_v26 = vld [vmem:[#allocation10 + $0xd28] ss:$16 sps:$4 sm:$0xff]  }
 0x1fa   :  { %4183 = vmatprep.subr.bf16.mxu0 %v9683_v25  ;;  %v9762_v25 = vld [vmem:[#allocation10 + $0x1120] ss:$16 sps:$4 sm:$0xff]  }
 0x1fc   :  { %4528 = vmatpush1.bf16.msra.mxu1 %v9684_v5  ;;  %v9773_v5 = vld [vmem:[#allocation10 + $0xd4c] ss:$16 sps:$4 sm:$0xff]  }
 0x1fd   :  { %4184 = vmatpush1.bf16.msra.mxu0 %v9681_v27  ;;  %4529 = vmatprep.subr.bf16.mxu1 %v9692_v28  ;;  %v9770_v27 = vld [vmem:[#allocation10 + $0x1144] ss:$16 sps:$4 sm:$0xff]   ;;  %v9771_v28 = vld [vmem:[#allocation10 + $0xd48] ss:$16 sps:$4 sm:$0xff]  }
 0x1fe   :  { %4185 = vmatprep.subr.bf16.mxu0 %v9689_v51  ;;  %v9768_v51 = vld [vmem:[#allocation10 + $0x1140] ss:$16 sps:$4 sm:$0xff]  }
 0x200   :  { %4530 = vmatpush1.bf16.msra.mxu1 %v9690_v30  ;;  %v9779_v30 = vld [vmem:[#allocation10 + $0xd6c] ss:$16 sps:$4 sm:$0xff]  }
 0x201   :  { %4186 = vmatpush1.bf16.msra.mxu0 %v9687_v29  ;;  %4531 = vmatprep.subr.bf16.mxu1 %v9698_v10  ;;  %v9776_v29 = vld [vmem:[#allocation10 + $0x1164] ss:$16 sps:$4 sm:$0xff]   ;;  %v9777_v10 = vld [vmem:[#allocation10 + $0xd68] ss:$16 sps:$4 sm:$0xff]  }
 0x202   :  { %4187 = vmatprep.subr.bf16.mxu0 %v9695_v32  ;;  %v9774_v32 = vld [vmem:[#allocation10 + $0x1160] ss:$16 sps:$4 sm:$0xff]  }
 0x204   :  { %4532 = vmatpush1.bf16.msra.mxu1 %v9696_v33  ;;  %v9785_v33 = vld [vmem:[#allocation10 + $0xd8c] ss:$16 sps:$4 sm:$0xff]  }
 0x205   :  { %4188 = vmatpush1.bf16.msra.mxu0 %v9693_v34  ;;  %4533 = vmatprep.subr.bf16.mxu1 %v9704_v36  ;;  %v9782_v34 = vld [vmem:[#allocation10 + $0x1184] ss:$16 sps:$4 sm:$0xff]   ;;  %v9783_v36 = vld [vmem:[#allocation10 + $0xd88] ss:$16 sps:$4 sm:$0xff]  }
 0x206   :  { %4189 = vmatprep.subr.bf16.mxu0 %v9701_v35  ;;  %v9780_v35 = vld [vmem:[#allocation10 + $0x1180] ss:$16 sps:$4 sm:$0xff]  }
 0x208   :  { %4534 = vmatpush1.bf16.msra.mxu1 %v9702_v38  ;;  %v9791_v38 = vld [vmem:[#allocation10 + $0xdac] ss:$16 sps:$4 sm:$0xff]  }
 0x209   :  { %4190 = vmatpush1.bf16.msra.mxu0 %v9699_v19  ;;  %4546 = vmatprep.subr.bf16.mxu1 %v9713_v39  ;;  %v9788_v19 = vld [vmem:[#allocation10 + $0x11a4] ss:$16 sps:$4 sm:$0xff]   ;;  %v9789_v39 = vld [vmem:[#allocation10 + $0xda8] ss:$16 sps:$4 sm:$0xff]  }
 0x20a   :  { %4202 = vmatprep.subr.bf16.mxu0 %v9710_v15  ;;  %v9786_v15 = vld [vmem:[#allocation10 + $0x11a0] ss:$16 sps:$4 sm:$0xff]  }
 0x20b   :  { %4536 = vmatmul.mubr.bf16.vlgmr.msra.gmra.mrb[4].mxu1 %v10256_v52  ;;  %v9798_v52 = vld [vmem:[#allocation10 + $0x11e0] ss:$16 sps:$4 sm:$0xff]  }
 0x20c   :  { %4192 = vmatmul.mubr.bf16.vlgmr.msra.gmra.mrb[0].mxu0 %v10556_v40  ;;  %4547 = vmatpush1.bf16.msra.mxu1 %v9711_v42  ;;  %v9797_v42 = vld [vmem:[#allocation10 + $0xdcc] ss:$16 sps:$4 sm:$0xff]  }
 0x20d   :  { %4203 = vmatpush1.bf16.msra.mxu0 %v9708_v41  ;;  %4548 = vmatprep.subr.bf16.mxu1 %v9719_v45  ;;  %v9794_v41 = vld [vmem:[#allocation10 + $0x11c4] ss:$16 sps:$4 sm:$0xff]   ;;  %v9795_v45 = vld [vmem:[#allocation10 + $0xdc8] ss:$16 sps:$4 sm:$0xff]  }
 0x20e   :  { %4204 = vmatprep.subr.bf16.mxu0 %v9716_v21  ;;  %4234 = vmatprep.mubr.bf16.mxu0 %v10561_v46  ;;  %v9792_v21 = vld [vmem:[#allocation10 + $0x11c0] ss:$16 sps:$4 sm:$0xff]  }
 0x20f   :  { %4578 = vmatprep.mubr.bf16.mxu1 %v10257_v57  ;;  %v9807_v57 = vld [vmem:[#allocation10 + $0x1200] ss:$16 sps:$4 sm:$0xff]  }
 0x210   :  { %4549 = vmatpush1.bf16.msra.mxu1 %v9717_v50  ;;  %v9803_v50 = vld [vmem:[#allocation10 + $0xdec] ss:$16 sps:$4 sm:$0xff]  }
 0x211   :  { %4205 = vmatpush1.bf16.msra.mxu0 %v9714_v48  ;;  %4550 = vmatprep.subr.bf16.mxu1 %v9725_v54  ;;  %v9800_v48 = vld [vmem:[#allocation10 + $0x11e4] ss:$16 sps:$4 sm:$0xff]  }
 0x212   :  { %4206 = vmatprep.subr.bf16.mxu0 %v9722_v53  ;;  %v9801_v53 = vld [vmem:[#allocation10 + $0xde8] ss:$16 sps:$4 sm:$0xff]   ;;  %v9809_v54 = vld [vmem:[#allocation10 + $0x1204] ss:$16 sps:$4 sm:$0xff]  }
 0x214   :  { %4551 = vmatpush1.bf16.msra.mxu1 %v9723_v56  ;;  %v10574_v56 = vld [vmem:[%s10754_s0 + $0x40] ss:$76 sps:$4 sm:$0xff]  }
 0x215   :  { %4207 = vmatpush1.bf16.msra.mxu0 %v9720_v55  ;;  %4552 = vmatprep.subr.bf16.mxu1 %v9731_v59  ;;  %v9812_v55 = vld [vmem:[#allocation10 + $0xe0c] ss:$16 sps:$4 sm:$0xff]   ;;  %v9815_v59 = vld [vmem:[#allocation10 + $0x1224] ss:$16 sps:$4 sm:$0xff]  }
 0x216   :  { %4208 = vmatprep.subr.bf16.mxu0 %v9728_v58  ;;  %v9810_v58 = vld [vmem:[#allocation10 + $0xe08] ss:$16 sps:$4 sm:$0xff]  }
 0x218   :  { %4553 = vmatpush1.bf16.msra.mxu1 %v9729_v61  ;;  %v9813_v61 = vld [vmem:[#allocation10 + $0x1220] ss:$16 sps:$4 sm:$0xff]  }
 0x219   :  { %4209 = vmatpush1.bf16.msra.mxu0 %v9726_v60  ;;  %4554 = vmatprep.subr.bf16.mxu1 %v9737_v63  ;;  %v9818_v60 = vld [vmem:[#allocation10 + $0xe2c] ss:$16 sps:$4 sm:$0xff]   ;;  %v9821_v63 = vld [vmem:[#allocation10 + $0x1244] ss:$16 sps:$4 sm:$0xff]  }
 0x21a   :  { %4210 = vmatprep.subr.bf16.mxu0 %v9734_v62  ;;  %v9816_v62 = vld [vmem:[#allocation10 + $0xe28] ss:$16 sps:$4 sm:$0xff]  }
 0x21c   :  { %4555 = vmatpush1.bf16.msra.mxu1 %v9735_v1  ;;  %v10362_v1 = vmov 0  }
 0x21d   :  { %4211 = vmatpush1.bf16.msra.mxu0 %v9732_v0  ;;  %4556 = vmatprep.subr.bf16.mxu1 %v9743_v3  ;;  %v9824_v0 = vld [vmem:[#allocation10 + $0xe4c] ss:$16 sps:$4 sm:$0xff]   ;;  %v9822_v3 = vld [vmem:[#allocation10 + $0xe48] ss:$16 sps:$4 sm:$0xff]  }
 0x21e   :  { %4212 = vmatprep.subr.bf16.mxu0 %v9740_v2  ;;  %v9819_v2 = vld [vmem:[#allocation10 + $0x1240] ss:$16 sps:$4 sm:$0xff]  }
 0x220   :  { %4557 = vmatpush1.bf16.msra.mxu1 %v9741_v7  ;;  %v9825_v7 = vld [vmem:[#allocation10 + $0x1260] ss:$16 sps:$4 sm:$0xff]  }
 0x221   :  { %4213 = vmatpush1.bf16.msra.mxu0 %v9738_v6  ;;  %4558 = vmatprep.subr.bf16.mxu1 %v9749_v9  ;;  %v9830_v6 = vld [vmem:[#allocation10 + $0xe6c] ss:$16 sps:$4 sm:$0xff]   ;;  %v9833_v9 = vld [vmem:[#allocation10 + $0x1284] ss:$16 sps:$4 sm:$0xff]  }
 0x222   :  { %4214 = vmatprep.subr.bf16.mxu0 %v9746_v8  ;;  %v9828_v8 = vld [vmem:[#allocation10 + $0xe68] ss:$16 sps:$4 sm:$0xff]  }
 0x224   :  { %4559 = vmatpush1.bf16.msra.mxu1 %v9747_v12  ;;  %v9831_v12 = vld [vmem:[#allocation10 + $0x1280] ss:$16 sps:$4 sm:$0xff]  }
 0x225   :  { %4215 = vmatpush1.bf16.msra.mxu0 %v9744_v11  ;;  %4560 = vmatprep.subr.bf16.mxu1 %v9755_v14  ;;  %v9836_v11 = vld [vmem:[#allocation10 + $0xe8c] ss:$16 sps:$4 sm:$0xff]  }
 0x226   :  { %4216 = vmatprep.subr.bf16.mxu0 %v9752_v13  ;;  %v9839_v13 = vld [vmem:[#allocation10 + $0x12a4] ss:$16 sps:$4 sm:$0xff]   ;;  %v9842_v14 = vld [vmem:[#allocation10 + $0xeac] ss:$16 sps:$4 sm:$0xff]  }
 0x228   :  { %4561 = vmatpush1.bf16.msra.mxu1 %v9753_v17  ;;  %v9840_v17 = vld [vmem:[#allocation10 + $0xea8] ss:$16 sps:$4 sm:$0xff]  }
 0x229   :  { %4217 = vmatpush1.bf16.msra.mxu0 %v9750_v16  ;;  %4562 = vmatprep.subr.bf16.mxu1 %v9761_v20  ;;  %v9837_v16 = vld [vmem:[#allocation10 + $0x12a0] ss:$16 sps:$4 sm:$0xff]   ;;  %v9848_v20 = vld [vmem:[#allocation10 + $0xecc] ss:$16 sps:$4 sm:$0xff]  }
 0x22a   :  { %4218 = vmatprep.subr.bf16.mxu0 %v9758_v18  ;;  %v9845_v18 = vld [vmem:[#allocation10 + $0x12c4] ss:$16 sps:$4 sm:$0xff]  }
 0x22c   :  { %4563 = vmatpush1.bf16.msra.mxu1 %v9759_v22  ;;  %v9846_v22 = vld [vmem:[#allocation10 + $0xec8] ss:$16 sps:$4 sm:$0xff]  }
 0x22d   :  { %4219 = vmatpush1.bf16.msra.mxu0 %v9756_v4  ;;  %4564 = vmatprep.subr.bf16.mxu1 %v9767_v24  ;;  %v9843_v4 = vld [vmem:[#allocation10 + $0x12c0] ss:$16 sps:$4 sm:$0xff]   ;;  %v9854_v24 = vld [vmem:[#allocation10 + $0xeec] ss:$16 sps:$4 sm:$0xff]  }
 0x22e   :  { %4220 = vmatprep.subr.bf16.mxu0 %v9764_v23  ;;  %v9851_v23 = vld [vmem:[#allocation10 + $0x12e4] ss:$16 sps:$4 sm:$0xff]  }
 0x230   :  { %4565 = vmatpush1.bf16.msra.mxu1 %v9765_v26  ;;  %v9852_v26 = vld [vmem:[#allocation10 + $0xee8] ss:$16 sps:$4 sm:$0xff]  }
 0x231   :  { %4221 = vmatpush1.bf16.msra.mxu0 %v9762_v25  ;;  %4566 = vmatprep.subr.bf16.mxu1 %v9773_v5  ;;  %v9849_v25 = vld [vmem:[#allocation10 + $0x12e0] ss:$16 sps:$4 sm:$0xff]  }
 0x232   :  { %4222 = vmatprep.subr.bf16.mxu0 %v9770_v27  ;;  %v9858_v27 = vld [vmem:[#allocation10 + $0xf0c] ss:$16 sps:$4 sm:$0xff]   ;;  %v10583_v5 = vld [vmem:[%s10754_s0 + $0x48] ss:$76 sps:$4 sm:$0xff]  }
 0x234   :  { %4567 = vmatpush1.bf16.msra.mxu1 %v9771_v28  ;;  %v9861_v28 = vld [vmem:[#allocation10 + $0xf2c] ss:$16 sps:$4 sm:$0xff]  }
 0x235   :  { %4223 = vmatpush1.bf16.msra.mxu0 %v9768_v51  ;;  %4568 = vmatprep.subr.bf16.mxu1 %v9779_v30  ;;  %v9856_v51 = vld [vmem:[#allocation10 + $0xf08] ss:$16 sps:$4 sm:$0xff]   ;;  %v9864_v30 = vld [vmem:[#allocation10 + $0xf4c] ss:$16 sps:$4 sm:$0xff]  }
 0x236   :  { %4224 = vmatprep.subr.bf16.mxu0 %v9776_v29  ;;  %v9859_v29 = vld [vmem:[#allocation10 + $0xf28] ss:$16 sps:$4 sm:$0xff]  }
 0x238   :  { %4569 = vmatpush1.bf16.msra.mxu1 %v9777_v10  ;;  %v9867_v10 = vld [vmem:[#allocation10 + $0xf6c] ss:$16 sps:$4 sm:$0xff]  }
 0x239   :  { %4225 = vmatpush1.bf16.msra.mxu0 %v9774_v32  ;;  %4570 = vmatprep.subr.bf16.mxu1 %v9785_v33  ;;  %v9862_v32 = vld [vmem:[#allocation10 + $0xf48] ss:$16 sps:$4 sm:$0xff]   ;;  %v9870_v33 = vld [vmem:[#allocation10 + $0xf8c] ss:$16 sps:$4 sm:$0xff]  }
 0x23a   :  { %4226 = vmatprep.subr.bf16.mxu0 %v9782_v34  ;;  %v9865_v34 = vld [vmem:[#allocation10 + $0xf68] ss:$16 sps:$4 sm:$0xff]  }
 0x23c   :  { %4571 = vmatpush1.bf16.msra.mxu1 %v9783_v36  ;;  %v9873_v36 = vld [vmem:[#allocation10 + $0xfac] ss:$16 sps:$4 sm:$0xff]  }
 0x23d   :  { %4227 = vmatpush1.bf16.msra.mxu0 %v9780_v35  ;;  %4572 = vmatprep.subr.bf16.mxu1 %v9791_v38  ;;  %v9868_v35 = vld [vmem:[#allocation10 + $0xf88] ss:$16 sps:$4 sm:$0xff]   ;;  %v9876_v38 = vld [vmem:[#allocation10 + $0xfcc] ss:$16 sps:$4 sm:$0xff]  }
 0x23e   :  { %4228 = vmatprep.subr.bf16.mxu0 %v9788_v19  ;;  %v9871_v19 = vld [vmem:[#allocation10 + $0xfa8] ss:$16 sps:$4 sm:$0xff]  }
 0x240   :  { %4573 = vmatpush1.bf16.msra.mxu1 %v9789_v39  ;;  %v9879_v39 = vld [vmem:[#allocation10 + $0xfec] ss:$16 sps:$4 sm:$0xff]  }
 0x241   :  { %4229 = vmatpush1.bf16.msra.mxu0 %v9786_v15  ;;  %4574 = vmatprep.subr.bf16.mxu1 %v9797_v42  ;;  %v9874_v15 = vld [vmem:[#allocation10 + $0xfc8] ss:$16 sps:$4 sm:$0xff]   ;;  %v9882_v42 = vld [vmem:[#allocation10 + $0x100c] ss:$16 sps:$4 sm:$0xff]  }
 0x242   :  { %4230 = vmatprep.subr.bf16.mxu0 %v9794_v41  ;;  %v9877_v41 = vld [vmem:[#allocation10 + $0xfe8] ss:$16 sps:$4 sm:$0xff]  }
 0x244   :  { %4575 = vmatpush1.bf16.msra.mxu1 %v9795_v45  ;;  %v9885_v45 = vld [vmem:[#allocation10 + $0x102c] ss:$16 sps:$4 sm:$0xff]  }
 0x245   :  { %4231 = vmatpush1.bf16.msra.mxu0 %v9792_v21  ;;  %4576 = vmatprep.subr.bf16.mxu1 %v9803_v50  ;;  %v9880_v21 = vld [vmem:[#allocation10 + $0x1008] ss:$16 sps:$4 sm:$0xff]   ;;  %v9888_v50 = vld [vmem:[#allocation10 + $0x104c] ss:$16 sps:$4 sm:$0xff]  }
 0x246   :  { %4232 = vmatprep.subr.bf16.mxu0 %v9800_v48  ;;  %v9883_v48 = vld [vmem:[#allocation10 + $0x1028] ss:$16 sps:$4 sm:$0xff]  }
 0x248   :  { %4577 = vmatpush1.bf16.msra.mxu1 %v9801_v53  ;;  %v9891_v53 = vld [vmem:[#allocation10 + $0x106c] ss:$16 sps:$4 sm:$0xff]  }
 0x249   :  { %4233 = vmatpush1.bf16.msra.mxu0 %v9798_v52  ;;  %4589 = vmatprep.subr.bf16.mxu1 %v9812_v55  ;;  %v9886_v52 = vld [vmem:[#allocation10 + $0x1048] ss:$16 sps:$4 sm:$0xff]   ;;  %v9894_v55 = vld [vmem:[#allocation10 + $0x108c] ss:$16 sps:$4 sm:$0xff]  }
 0x24a   :  { %4245 = vmatprep.subr.bf16.mxu0 %v9809_v54  ;;  %v9889_v54 = vld [vmem:[#allocation10 + $0x1068] ss:$16 sps:$4 sm:$0xff]  }
 0x24b   :  { %4579 = vmatmul.mubr.bf16.vlgmr.msra.gmra.mrb[4].mxu1 %v10538_v31  ;;  %v9827_v31 = vld [vmem:[#allocation10 + $0x1264] ss:$16 sps:$4 sm:$0xff]  }
 0x24c   :  { %4235 = vmatmul.mubr.bf16.vlgmr.msra.gmra.mrb[0].mxu0 %v10574_v56  ;;  %4590 = vmatpush1.bf16.msra.mxu1 %v9810_v58  ;;  %v9897_v58 = vld [vmem:[#allocation10 + $0x10ac] ss:$16 sps:$4 sm:$0xff]  }
 0x24d   :  { %4246 = vmatpush1.bf16.msra.mxu0 %v9807_v57  ;;  %4591 = vmatprep.subr.bf16.mxu1 %v9818_v60  ;;  %v9892_v57 = vld [vmem:[#allocation10 + $0x1088] ss:$16 sps:$4 sm:$0xff]   ;;  %v9903_v60 = vld [vmem:[#allocation10 + $0x10ec] ss:$16 sps:$4 sm:$0xff]  }
 0x24e   :  { %4247 = vmatprep.subr.bf16.mxu0 %v9815_v59  ;;  %4277 = vmatprep.mubr.bf16.mxu0 %v10362_v1  ;;  %v9900_v59 = vld [vmem:[#allocation10 + $0x10cc] ss:$16 sps:$4 sm:$0xff]  }
 0x24f   :  { %4621 = vmatprep.mubr.bf16.mxu1 %v10543_v37  ;;  %v9834_v37 = vld [vmem:[#allocation10 + $0xe88] ss:$16 sps:$4 sm:$0xff]  }
 0x250   :  { %4592 = vmatpush1.bf16.msra.mxu1 %v9816_v62  ;;  %v9906_v62 = vld [vmem:[#allocation10 + $0x110c] ss:$16 sps:$4 sm:$0xff]  }
 0x251   :  { %4248 = vmatpush1.bf16.msra.mxu0 %v9813_v61  ;;  %4593 = vmatprep.subr.bf16.mxu1 %v9824_v0  ;;  %v9901_v61 = vld [vmem:[#allocation10 + $0x10e8] ss:$16 sps:$4 sm:$0xff]   ;;  %v9909_v0 = vld [vmem:[#allocation10 + $0x112c] ss:$16 sps:$4 sm:$0xff]  }
 0x252   :  { %4249 = vmatprep.subr.bf16.mxu0 %v9821_v63  ;;  %v9904_v63 = vld [vmem:[#allocation10 + $0x1108] ss:$16 sps:$4 sm:$0xff]  }
 0x254   :  { %4594 = vmatpush1.bf16.msra.mxu1 %v9822_v3  ;;  %v9912_v3 = vld [vmem:[#allocation10 + $0x114c] ss:$16 sps:$4 sm:$0xff]  }
 0x255   :  { %4250 = vmatpush1.bf16.msra.mxu0 %v9819_v2  ;;  %4595 = vmatprep.subr.bf16.mxu1 %v9830_v6  ;;  %v9907_v2 = vld [vmem:[#allocation10 + $0x1128] ss:$16 sps:$4 sm:$0xff]   ;;  %v9915_v6 = vld [vmem:[#allocation10 + $0x116c] ss:$16 sps:$4 sm:$0xff]  }
 0x256   :  { %4251 = vmatprep.subr.bf16.mxu0 %v9827_v31  ;;  %v9910_v31 = vld [vmem:[#allocation10 + $0x1148] ss:$16 sps:$4 sm:$0xff]  }
 0x258   :  { %4596 = vmatpush1.bf16.msra.mxu1 %v9828_v8  ;;  %v9918_v8 = vld [vmem:[#allocation10 + $0x118c] ss:$16 sps:$4 sm:$0xff]  }
 0x259   :  { %4252 = vmatpush1.bf16.msra.mxu0 %v9825_v7  ;;  %4597 = vmatprep.subr.bf16.mxu1 %v9836_v11  ;;  %v9913_v7 = vld [vmem:[#allocation10 + $0x1168] ss:$16 sps:$4 sm:$0xff]   ;;  %v9921_v11 = vld [vmem:[#allocation10 + $0x11ac] ss:$16 sps:$4 sm:$0xff]  }
 0x25a   :  { %4253 = vmatprep.subr.bf16.mxu0 %v9833_v9  ;;  %v9916_v9 = vld [vmem:[#allocation10 + $0x1188] ss:$16 sps:$4 sm:$0xff]  }
 0x25c   :  { %4598 = vmatpush1.bf16.msra.mxu1 %v9834_v37  ;;  %v9924_v37 = vld [vmem:[#allocation10 + $0x11cc] ss:$16 sps:$4 sm:$0xff]  }
 0x25d   :  { %4254 = vmatpush1.bf16.msra.mxu0 %v9831_v12  ;;  %4599 = vmatprep.subr.bf16.mxu1 %v9842_v14  ;;  %v9919_v12 = vld [vmem:[#allocation10 + $0x11a8] ss:$16 sps:$4 sm:$0xff]   ;;  %v9927_v14 = vld [vmem:[#allocation10 + $0x11ec] ss:$16 sps:$4 sm:$0xff]  }
 0x25e   :  { %4255 = vmatprep.subr.bf16.mxu0 %v9839_v13  ;;  %v9922_v13 = vld [vmem:[#allocation10 + $0x11c8] ss:$16 sps:$4 sm:$0xff]  }
 0x260   :  { %4600 = vmatpush1.bf16.msra.mxu1 %v9840_v17  ;;  %v9930_v17 = vld [vmem:[#allocation10 + $0x120c] ss:$16 sps:$4 sm:$0xff]  }
 0x261   :  { %4256 = vmatpush1.bf16.msra.mxu0 %v9837_v16  ;;  %4601 = vmatprep.subr.bf16.mxu1 %v9848_v20  ;;  %v9925_v16 = vld [vmem:[#allocation10 + $0x11e8] ss:$16 sps:$4 sm:$0xff]   ;;  %v9933_v20 = vld [vmem:[#allocation10 + $0x122c] ss:$16 sps:$4 sm:$0xff]  }
 0x262   :  { %4257 = vmatprep.subr.bf16.mxu0 %v9845_v18  ;;  %v9928_v18 = vld [vmem:[#allocation10 + $0x1208] ss:$16 sps:$4 sm:$0xff]  }
 0x264   :  { %4602 = vmatpush1.bf16.msra.mxu1 %v9846_v22  ;;  %v9936_v22 = vld [vmem:[#allocation10 + $0x124c] ss:$16 sps:$4 sm:$0xff]  }
 0x265   :  { %4258 = vmatpush1.bf16.msra.mxu0 %v9843_v4  ;;  %4603 = vmatprep.subr.bf16.mxu1 %v9854_v24  ;;  %v9931_v4 = vld [vmem:[#allocation10 + $0x1228] ss:$16 sps:$4 sm:$0xff]   ;;  %v9939_v24 = vld [vmem:[#allocation10 + $0x126c] ss:$16 sps:$4 sm:$0xff]  }
 0x266   :  { %4259 = vmatprep.subr.bf16.mxu0 %v9851_v23  ;;  %v9934_v23 = vld [vmem:[#allocation10 + $0x1248] ss:$16 sps:$4 sm:$0xff]  }
 0x268   :  { %4604 = vmatpush1.bf16.msra.mxu1 %v9852_v26  ;;  %v9942_v26 = vld [vmem:[#allocation10 + $0x128c] ss:$16 sps:$4 sm:$0xff]  }
 0x269   :  { %4260 = vmatpush1.bf16.msra.mxu0 %v9849_v25  ;;  %4605 = vmatprep.subr.bf16.mxu1 %v9858_v27  ;;  %v9937_v25 = vld [vmem:[#allocation10 + $0x1268] ss:$16 sps:$4 sm:$0xff]  }
 0x26a   :  { %v9940_v27 = vld [vmem:[#allocation10 + $0x1288] ss:$16 sps:$4 sm:$0xff]  }
 0x26c   :  { %4278 = vmatmul.mubr.bf16.vlgmr.msra.gmra.mrb[0].mxu0 %v10583_v5  ;;  %4606 = vmatpush1.bf16.msra.mxu1 %v9856_v51  ;;  %v9945_v51 = vld [vmem:[#allocation10 + $0x12ac] ss:$16 sps:$4 sm:$0xff]  }
 0x26d   :  { %4607 = vmatprep.subr.bf16.mxu1 %v9861_v28  ;;  %v9948_v28 = vld [vmem:[#allocation10 + $0x12cc] ss:$16 sps:$4 sm:$0xff]  }
 0x270   :  { %4608 = vmatpush1.bf16.msra.mxu1 %v9859_v29  ;;  %v9951_v29 = vld [vmem:[#allocation10 + $0x12ec] ss:$16 sps:$4 sm:$0xff]  }
 0x271   :  { %4609 = vmatprep.subr.bf16.mxu1 %v9864_v30  ;;  %v9949_v30 = vld [vmem:[#allocation10 + $0x12e8] ss:$16 sps:$4 sm:$0xff]  }
 0x274   :  { %4610 = vmatpush1.bf16.msra.mxu1 %v9862_v32 }
 0x275   :  { %4611 = vmatprep.subr.bf16.mxu1 %v9867_v10 }
 0x278   :  { %4612 = vmatpush1.bf16.msra.mxu1 %v9865_v34 }
 0x279   :  { %4613 = vmatprep.subr.bf16.mxu1 %v9870_v33 }
 0x27c   :  { %4614 = vmatpush1.bf16.msra.mxu1 %v9868_v35 }
 0x27d   :  { %4615 = vmatprep.subr.bf16.mxu1 %v9873_v36 }
 0x280   :  { %4616 = vmatpush1.bf16.msra.mxu1 %v9871_v19 }
 0x281   :  { %4617 = vmatprep.subr.bf16.mxu1 %v9876_v38 }
 0x284   :  { %4618 = vmatpush1.bf16.msra.mxu1 %v9874_v15  ;;  %v10363_v15 = vmov 0.0  }
 0x285   :  { %4619 = vmatprep.subr.bf16.mxu1 %v9879_v39  ;;  %88 = vst [vmem:[#allocation8] sm:$0xf] %v10363_v15  ;;  %89 = vst [vmem:[#allocation8 + $0x4] sm:$0xf] %v10363_v15  ;;  %v9952_v39 = vld [vmem:[#allocation12] ss:$16 sps:$4 sm:$0xff]  }
 0x286   :  { %90 = vst [vmem:[#allocation8 + $0x8] sm:$0xf] %v10363_v15  ;;  %91 = vst [vmem:[#allocation9] sm:$0x3] %v10363_v15 }
 0x287   :  { %92 = vst [vmem:[#allocation9 + $0x2] sm:$0x3] %v10363_v15  ;;  %93 = vst [vmem:[#allocation9 + $0x4] sm:$0x3] %v10363_v15 }
 0x288   :  { %4620 = vmatpush1.bf16.msra.mxu1 %v9877_v41  ;;  %v9955_v41 = vld [vmem:[#allocation12 + $0x8] ss:$16 sps:$4 sm:$0xff]  }
 0x289   :  { %4632 = vmatprep.subr.bf16.mxu1 %v9882_v42 }
 0x28b   :  { %4622 = vmatmul.mubr.bf16.vlgmr.msra.gmra.mrb[4].mxu1 %v10556_v40  ;;  %v9895_v40 = vld [vmem:[#allocation10 + $0x10a8] ss:$16 sps:$4 sm:$0xff]  }
 0x28c   :  { %4633 = vmatpush1.bf16.msra.mxu1 %v9880_v21  ;;  %4664 = vmatprep.mubr.bf16.mxu1 %v10561_v46  ;;  %v9898_v46 = vld [vmem:[#allocation10 + $0x10c8] ss:$16 sps:$4 sm:$0xff]  }
 0x28d   :  { %4634 = vmatprep.subr.bf16.mxu1 %v9885_v45  ;;  %v9960_v45 = vld [vmem:[#allocation12 + $0x24] ss:$16 sps:$4 sm:$0xff]  }
 0x290   :  { %4635 = vmatpush1.bf16.msra.mxu1 %v9883_v48  ;;  %v9963_v48 = vld [vmem:[#allocation12 + $0x2c] ss:$16 sps:$4 sm:$0xff]  }
 0x291   :  { %4636 = vmatprep.subr.bf16.mxu1 %v9888_v50  ;;  %v9958_v50 = vld [vmem:[#allocation12 + $0x20] ss:$16 sps:$4 sm:$0xff]  }
 0x294   :  { %4637 = vmatpush1.bf16.msra.mxu1 %v9886_v52  ;;  %v9961_v52 = vld [vmem:[#allocation12 + $0x28] ss:$16 sps:$4 sm:$0xff]  }
 0x295   :  { %4638 = vmatprep.subr.bf16.mxu1 %v9891_v53 }
 0x298   :  { %4639 = vmatpush1.bf16.msra.mxu1 %v9889_v54  ;;  %v9966_v54 = vld [vmem:[#allocation12 + $0x44] ss:$16 sps:$4 sm:$0xff]  }
 0x299   :  { %4640 = vmatprep.subr.bf16.mxu1 %v9894_v55  ;;  %v9969_v55 = vld [vmem:[#allocation12 + $0x4c] ss:$16 sps:$4 sm:$0xff]  }
 0x29c   :  { %4641 = vmatpush1.bf16.msra.mxu1 %v9892_v57  ;;  %v9964_v57 = vld [vmem:[#allocation12 + $0x40] ss:$16 sps:$4 sm:$0xff]  }
 0x29d   :  { %4642 = vmatprep.subr.bf16.mxu1 %v9897_v58  ;;  %v9967_v58 = vld [vmem:[#allocation12 + $0x48] ss:$16 sps:$4 sm:$0xff]  }
 0x2a0   :  { %4643 = vmatpush1.bf16.msra.mxu1 %v9895_v40 }
 0x2a1   :  { %4644 = vmatprep.subr.bf16.mxu1 %v9900_v59  ;;  %v9972_v59 = vld [vmem:[#allocation12 + $0x64] ss:$16 sps:$4 sm:$0xff]  }
 0x2a4   :  { %4645 = vmatpush1.bf16.msra.mxu1 %v9898_v46  ;;  %v9975_v46 = vld [vmem:[#allocation12 + $0x6c] ss:$16 sps:$4 sm:$0xff]  }
 0x2a5   :  { %4646 = vmatprep.subr.bf16.mxu1 %v9903_v60  ;;  %v9970_v60 = vld [vmem:[#allocation12 + $0x60] ss:$16 sps:$4 sm:$0xff]  }
 0x2a8   :  { %4647 = vmatpush1.bf16.msra.mxu1 %v9901_v61  ;;  %v9973_v61 = vld [vmem:[#allocation12 + $0x68] ss:$16 sps:$4 sm:$0xff]  }
 0x2a9   :  { %4648 = vmatprep.subr.bf16.mxu1 %v9906_v62 }
 0x2ac   :  { %4649 = vmatpush1.bf16.msra.mxu1 %v9904_v63  ;;  %v9978_v63 = vld [vmem:[#allocation12 + $0x84] ss:$16 sps:$4 sm:$0xff]  }
 0x2ad   :  { %4650 = vmatprep.subr.bf16.mxu1 %v9909_v0  ;;  %v9981_v0 = vld [vmem:[#allocation12 + $0x8c] ss:$16 sps:$4 sm:$0xff]  }
 0x2b0   :  { %4651 = vmatpush1.bf16.msra.mxu1 %v9907_v2 }
 0x2b1   :  { %4652 = vmatprep.subr.bf16.mxu1 %v9912_v3  ;;  %v9976_v3 = vld [vmem:[#allocation12 + $0x80] ss:$16 sps:$4 sm:$0xff]  }
 0x2b4   :  { %4653 = vmatpush1.bf16.msra.mxu1 %v9910_v31  ;;  %v9979_v31 = vld [vmem:[#allocation12 + $0x88] ss:$16 sps:$4 sm:$0xff]  }
 0x2b5   :  { %4654 = vmatprep.subr.bf16.mxu1 %v9915_v6  ;;  %v9984_v6 = vld [vmem:[#allocation12 + $0xa4] ss:$16 sps:$4 sm:$0xff]  }
 0x2b8   :  { %4655 = vmatpush1.bf16.msra.mxu1 %v9913_v7  ;;  %v9987_v7 = vld [vmem:[#allocation12 + $0xac] ss:$16 sps:$4 sm:$0xff]  }
 0x2b9   :  { %4656 = vmatprep.subr.bf16.mxu1 %v9918_v8  ;;  %v9982_v8 = vld [vmem:[#allocation12 + $0xa0] ss:$16 sps:$4 sm:$0xff]  }
 0x2bc   :  { %4657 = vmatpush1.bf16.msra.mxu1 %v9916_v9  ;;  %v9985_v9 = vld [vmem:[#allocation12 + $0xa8] ss:$16 sps:$4 sm:$0xff]  }
 0x2bd   :  { %4658 = vmatprep.subr.bf16.mxu1 %v9921_v11  ;;  %v9990_v11 = vld [vmem:[#allocation12 + $0xc4] ss:$16 sps:$4 sm:$0xff]  }
 0x2c0   :  { %4659 = vmatpush1.bf16.msra.mxu1 %v9919_v12  ;;  %v9993_v12 = vld [vmem:[#allocation12 + $0xcc] ss:$16 sps:$4 sm:$0xff]  }
 0x2c1   :  { %4660 = vmatprep.subr.bf16.mxu1 %v9924_v37  ;;  %v9988_v37 = vld [vmem:[#allocation12 + $0xc0] ss:$16 sps:$4 sm:$0xff]  }
 0x2c4   :  { %4661 = vmatpush1.bf16.msra.mxu1 %v9922_v13  ;;  %v9991_v13 = vld [vmem:[#allocation12 + $0xc8] ss:$16 sps:$4 sm:$0xff]  }
 0x2c5   :  { %4662 = vmatprep.subr.bf16.mxu1 %v9927_v14  ;;  %v9996_v14 = vld [vmem:[#allocation12 + $0xe4] ss:$16 sps:$4 sm:$0xff]  }
 0x2c8   :  { %4663 = vmatpush1.bf16.msra.mxu1 %v9925_v16  ;;  %v9999_v16 = vld [vmem:[#allocation12 + $0xec] ss:$16 sps:$4 sm:$0xff]  }
 0x2c9   :  { %4675 = vmatprep.subr.bf16.mxu1 %v9930_v17  ;;  %v9994_v17 = vld [vmem:[#allocation12 + $0xe0] ss:$16 sps:$4 sm:$0xff]  }
 0x2cb   :  { %4665 = vmatmul.mubr.bf16.vlgmr.msra.gmra.mrb[4].mxu1 %v10574_v56  ;;  %v9943_v56 = vld [vmem:[#allocation10 + $0x12a8] ss:$16 sps:$4 sm:$0xff]  }
 0x2cc   :  { %4676 = vmatpush1.bf16.msra.mxu1 %v9928_v18  ;;  %4707 = vmatprep.mubr.bf16.mxu1 %v10362_v1  ;;  %v9946_v1 = vld [vmem:[#allocation10 + $0x12c8] ss:$16 sps:$4 sm:$0xff]  }
 0x2cd   :  { %4677 = vmatprep.subr.bf16.mxu1 %v9933_v20  ;;  %v9997_v18 = vld [vmem:[#allocation12 + $0xe8] ss:$16 sps:$4 sm:$0xff]   ;;  %v10002_v20 = vld [vmem:[#allocation12 + $0x104] ss:$16 sps:$4 sm:$0xff]  }
 0x2d0   :  { %4678 = vmatpush1.bf16.msra.mxu1 %v9931_v4  ;;  %v10005_v4 = vld [vmem:[#allocation12 + $0x10c] ss:$16 sps:$4 sm:$0xff]  }
 0x2d1   :  { %4679 = vmatprep.subr.bf16.mxu1 %v9936_v22  ;;  %v10000_v22 = vld [vmem:[#allocation12 + $0x100] ss:$16 sps:$4 sm:$0xff]  }
 0x2d4   :  { %4680 = vmatpush1.bf16.msra.mxu1 %v9934_v23  ;;  %v10003_v23 = vld [vmem:[#allocation12 + $0x108] ss:$16 sps:$4 sm:$0xff]  }
 0x2d5   :  { %4681 = vmatprep.subr.bf16.mxu1 %v9939_v24  ;;  %v10008_v24 = vld [vmem:[#allocation12 + $0x124] ss:$16 sps:$4 sm:$0xff]  }
 0x2d8   :  { %4682 = vmatpush1.bf16.msra.mxu1 %v9937_v25  ;;  %v10011_v25 = vld [vmem:[#allocation12 + $0x12c] ss:$16 sps:$4 sm:$0xff]  }
 0x2d9   :  { %4683 = vmatprep.subr.bf16.mxu1 %v9942_v26  ;;  %v10006_v26 = vld [vmem:[#allocation12 + $0x120] ss:$16 sps:$4 sm:$0xff]  }
 0x2dc   :  { %4684 = vmatpush1.bf16.msra.mxu1 %v9940_v27  ;;  %v10009_v27 = vld [vmem:[#allocation12 + $0x128] ss:$16 sps:$4 sm:$0xff]  }
 0x2dd   :  { %4685 = vmatprep.subr.bf16.mxu1 %v9945_v51  ;;  %v10014_v51 = vld [vmem:[#allocation12 + $0x144] ss:$16 sps:$4 sm:$0xff]  }
 0x2e0   :  { %4686 = vmatpush1.bf16.msra.mxu1 %v9943_v56  ;;  %v10017_v56 = vld [vmem:[#allocation12 + $0x14c] ss:$16 sps:$4 sm:$0xff]  }
 0x2e1   :  { %4687 = vmatprep.subr.bf16.mxu1 %v9948_v28  ;;  %v10012_v28 = vld [vmem:[#allocation12 + $0x140] ss:$16 sps:$4 sm:$0xff]  }
 0x2e4   :  { %4688 = vmatpush1.bf16.msra.mxu1 %v9946_v1  ;;  %v10015_v1 = vld [vmem:[#allocation12 + $0x148] ss:$16 sps:$4 sm:$0xff]  }
 0x2e5   :  { %4689 = vmatprep.subr.bf16.mxu1 %v9951_v29  ;;  %v10020_v29 = vld [vmem:[#allocation12 + $0x164] ss:$16 sps:$4 sm:$0xff]  }
 0x2e8   :  { %4690 = vmatpush1.bf16.msra.mxu1 %v9949_v30  ;;  %v10023_v30 = vld [vmem:[#allocation12 + $0x16c] ss:$16 sps:$4 sm:$0xff]  }
 0x2eb   :  { %4708 = vmatmul.mubr.bf16.vlgmr.msra.gmra.mrb[4].mxu1 %v10583_v5  ;;  %v9954_v5 = vld [vmem:[#allocation12 + $0x4] ss:$16 sps:$4 sm:$0xff]  }
 0x2ec   :  { %6110 = vmatprep.subr.bf16.mxu0 %v9954_v5  ;;  %v10041_v5 = vld [vmem:[#allocation12 + $0x1cc] ss:$16 sps:$4 sm:$0xff]  }
 0x2ed   :  { %6111 = vmatpush1.bf16.msra.mxu0 %v9952_v39 }
 0x2ee   :  { %6112 = vmatprep.subr.bf16.mxu0 %v9960_v45  ;;  %v10044_v45 = vld [vmem:[#allocation12 + $0x1e4] ss:$16 sps:$4 sm:$0xff]  }
 0x2f1   :  { %6113 = vmatpush1.bf16.msra.mxu0 %v9958_v50 }
 0x2f2   :  { %6114 = vmatprep.subr.bf16.mxu0 %v9966_v54 }
 0x2f5   :  { %6115 = vmatpush1.bf16.msra.mxu0 %v9964_v57  ;;  %v10045_v57 = vld [vmem:[#allocation12 + $0x1e8] ss:$16 sps:$4 sm:$0xff]  }
 0x2f6   :  { %6116 = vmatprep.subr.bf16.mxu0 %v9972_v59 }
 0x2f9   :  { %6117 = vmatpush1.bf16.msra.mxu0 %v9970_v60 }
 0x2fa   :  { %6118 = vmatprep.subr.bf16.mxu0 %v9978_v63 }
 0x2fd   :  { %6119 = vmatpush1.bf16.msra.mxu0 %v9976_v3 }
 0x2fe   :  { %6120 = vmatprep.subr.bf16.mxu0 %v9984_v6 }
 0x301   :  { %6121 = vmatpush1.bf16.msra.mxu0 %v9982_v8 }
 0x302   :  { %6122 = vmatprep.subr.bf16.mxu0 %v9990_v11 }
 0x305   :  { %6123 = vmatpush1.bf16.msra.mxu0 %v9988_v37 }
 0x306   :  { %6124 = vmatprep.subr.bf16.mxu0 %v9996_v14 }
 0x309   :  { %6125 = vmatpush1.bf16.msra.mxu0 %v9994_v17 }
 0x30a   :  { %6126 = vmatprep.subr.bf16.mxu0 %v10002_v20 }
 0x30d   :  { %6127 = vmatpush1.bf16.msra.mxu0 %v10000_v22 }
 0x30e   :  { %6128 = vmatprep.subr.bf16.mxu0 %v10008_v24 }
 0x311   :  { %6129 = vmatpush1.bf16.msra.mxu0 %v10006_v26 }
 0x312   :  { %6130 = vmatprep.subr.bf16.mxu0 %v10014_v51 }
 0x315   :  { %6131 = vmatpush1.bf16.msra.mxu0 %v10012_v28 }
 0x316   :  { %6132 = vmatprep.subr.bf16.mxu0 %v10020_v29 }
 0x33f   :  { %v4279_v32 = vpop.f32.mrb[0].mxu0 }
 0x340   :  { %v8914_v10 = vadd.f32 %v4279_v32, %v10519_v43  ;;  %v4281_v34 = vpop.f32.mrb[1].mxu0  ;;  %v10364_v43 = vmov 1983009808   ;;  %v10018_v32 = vld [vmem:[#allocation12 + $0x160] ss:$16 sps:$4 sm:$0xff]  }
 0x341   :  { %v8915_v33 = vadd.f32 %v4281_v34, %v10521_v44  ;;  %v4283_v35 = vpop.f32.mrb[2].mxu0  ;;  %v4734_v44 = vunpack.c.l.s4 %v10364_v43  ;;  %v10026_v34 = vld [vmem:[#allocation12 + $0x184] ss:$16 sps:$4 sm:$0xff]   ;;  %6133 = vmatpush1.bf16.msra.mxu0 %v10018_v32  ;;  %v10030_v43 = vld [vmem:[#allocation12 + $0x1a0] ss:$16 sps:$4 sm:$0xff]  }
 0x342   :  { %4718 = vst [vmem:[#allocation2] sm:$0xff] %v8914_v10  ;;  %v8916_v36 = vadd.f32 %v4283_v35, %v10523_v47  ;;  %v4285_v19 = vpop.f32.mrb[3].mxu0  ;;  %v4736_v47 = vlaneseq  ;;  %v10021_v10 = vld [vmem:[#allocation12 + $0x168] ss:$16 sps:$4 sm:$0xff]   ;;  %v10024_v35 = vld [vmem:[#allocation12 + $0x180] ss:$16 sps:$4 sm:$0xff]   ;;  %6134 = vmatprep.subr.bf16.mxu0 %v10026_v34 }
 0x343   :  { %4719 = vst [vmem:[#allocation2 + $0x8] sm:$0xff] %v8915_v33  ;;  %v8917_v38 = vadd.f32 %v4285_v19, %v10525_v49  ;;  %v9957_v49 = vld [vmem:[#allocation12 + $0xc] ss:$16 sps:$4 sm:$0xff]   ;;  %v4735_v42 = vunpack.c.0.s8 %v4734_v44  ;;  %v10032_v19 = vld [vmem:[#allocation12 + $0x1a4] ss:$16 sps:$4 sm:$0xff]  }
 0x344   :  { %4722 = vst [vmem:[#allocation2 + $0x20] sm:$0xff] %v8916_v36  ;;  %6196 = vmatprep.subr.bf16.mxu1 %v9957_v49  ;;  %v4737_v21 = vshrl.u32 %v4736_v47, 7  ;;  %v10029_v33 = vld [vmem:[#allocation12 + $0x18c] ss:$16 sps:$4 sm:$0xff]   ;;  %v10027_v36 = vld [vmem:[#allocation12 + $0x188] ss:$16 sps:$4 sm:$0xff]   ;;  %v4732_v49 = vcombine.high %v10363_v15, %v10363_v15 }
 0x345   :  { %4723 = vst [vmem:[#allocation2 + $0x28] sm:$0xff] %v8917_v38  ;;  %6197 = vmatpush1.bf16.msra.mxu1 %v9955_v41  ;;  %v10035_v38 = vld [vmem:[#allocation12 + $0x1ac] ss:$16 sps:$4 sm:$0xff]   ;;  %6135 = vmatpush1.bf16.msra.mxu0 %v10024_v35  ;;  %v10033_v44 = vld [vmem:[#allocation12 + $0x1a8] ss:$16 sps:$4 sm:$0xff]  }
 0x346   :  { %6198 = vmatprep.subr.bf16.mxu1 %v9963_v48  ;;  %v10601_v53 = vsub.s32 %v4735_v42, %v4737_v21  ;;  %6136 = vmatprep.subr.bf16.mxu0 %v10032_v19  ;;  %v10038_v47 = vld [vmem:[#allocation12 + $0x1c4] ss:$16 sps:$4 sm:$0xff]   ;;  %v10036_v42 = vld [vmem:[#allocation12 + $0x1c0] ss:$16 sps:$4 sm:$0xff]   ;;  %v10039_v21 = vld [vmem:[#allocation12 + $0x1c8] ss:$16 sps:$4 sm:$0xff]  }
 0x347   :  { %v10047_v48 = vld [vmem:[#allocation12 + $0x1ec] ss:$16 sps:$4 sm:$0xff]  }
 0x348   :  { %v10605_v40 = vrot.slane %v10363_v15, %v10601_v53  ;;  %v4746_v41 = vrot.slane %v4732_v49, %v10601_v53 }
 0x349   :  { %6199 = vmatpush1.bf16.msra.mxu1 %v9961_v52  ;;  %6137 = vmatpush1.bf16.msra.mxu0 %v10030_v43  ;;  %v4915_v26 = vld [vmem:[#allocation2] sm:$0x30] }
 0x34a   :  { %6200 = vmatprep.subr.bf16.mxu1 %v9969_v55  ;;  %v4747_v62 = vcombine.high %v10605_v40, %v10605_v40  ;;  %v4753_v39 = vpack.c.bf16 %v10605_v40, %v10605_v40  ;;  %6138 = vmatprep.subr.bf16.mxu0 %v10038_v47  ;;  %v4748_v50 = vcombine.high %v4746_v41, %v4746_v41  ;;  %v10042_v55 = vld [vmem:[#allocation12 + $0x1e0] ss:$16 sps:$4 sm:$0xff]   ;;  %v10053_v40 = vld [vmem:[#allocation12 + $0x20c] ss:$16 sps:$4 sm:$0xff]   ;;  %v4762_v63 = vld [vmem:[#allocation2 + $0x8] sm:$0x3] }
 0x34b   :  { %v4755_v52 = vpack.c.bf16 %v4746_v41, %v4746_v41  ;;  %v4839_v8 = vld [vmem:[#allocation2 + $0x8] sm:$0xc] }
 0x34c   :  { %v4754_v2 = vpack.c.bf16 %v4747_v62, %v4747_v62  ;;  %4757 = vst [vmem:[#allocation3] sm:$0x1] %v4753_v39  ;;  %6321 = vst [vmem:[#allocation4] sm:$0x1] %v4753_v39  ;;  %v4756_v54 = vpack.c.bf16 %v4748_v50, %v4748_v50  ;;  %v4761_v62 = vld [vmem:[#allocation2] sm:$0x3] }
 0x34d   :  { %6201 = vmatpush1.bf16.msra.mxu1 %v9967_v58  ;;  %4759 = vst [vmem:[#allocation3 + $0x10] sm:$0x1] %v4755_v52  ;;  %6323 = vst [vmem:[#allocation4 + $0x10] sm:$0x1] %v4755_v52  ;;  %6139 = vmatpush1.bf16.msra.mxu0 %v10036_v42  ;;  %v10050_v58 = vld [vmem:[#allocation12 + $0x204] ss:$16 sps:$4 sm:$0xff]  }
 0x34e   :  { %6202 = vmatprep.subr.bf16.mxu1 %v9975_v46  ;;  %4758 = vst [vmem:[#allocation3 + $0x8] sm:$0x1] %v4754_v2  ;;  %6322 = vst [vmem:[#allocation4 + $0x8] sm:$0x1] %v4754_v2  ;;  %6140 = vmatprep.subr.bf16.mxu0 %v10044_v45 }
 0x34f   :  { %4760 = vst [vmem:[#allocation3 + $0x18] sm:$0x1] %v4756_v54  ;;  %6324 = vst [vmem:[#allocation4 + $0x18] sm:$0x1] %v4756_v54  ;;  %v4992_v54 = vld [vmem:[#allocation2] sm:$0xc0] }
 0x351   :  { %6203 = vmatpush1.bf16.msra.mxu1 %v9973_v61  ;;  %6141 = vmatpush1.bf16.msra.mxu0 %v10042_v55  ;;  %v4993_v55 = vld [vmem:[#allocation2 + $0x8] sm:$0xc0] }
 0x352   :  { %6204 = vmatprep.subr.bf16.mxu1 %v9981_v0  ;;  %6153 = vmatprep.subr.bf16.mxu0 %v10050_v58  ;;  %v4770_v0 = vcombine.low %v4761_v62, %v4762_v63 }
 0x354   :  { %v4778_v11 = vrot.slane %v4770_v0, %v10601_v53 }
 0x355   :  { %6205 = vmatpush1.bf16.msra.mxu1 %v9979_v31 }
 0x356   :  { %6206 = vmatprep.subr.bf16.mxu1 %v9987_v7  ;;  %v4838_v7 = vld [vmem:[#allocation2] sm:$0xc] }
 0x359   :  { %6207 = vmatpush1.bf16.msra.mxu1 %v9985_v9 }
 0x35a   :  { %6208 = vmatprep.subr.bf16.mxu1 %v9993_v12 }
 0x35d   :  { %6209 = vmatpush1.bf16.msra.mxu1 %v9991_v13  ;;  %v4847_v13 = vcombine.low %v4838_v7, %v4839_v8 }
 0x35e   :  { %6210 = vmatprep.subr.bf16.mxu1 %v9999_v16 }
 0x35f   :  { %v4855_v17 = vrot.slane %v4847_v13, %v10601_v53 }
 0x361   :  { %6211 = vmatpush1.bf16.msra.mxu1 %v9997_v18 }
 0x362   :  { %6212 = vmatprep.subr.bf16.mxu1 %v10005_v4 }
 0x365   :  { %6213 = vmatpush1.bf16.msra.mxu1 %v10003_v23 }
 0x366   :  { %6214 = vmatprep.subr.bf16.mxu1 %v10011_v25 }
 0x369   :  { %6215 = vmatpush1.bf16.msra.mxu1 %v10009_v27  ;;  %v4916_v27 = vld [vmem:[#allocation2 + $0x8] sm:$0x30] }
 0x36a   :  { %6216 = vmatprep.subr.bf16.mxu1 %v10017_v56  ;;  %v4924_v35 = vcombine.high %v4915_v26, %v4916_v27 }
 0x36c   :  { %v4932_v49 = vrot.slane %v4924_v35, %v10601_v53 }
 0x36d   :  { %6217 = vmatpush1.bf16.msra.mxu1 %v10015_v1 }
 0x36e   :  { %6218 = vmatprep.subr.bf16.mxu1 %v10023_v30 }
 0x371   :  { %6219 = vmatpush1.bf16.msra.mxu1 %v10021_v10 }
 0x372   :  { %6220 = vmatprep.subr.bf16.mxu1 %v10029_v33 }
 0x375   :  { %6221 = vmatpush1.bf16.msra.mxu1 %v10027_v36 }
 0x376   :  { %6222 = vmatprep.subr.bf16.mxu1 %v10035_v38 }
 0x379   :  { %6223 = vmatpush1.bf16.msra.mxu1 %v10033_v44 }
 0x37a   :  { %6224 = vmatprep.subr.bf16.mxu1 %v10041_v5 }
 0x37d   :  { %6225 = vmatpush1.bf16.msra.mxu1 %v10039_v21 }
 0x37e   :  { %6226 = vmatprep.subr.bf16.mxu1 %v10047_v48 }
 0x381   :  { %6227 = vmatpush1.bf16.msra.mxu1 %v10045_v57 }
 0x382   :  { %6239 = vmatprep.subr.bf16.mxu1 %v10053_v40 }
 0x3be   :  { %v4709_v59 = vpop.f32.mrb[4].mxu1 }
 0x3bf   :  { %4720 = vst [vmem:[#allocation2 + $0x10] sm:$0xff] %v4709_v59  ;;  %v4711_v46 = vpop.f32.mrb[5].mxu1 }
 0x3c0   :  { %4721 = vst [vmem:[#allocation2 + $0x18] sm:$0xff] %v4711_v46  ;;  %v4713_v60 = vpop.f32.mrb[6].mxu1 }
 0x3c1   :  { %4724 = vst [vmem:[#allocation2 + $0x30] sm:$0xff] %v4713_v60  ;;  %v4715_v61 = vpop.f32.mrb[7].mxu1 }
 0x3c2   :  { %4725 = vst [vmem:[#allocation2 + $0x38] sm:$0xff] %v4715_v61 }
 0x3c6   :  { %v4763_v2 = vld [vmem:[#allocation2 + $0x10] sm:$0x3]  ;;  %v4840_v3 = vld [vmem:[#allocation2 + $0x10] sm:$0xc]  ;;  %v4917_v20 = vld [vmem:[#allocation2 + $0x10] sm:$0x30] }
 0x3c7   :  { %v4764_v31 = vld [vmem:[#allocation2 + $0x18] sm:$0x3]  ;;  %v4841_v6 = vld [vmem:[#allocation2 + $0x18] sm:$0xc]  ;;  %v4918_v22 = vld [vmem:[#allocation2 + $0x18] sm:$0x30] }
 0x3c8   :  { %v4771_v9 = vcombine.low %v4763_v2, %v4764_v31  ;;  %v4848_v37 = vcombine.low %v4840_v3, %v4841_v6  ;;  %v4925_v29 = vcombine.high %v4917_v20, %v4918_v22  ;;  %v4994_v42 = vld [vmem:[#allocation2 + $0x10] sm:$0xc0]  ;;  %v4995_v45 = vld [vmem:[#allocation2 + $0x18] sm:$0xc0]  ;;  %v5001_v2 = vcombine.high %v4992_v54, %v4993_v55 }
 0x3c9   :  { %v5002_v46 = vcombine.high %v4994_v42, %v4995_v45 }
 0x3ca   :  { %v4785_v12 = vrot.slane %v4771_v9, %v10601_v53  ;;  %v4862_v16 = vrot.slane %v4848_v37, %v10601_v53  ;;  %v4939_v5 = vrot.slane %v4925_v29, %v10601_v53 }
 0x3cb   :  { %v5016_v8 = vrot.slane %v5002_v46, %v10601_v53 }
 0x3cc   :  { %v4786_v14 = vcombine.low %v4778_v11, %v4785_v12  ;;  %v4863_v51 = vcombine.high %v4855_v17, %v4862_v16  ;;  %v4940_v57 = vcombine.low %v4932_v49, %v4939_v5  ;;  %v5009_v12 = vrot.slane %v5001_v2, %v10601_v53  ;;  %v5071_v16 = vld [vmem:[#allocation2 + $0x30] sm:$0x3]  ;;  %v5072_v17 = vld [vmem:[#allocation2 + $0x38] sm:$0x3]  ;;  %v5148_v49 = vld [vmem:[#allocation2 + $0x30] sm:$0xc] }
 0x3ce   :  { %vm4791_vm0 = vcmp.ge.f32.partialorder %v4786_v14, 1.25  ;;  %v4842_v4 = vmul.f32 0.75, %v4786_v14  ;;  %v5017_v22 = vcombine.high %v5009_v12, %v5016_v8  ;;  %v5225_v12 = vld [vmem:[#allocation2 + $0x30] sm:$0x30] }
 0x3cf   :  { %v8638_v18 = vsel %vm4791_vm0, 1.0, %v10363_v15 }
 0x3d0   :  { %v4794_v23 = vsub.f32 1.0, %v8638_v18  ;;  %v4804_v24 = vrot.slane %v8638_v18, %v10601_v53  ;;  %v4797_v25 = vcombine.high %v8638_v18, %v8638_v18  ;;  %v4865_v32 = vadd.f32 %v4863_v51, %v4842_v4 }
 0x3d2   :  { %v4795_v56 = vmul.f32 %v4794_v23, %v4786_v14  ;;  %v4812_v28 = vcombine.high %v4804_v24, %v4804_v24  ;;  %v4818_v1 = vpack.c.bf16 %v4804_v24, %v4804_v24  ;;  %v4811_v30 = vrot.slane %v4797_v25, %v10601_v53  ;;  %v5069_v23 = vld [vmem:[#allocation2 + $0x20] sm:$0x3]  ;;  %v5070_v24 = vld [vmem:[#allocation2 + $0x28] sm:$0x3] }
 0x3d3   :  { %v4919_v21 = vmul.f32 0.75, %v4865_v32 }
 0x3d4   :  { %v4819_v10 = vpack.c.bf16 %v4812_v28, %v4812_v28  ;;  %v4866_v34 = vmul.f32 0.97, %v4795_v56  ;;  %v4826_v33 = vrot.slane %v4818_v1, 7  ;;  %v4813_v36 = vcombine.high %v4811_v30, %v4811_v30 }
 0x3d5   :  { %v4820_v19 = vpack.c.bf16 %v4811_v30, %v4811_v30  ;;  %v4942_v61 = vadd.f32 %v4940_v57, %v4919_v21  ;;  %v5079_v28 = vcombine.low %v5071_v16, %v5072_v17 }
 0x3d6   :  { %v4827_v38 = vrot.slane %v4819_v10, 7  ;;  %v4867_v43 = vadd.f32 %v4866_v34, %v4865_v32  ;;  %4834 = vst [vmem:[#allocation3] sm:$0x2] %v4826_v33  ;;  %v4821_v44 = vpack.c.bf16 %v4813_v36, %v4813_v36  ;;  %v5078_v10 = vcombine.low %v5069_v23, %v5070_v24 }
 0x3d7   :  { %v4828_v47 = vrot.slane %v4820_v19, 7  ;;  %v4996_v37 = vmul.f32 0.75, %v4942_v61  ;;  %v5093_v19 = vrot.slane %v5079_v28, %v10601_v53 }
 0x3d8   :  { %4835 = vst [vmem:[#allocation3 + $0x8] sm:$0x2] %v4827_v38  ;;  %vm4868_vm1 = vcmp.ge.f32.partialorder %v4867_v43, 1.25  ;;  %v4829_v41 = vrot.slane %v4821_v44, 7  ;;  %v5086_v44 = vrot.slane %v5078_v10, %v10601_v53 }
 0x3d9   :  { %v8639_v39 = vsel %vm4868_vm1, 1.0, %v10363_v15  ;;  %4836 = vst [vmem:[#allocation3 + $0x10] sm:$0x2] %v4828_v47  ;;  %v5019_v56 = vadd.f32 %v5017_v22, %v4996_v37  ;;  %v5226_v37 = vld [vmem:[#allocation2 + $0x38] sm:$0x30] }
 0x3da   :  { %v4871_v48 = vsub.f32 1.0, %v8639_v39  ;;  %v4881_v50 = vrot.slane %v8639_v39, %v10601_v53  ;;  %v4874_v52 = vcombine.high %v8639_v39, %v8639_v39  ;;  %4837 = vst [vmem:[#allocation3 + $0x18] sm:$0x2] %v4829_v41  ;;  %v5149_v39 = vld [vmem:[#allocation2 + $0x38] sm:$0xc]  ;;  %v5094_v45 = vcombine.low %v5086_v44, %v5093_v19 }
 0x3db   :  { %v5073_v47 = vmul.f32 0.75, %v5019_v56 }
 0x3dc   :  { %v4872_v58 = vmul.f32 %v4871_v48, %v4867_v43  ;;  %v4889_v40 = vcombine.high %v4881_v50, %v4881_v50  ;;  %v4895_v59 = vpack.c.bf16 %v4881_v50, %v4881_v50  ;;  %v4888_v60 = vrot.slane %v4874_v52, %v10601_v53  ;;  %v5146_v48 = vld [vmem:[#allocation2 + $0x20] sm:$0xc]  ;;  %v5147_v50 = vld [vmem:[#allocation2 + $0x28] sm:$0xc] }
 0x3de   :  { %v4896_v62 = vpack.c.bf16 %v4889_v40, %v4889_v40  ;;  %v4943_v63 = vmul.f32 0.97, %v4872_v58  ;;  %v4903_v0 = vrot.slane %v4895_v59, 6  ;;  %v4890_v3 = vcombine.high %v4888_v60, %v4888_v60 }
 0x3df   :  { %v4897_v31 = vpack.c.bf16 %v4888_v60, %v4888_v60  ;;  %v5096_v58 = vadd.f32 %v5094_v45, %v5073_v47  ;;  %v5156_v40 = vcombine.low %v5148_v49, %v5149_v39 }
 0x3e0   :  { %v4904_v6 = vrot.slane %v4896_v62, 6  ;;  %v4944_v7 = vadd.f32 %v4943_v63, %v4942_v61  ;;  %4911 = vst [vmem:[#allocation3] sm:$0x4] %v4903_v0  ;;  %v4898_v9 = vpack.c.bf16 %v4890_v3, %v4890_v3  ;;  %v5155_v62 = vcombine.low %v5146_v48, %v5147_v50 }
 0x3e1   :  { %v4905_v11 = vrot.slane %v4897_v31, 6  ;;  %v5170_v31 = vrot.slane %v5156_v40, %v10601_v53 }
 0x3e2   :  { %4912 = vst [vmem:[#allocation3 + $0x8] sm:$0x4] %v4904_v6  ;;  %vm4945_vm2 = vcmp.ge.f32.partialorder %v4944_v7, 1.25  ;;  %v4906_v14 = vrot.slane %v4898_v9, 6  ;;  %v5163_v8 = vrot.slane %v5155_v62, %v10601_v53  ;;  %v5150_v9 = vmul.f32 0.75, %v5096_v58 }
 0x3e3   :  { %v8640_v13 = vsel %vm4945_vm2, 1.0, %v10363_v15  ;;  %4913 = vst [vmem:[#allocation3 + $0x10] sm:$0x4] %v4905_v11 }
 0x3e4   :  { %v4948_v18 = vsub.f32 1.0, %v8640_v13  ;;  %v4958_v20 = vrot.slane %v8640_v13, %v10601_v53  ;;  %v4951_v4 = vcombine.high %v8640_v13, %v8640_v13  ;;  %4914 = vst [vmem:[#allocation3 + $0x18] sm:$0x4] %v4906_v14  ;;  %v5171_v17 = vcombine.high %v5163_v8, %v5170_v31 }
 0x3e6   :  { %v4949_v25 = vmul.f32 %v4948_v18, %v4944_v7  ;;  %v4966_v26 = vcombine.high %v4958_v20, %v4958_v20  ;;  %v4972_v27 = vpack.c.bf16 %v4958_v20, %v4958_v20  ;;  %v4965_v51 = vrot.slane %v4951_v4, %v10601_v53  ;;  %v5223_v18 = vld [vmem:[#allocation2 + $0x20] sm:$0x30]  ;;  %v5224_v20 = vld [vmem:[#allocation2 + $0x28] sm:$0x30] }
 0x3e8   :  { %v4973_v1 = vpack.c.bf16 %v4966_v26, %v4966_v26  ;;  %v5020_v29 = vmul.f32 0.97, %v4949_v25  ;;  %v4980_v30 = vrot.slane %v4972_v27, 5  ;;  %v4967_v32 = vcombine.high %v4965_v51, %v4965_v51 }
 0x3e9   :  { %v4974_v34 = vpack.c.bf16 %v4965_v51, %v4965_v51  ;;  %v5173_v25 = vadd.f32 %v5171_v17, %v5150_v9  ;;  %v5233_v26 = vcombine.high %v5225_v12, %v5226_v37  ;;  %v10048_v12 = vld [vmem:[#allocation12 + $0x200] ss:$16 sps:$4 sm:$0xff]   ;;  %v10051_v37 = vld [vmem:[#allocation12 + $0x208] ss:$16 sps:$4 sm:$0xff]   ;;  %v10059_v17 = vld [vmem:[#allocation12 + $0x22c] ss:$16 sps:$4 sm:$0xff]  }
 0x3ea   :  { %v4981_v33 = vrot.slane %v4973_v1, 5  ;;  %v5021_v35 = vadd.f32 %v5020_v29, %v5019_v56  ;;  %4988 = vst [vmem:[#allocation3] sm:$0x8] %v4980_v30  ;;  %v4975_v36 = vpack.c.bf16 %v4967_v32, %v4967_v32  ;;  %v5232_v1 = vcombine.high %v5223_v18, %v5224_v20  ;;  %v10054_v20 = vld [vmem:[#allocation12 + $0x220] ss:$16 sps:$4 sm:$0xff]  }
 0x3eb   :  { %v4982_v38 = vrot.slane %v4974_v34, 5  ;;  %v5247_v34 = vrot.slane %v5233_v26, %v10601_v53  ;;  %v5227_v19 = vmul.f32 0.75, %v5173_v25  ;;  %v10068_v26 = vld [vmem:[#allocation12 + $0x264] ss:$16 sps:$4 sm:$0xff]  }
 0x3ec   :  { %4989 = vst [vmem:[#allocation3 + $0x8] sm:$0x8] %v4981_v33  ;;  %vm5022_vm3 = vcmp.ge.f32.partialorder %v5021_v35, 1.25  ;;  %v4983_v43 = vrot.slane %v4975_v36, 5  ;;  %v5240_v36 = vrot.slane %v5232_v1, %v10601_v53  ;;  %v10077_v1 = vld [vmem:[#allocation12 + $0x28c] ss:$16 sps:$4 sm:$0xff]  }
 0x3ed   :  { %v8641_v5 = vsel %vm5022_vm3, 1.0, %v10363_v15  ;;  %4990 = vst [vmem:[#allocation3 + $0x10] sm:$0x8] %v4982_v38 }
 0x3ee   :  { %v5025_v41 = vsub.f32 1.0, %v8641_v5  ;;  %v5035_v42 = vrot.slane %v8641_v5, %v10601_v53  ;;  %4991 = vst [vmem:[#allocation3 + $0x18] sm:$0x8] %v4983_v43  ;;  %v5028_v21 = vcombine.high %v8641_v5, %v8641_v5  ;;  %v5248_v5 = vcombine.low %v5240_v36, %v5247_v34  ;;  %v10078_v34 = vld [vmem:[#allocation12 + $0x2a0] ss:$16 sps:$4 sm:$0xff]  }
 0x3ef   :  { %v10089_v36 = vld [vmem:[#allocation12 + $0x2cc] ss:$16 sps:$4 sm:$0xff]  }
 0x3f0   :  { %v5026_v52 = vmul.f32 %v5025_v41, %v5021_v35  ;;  %v5043_v54 = vcombine.high %v5035_v42, %v5035_v42  ;;  %v5049_v55 = vpack.c.bf16 %v5035_v42, %v5035_v42  ;;  %v5042_v57 = vrot.slane %v5028_v21, %v10601_v53 }
 0x3f1   :  { %v5250_v21 = vadd.f32 %v5248_v5, %v5227_v19  ;;  %v10084_v19 = vld [vmem:[#allocation12 + $0x2c0] ss:$16 sps:$4 sm:$0xff]   ;;  %v10093_v5 = vld [vmem:[#allocation12 + $0x2e8] ss:$16 sps:$4 sm:$0xff]  }
 0x3f2   :  { %v5050_v59 = vpack.c.bf16 %v5043_v54, %v5043_v54  ;;  %v5097_v46 = vmul.f32 0.97, %v5026_v52  ;;  %v5057_v60 = vrot.slane %v5049_v55, 4  ;;  %v5044_v61 = vcombine.high %v5042_v57, %v5042_v57 }
 0x3f3   :  { %v5051_v63 = vpack.c.bf16 %v5042_v57, %v5042_v57 }
 0x3f4   :  { %v5058_v0 = vrot.slane %v5050_v59, 4  ;;  %v5098_v2 = vadd.f32 %v5097_v46, %v5096_v58  ;;  %5065 = vst [vmem:[#allocation3] sm:$0x10] %v5057_v60  ;;  %v5052_v3 = vpack.c.bf16 %v5044_v61, %v5044_v61 }
 0x3f5   :  { %v5059_v6 = vrot.slane %v5051_v63, 4 }
 0x3f6   :  { %5066 = vst [vmem:[#allocation3 + $0x8] sm:$0x10] %v5058_v0  ;;  %vm5099_vm4 = vcmp.ge.f32.partialorder %v5098_v2, 1.25  ;;  %v5060_v7 = vrot.slane %v5052_v3, 4 }
 0x3f7   :  { %v8642_v11 = vsel %vm5099_vm4, 1.0, %v10363_v15  ;;  %5067 = vst [vmem:[#allocation3 + $0x10] sm:$0x10] %v5059_v6 }
 0x3f8   :  { %v5102_v13 = vsub.f32 1.0, %v8642_v11  ;;  %v5112_v14 = vrot.slane %v8642_v11, %v10601_v53  ;;  %5068 = vst [vmem:[#allocation3 + $0x18] sm:$0x10] %v5060_v7  ;;  %v5105_v16 = vcombine.high %v8642_v11, %v8642_v11 }
 0x3fa   :  { %v5103_v4 = vmul.f32 %v5102_v13, %v5098_v2  ;;  %v5120_v22 = vcombine.high %v5112_v14, %v5112_v14  ;;  %v5126_v23 = vpack.c.bf16 %v5112_v14, %v5112_v14  ;;  %v5119_v24 = vrot.slane %v5105_v16, %v10601_v53  ;;  %v10056_v16 = vld [vmem:[#allocation12 + $0x224] ss:$16 sps:$4 sm:$0xff]  }
 0x3fc   :  { %v5127_v27 = vpack.c.bf16 %v5120_v22, %v5120_v22  ;;  %v5174_v51 = vmul.f32 0.97, %v5103_v4  ;;  %v5134_v56 = vrot.slane %v5126_v23, 3  ;;  %v5121_v28 = vcombine.high %v5119_v24, %v5119_v24  ;;  %v10057_v4 = vld [vmem:[#allocation12 + $0x228] ss:$16 sps:$4 sm:$0xff]  }
 0x3fd   :  { %v5128_v29 = vpack.c.bf16 %v5119_v24, %v5119_v24  ;;  %v10062_v22 = vld [vmem:[#allocation12 + $0x244] ss:$16 sps:$4 sm:$0xff]   ;;  %v10065_v23 = vld [vmem:[#allocation12 + $0x24c] ss:$16 sps:$4 sm:$0xff]   ;;  %v10060_v24 = vld [vmem:[#allocation12 + $0x240] ss:$16 sps:$4 sm:$0xff]  }
 0x3fe   :  { %v5135_v30 = vrot.slane %v5127_v27, 3  ;;  %v5175_v32 = vadd.f32 %v5174_v51, %v5173_v25  ;;  %5142 = vst [vmem:[#allocation3] sm:$0x20] %v5134_v56  ;;  %v5129_v10 = vpack.c.bf16 %v5121_v28, %v5121_v28  ;;  %v10063_v25 = vld [vmem:[#allocation12 + $0x248] ss:$16 sps:$4 sm:$0xff]  }
 0x3ff   :  { %v5136_v33 = vrot.slane %v5128_v29, 3  ;;  %v10071_v27 = vld [vmem:[#allocation12 + $0x26c] ss:$16 sps:$4 sm:$0xff]   ;;  %v10066_v51 = vld [vmem:[#allocation12 + $0x260] ss:$16 sps:$4 sm:$0xff]  }
 0x400   :  { %5143 = vst [vmem:[#allocation3 + $0x8] sm:$0x20] %v5135_v30  ;;  %vm5176_vm5 = vcmp.ge.f32.partialorder %v5175_v32, 1.25  ;;  %v5137_v35 = vrot.slane %v5129_v10, 3  ;;  %v10069_v56 = vld [vmem:[#allocation12 + $0x268] ss:$16 sps:$4 sm:$0xff]  }
 0x401   :  { %v8643_v38 = vsel %vm5176_vm5, 1.0, %v10363_v15  ;;  %5144 = vst [vmem:[#allocation3 + $0x10] sm:$0x20] %v5136_v33  ;;  %v10074_v28 = vld [vmem:[#allocation12 + $0x284] ss:$16 sps:$4 sm:$0xff]  }
 0x402   :  { %v5179_v43 = vsub.f32 1.0, %v8643_v38  ;;  %v5189_v44 = vrot.slane %v8643_v38, %v10601_v53  ;;  %5145 = vst [vmem:[#allocation3 + $0x18] sm:$0x20] %v5137_v35  ;;  %v5182_v47 = vcombine.high %v8643_v38, %v8643_v38  ;;  %v10072_v29 = vld [vmem:[#allocation12 + $0x280] ss:$16 sps:$4 sm:$0xff]  }
 0x403   :  { %v10075_v30 = vld [vmem:[#allocation12 + $0x288] ss:$16 sps:$4 sm:$0xff]   ;;  %v10083_v10 = vld [vmem:[#allocation12 + $0x2ac] ss:$16 sps:$4 sm:$0xff]   ;;  %v10086_v35 = vld [vmem:[#allocation12 + $0x2c4] ss:$16 sps:$4 sm:$0xff]  }
 0x404   :  { %v5180_v49 = vmul.f32 %v5179_v43, %v5175_v32  ;;  %v5197_v39 = vcombine.high %v5189_v44, %v5189_v44  ;;  %v5203_v41 = vpack.c.bf16 %v5189_v44, %v5189_v44  ;;  %v5196_v42 = vrot.slane %v5182_v47, %v10601_v53  ;;  %v10080_v32 = vld [vmem:[#allocation12 + $0x2a4] ss:$16 sps:$4 sm:$0xff]   ;;  %v10081_v33 = vld [vmem:[#allocation12 + $0x2a8] ss:$16 sps:$4 sm:$0xff]   ;;  %v10095_v44 = vld [vmem:[#allocation12 + $0x2ec] ss:$16 sps:$4 sm:$0xff]  }
 0x405   :  { %v10087_v38 = vld [vmem:[#allocation12 + $0x2c8] ss:$16 sps:$4 sm:$0xff]   ;;  %v10092_v43 = vld [vmem:[#allocation12 + $0x2e4] ss:$16 sps:$4 sm:$0xff]   ;;  %v10090_v47 = vld [vmem:[#allocation12 + $0x2e0] ss:$16 sps:$4 sm:$0xff]  }
 0x406   :  { %v5204_v45 = vpack.c.bf16 %v5197_v39, %v5197_v39  ;;  %v5251_v48 = vmul.f32 0.97, %v5180_v49  ;;  %v5211_v50 = vrot.slane %v5203_v41, 2  ;;  %v5198_v52 = vcombine.high %v5196_v42, %v5196_v42  ;;  %v10098_v49 = vld [vmem:[#allocation12 + $0x304] ss:$16 sps:$4 sm:$0xff]  }
 0x407   :  { %v5205_v54 = vpack.c.bf16 %v5196_v42, %v5196_v42  ;;  %v10101_v39 = vld [vmem:[#allocation12 + $0x30c] ss:$16 sps:$4 sm:$0xff]   ;;  %v10096_v41 = vld [vmem:[#allocation12 + $0x300] ss:$16 sps:$4 sm:$0xff]   ;;  %v10099_v42 = vld [vmem:[#allocation12 + $0x308] ss:$16 sps:$4 sm:$0xff]  }
 0x408   :  { %v5212_v55 = vrot.slane %v5204_v45, 2  ;;  %v5252_v57 = vadd.f32 %v5251_v48, %v5250_v21  ;;  %5219 = vst [vmem:[#allocation3] sm:$0x40] %v5211_v50  ;;  %v5206_v58 = vpack.c.bf16 %v5198_v52, %v5198_v52  ;;  %v10104_v21 = vld [vmem:[#allocation12 + $0x324] ss:$16 sps:$4 sm:$0xff]  }
 0x409   :  { %v5213_v40 = vrot.slane %v5205_v54, 2  ;;  %v10107_v45 = vld [vmem:[#allocation12 + $0x32c] ss:$16 sps:$4 sm:$0xff]   ;;  %v10102_v48 = vld [vmem:[#allocation12 + $0x320] ss:$16 sps:$4 sm:$0xff]  }
 0x40a   :  { %5220 = vst [vmem:[#allocation3 + $0x8] sm:$0x40] %v5212_v55  ;;  %vm5253_vm6 = vcmp.ge.f32.partialorder %v5252_v57, 1.25  ;;  %v5214_v59 = vrot.slane %v5206_v58, 2  ;;  %v10105_v50 = vld [vmem:[#allocation12 + $0x328] ss:$16 sps:$4 sm:$0xff]  }
 0x40b   :  { %v8644_v46 = vsel %vm5253_vm6, 1.0, %v10363_v15  ;;  %5221 = vst [vmem:[#allocation3 + $0x10] sm:$0x40] %v5213_v40  ;;  %v10110_v52 = vld [vmem:[#allocation12 + $0x344] ss:$16 sps:$4 sm:$0xff]  }
 0x40c   :  { %v5266_v60 = vrot.slane %v8644_v46, %v10601_v53  ;;  %5222 = vst [vmem:[#allocation3 + $0x18] sm:$0x40] %v5214_v59  ;;  %v5259_v61 = vcombine.high %v8644_v46, %v8644_v46  ;;  %v10113_v54 = vld [vmem:[#allocation12 + $0x34c] ss:$16 sps:$4 sm:$0xff]   ;;  %v10108_v55 = vld [vmem:[#allocation12 + $0x340] ss:$16 sps:$4 sm:$0xff]  }
 0x40d   :  { %v10111_v57 = vld [vmem:[#allocation12 + $0x348] ss:$16 sps:$4 sm:$0xff]   ;;  %v10116_v58 = vld [vmem:[#allocation12 + $0x364] ss:$16 sps:$4 sm:$0xff]   ;;  %v10119_v40 = vld [vmem:[#allocation12 + $0x36c] ss:$16 sps:$4 sm:$0xff]  }
 0x40e   :  { %v5274_v62 = vcombine.high %v5266_v60, %v5266_v60  ;;  %v5280_v63 = vpack.c.bf16 %v5266_v60, %v5266_v60  ;;  %v5273_v0 = vrot.slane %v5259_v61, %v10601_v53  ;;  %v10114_v59 = vld [vmem:[#allocation12 + $0x360] ss:$16 sps:$4 sm:$0xff]   ;;  %v10117_v46 = vld [vmem:[#allocation12 + $0x368] ss:$16 sps:$4 sm:$0xff]   ;;  %v10122_v60 = vld [vmem:[#allocation12 + $0x384] ss:$16 sps:$4 sm:$0xff]  }
 0x40f   :  { %v10125_v61 = vld [vmem:[#allocation12 + $0x38c] ss:$16 sps:$4 sm:$0xff]  }
 0x410   :  { %v5281_v2 = vpack.c.bf16 %v5274_v62, %v5274_v62  ;;  %v5288_v3 = vrot.slane %v5280_v63, 1  ;;  %v5275_v31 = vcombine.high %v5273_v0, %v5273_v0  ;;  %v5282_v6 = vpack.c.bf16 %v5273_v0, %v5273_v0  ;;  %v10120_v62 = vld [vmem:[#allocation12 + $0x380] ss:$16 sps:$4 sm:$0xff]   ;;  %v10123_v63 = vld [vmem:[#allocation12 + $0x388] ss:$16 sps:$4 sm:$0xff]  }
 0x411   :  { %v10128_v0 = vld [vmem:[#allocation12 + $0x3a4] ss:$16 sps:$4 sm:$0xff]  }
 0x412   :  { %v5289_v7 = vrot.slane %v5281_v2, 1  ;;  %5296 = vst [vmem:[#allocation3] sm:$0x80] %v5288_v3  ;;  %v5283_v8 = vpack.c.bf16 %v5275_v31, %v5275_v31  ;;  %v5290_v9 = vrot.slane %v5282_v6, 1  ;;  %v10131_v2 = vld [vmem:[#allocation12 + $0x3ac] ss:$16 sps:$4 sm:$0xff]  }
 0x413   :  { %v10126_v3 = vld [vmem:[#allocation12 + $0x3a0] ss:$16 sps:$4 sm:$0xff]   ;;  %v10129_v31 = vld [vmem:[#allocation12 + $0x3a8] ss:$16 sps:$4 sm:$0xff]   ;;  %v10134_v6 = vld [vmem:[#allocation12 + $0x3c4] ss:$16 sps:$4 sm:$0xff]  }
 0x414   :  { %5297 = vst [vmem:[#allocation3 + $0x8] sm:$0x80] %v5289_v7  ;;  %v5291_v11 = vrot.slane %v5283_v8, 1  ;;  %5298 = vst [vmem:[#allocation3 + $0x10] sm:$0x80] %v5290_v9 }
 0x415   :  { %v10137_v7 = vld [vmem:[#allocation12 + $0x3cc] ss:$16 sps:$4 sm:$0xff]   ;;  %v10132_v8 = vld [vmem:[#allocation12 + $0x3c0] ss:$16 sps:$4 sm:$0xff]   ;;  %v10135_v9 = vld [vmem:[#allocation12 + $0x3c8] ss:$16 sps:$4 sm:$0xff]  }
 0x416   :  { %5299 = vst [vmem:[#allocation3 + $0x18] sm:$0x80] %v5291_v11  ;;  %v10140_v11 = vld [vmem:[#allocation12 + $0x3e4] ss:$16 sps:$4 sm:$0xff]  }
 0x419   :  { %v5338_v14 = vld [vmem:[#allocation3] sm:$0xff] }
 0x41b   :  { %v5339_v13 = vld [vmem:[#allocation3 + $0x8] sm:$0xff] }
 0x41c   :  { %6142 = vmatprep.mubr.bf16.mxu0 %v5339_v13  ;;  %6228 = vmatprep.mubr.bf16.mxu1 %v5339_v13  ;;  %v10141_v13 = vld [vmem:[#allocation12 + $0x3e8] ss:$16 sps:$4 sm:$0xff]  }
 0x41d   :  { %6143 = vmatmul.mubr.bf16.vlgmr.msra.gmra.mrb[4].mxu0 %v5338_v14  ;;  %6229 = vmatmul.mubr.bf16.vlgmr.msra.gmra.mrb[8].mxu1 %v5338_v14  ;;  %v5341_v18 = vld [vmem:[#allocation3 + $0x18] sm:$0xff]  ;;  %v5340_v14 = vld [vmem:[#allocation3 + $0x10] sm:$0xff] }
 0x41e   :  { %6154 = vmatpush1.bf16.msra.mxu0 %v10048_v12  ;;  %6240 = vmatpush1.bf16.msra.mxu1 %v10051_v37  ;;  %v10143_v12 = vld [vmem:[#allocation12 + $0x3ec] ss:$16 sps:$4 sm:$0xff]   ;;  %v10138_v37 = vld [vmem:[#allocation12 + $0x3e0] ss:$16 sps:$4 sm:$0xff]  }
 0x41f   :  { %6185 = vmatprep.mubr.bf16.mxu0 %v5341_v18  ;;  %6271 = vmatprep.mubr.bf16.mxu1 %v5341_v18  ;;  %v10149_v18 = vld [vmem:[#allocation14 + $0x14] ss:$8 sps:$4 sm:$0xff]  }
 0x420   :  { %6155 = vmatprep.subr.bf16.mxu0 %v10056_v16  ;;  %6241 = vmatprep.subr.bf16.mxu1 %v10059_v17  ;;  %v10144_v16 = vld [vmem:[#allocation14] ss:$8 sps:$4 sm:$0xff]   ;;  %v10146_v17 = vld [vmem:[#allocation14 + $0x4] ss:$8 sps:$4 sm:$0xff]  }
 0x422   :  { %6156 = vmatpush1.bf16.msra.mxu0 %v10054_v20  ;;  %6242 = vmatpush1.bf16.msra.mxu1 %v10057_v4  ;;  %v10147_v20 = vld [vmem:[#allocation14 + $0x10] ss:$8 sps:$4 sm:$0xff]   ;;  %v10152_v4 = vld [vmem:[#allocation14 + $0x24] ss:$8 sps:$4 sm:$0xff]  }
 0x423   :  { %6157 = vmatprep.subr.bf16.mxu0 %v10062_v22  ;;  %6243 = vmatprep.subr.bf16.mxu1 %v10065_v23  ;;  %v10150_v22 = vld [vmem:[#allocation14 + $0x20] ss:$8 sps:$4 sm:$0xff]   ;;  %v10155_v23 = vld [vmem:[#allocation14 + $0x34] ss:$8 sps:$4 sm:$0xff]  }
 0x426   :  { %6158 = vmatpush1.bf16.msra.mxu0 %v10060_v24  ;;  %6244 = vmatpush1.bf16.msra.mxu1 %v10063_v25  ;;  %v10153_v24 = vld [vmem:[#allocation14 + $0x30] ss:$8 sps:$4 sm:$0xff]   ;;  %v10158_v25 = vld [vmem:[#allocation14 + $0x44] ss:$8 sps:$4 sm:$0xff]  }
 0x427   :  { %6159 = vmatprep.subr.bf16.mxu0 %v10068_v26  ;;  %6245 = vmatprep.subr.bf16.mxu1 %v10071_v27  ;;  %v10156_v26 = vld [vmem:[#allocation14 + $0x40] ss:$8 sps:$4 sm:$0xff]   ;;  %v10161_v27 = vld [vmem:[#allocation14 + $0x54] ss:$8 sps:$4 sm:$0xff]  }
 0x42a   :  { %6160 = vmatpush1.bf16.msra.mxu0 %v10066_v51  ;;  %6246 = vmatpush1.bf16.msra.mxu1 %v10069_v56  ;;  %v10159_v51 = vld [vmem:[#allocation14 + $0x50] ss:$8 sps:$4 sm:$0xff]   ;;  %v10164_v56 = vld [vmem:[#allocation14 + $0x64] ss:$8 sps:$4 sm:$0xff]  }
 0x42b   :  { %6161 = vmatprep.subr.bf16.mxu0 %v10074_v28  ;;  %6247 = vmatprep.subr.bf16.mxu1 %v10077_v1  ;;  %v10162_v28 = vld [vmem:[#allocation14 + $0x60] ss:$8 sps:$4 sm:$0xff]   ;;  %v10167_v1 = vld [vmem:[#allocation14 + $0x74] ss:$8 sps:$4 sm:$0xff]  }
 0x42e   :  { %6162 = vmatpush1.bf16.msra.mxu0 %v10072_v29  ;;  %6248 = vmatpush1.bf16.msra.mxu1 %v10075_v30  ;;  %v10165_v29 = vld [vmem:[#allocation14 + $0x70] ss:$8 sps:$4 sm:$0xff]   ;;  %v10170_v30 = vld [vmem:[#allocation14 + $0x84] ss:$8 sps:$4 sm:$0xff]  }
 0x42f   :  { %6163 = vmatprep.subr.bf16.mxu0 %v10080_v32  ;;  %6249 = vmatprep.subr.bf16.mxu1 %v10083_v10  ;;  %v10168_v32 = vld [vmem:[#allocation14 + $0x80] ss:$8 sps:$4 sm:$0xff]   ;;  %v10173_v10 = vld [vmem:[#allocation14 + $0x94] ss:$8 sps:$4 sm:$0xff]  }
 0x432   :  { %6164 = vmatpush1.bf16.msra.mxu0 %v10078_v34  ;;  %6250 = vmatpush1.bf16.msra.mxu1 %v10081_v33  ;;  %v10171_v34 = vld [vmem:[#allocation14 + $0x90] ss:$8 sps:$4 sm:$0xff]   ;;  %v10176_v33 = vld [vmem:[#allocation14 + $0xa4] ss:$8 sps:$4 sm:$0xff]  }
 0x433   :  { %6165 = vmatprep.subr.bf16.mxu0 %v10086_v35  ;;  %6251 = vmatprep.subr.bf16.mxu1 %v10089_v36  ;;  %v10174_v35 = vld [vmem:[#allocation14 + $0xa0] ss:$8 sps:$4 sm:$0xff]   ;;  %v10179_v36 = vld [vmem:[#allocation14 + $0xb4] ss:$8 sps:$4 sm:$0xff]  }
 0x436   :  { %6166 = vmatpush1.bf16.msra.mxu0 %v10084_v19  ;;  %6252 = vmatpush1.bf16.msra.mxu1 %v10087_v38  ;;  %v10177_v19 = vld [vmem:[#allocation14 + $0xb0] ss:$8 sps:$4 sm:$0xff]   ;;  %v10182_v38 = vld [vmem:[#allocation14 + $0xc4] ss:$8 sps:$4 sm:$0xff]  }
 0x437   :  { %6167 = vmatprep.subr.bf16.mxu0 %v10092_v43  ;;  %6253 = vmatprep.subr.bf16.mxu1 %v10095_v44  ;;  %v10180_v43 = vld [vmem:[#allocation14 + $0xc0] ss:$8 sps:$4 sm:$0xff]   ;;  %v10185_v44 = vld [vmem:[#allocation14 + $0xd4] ss:$8 sps:$4 sm:$0xff]  }
 0x43a   :  { %6168 = vmatpush1.bf16.msra.mxu0 %v10090_v47  ;;  %6254 = vmatpush1.bf16.msra.mxu1 %v10093_v5  ;;  %v10183_v47 = vld [vmem:[#allocation14 + $0xd0] ss:$8 sps:$4 sm:$0xff]   ;;  %v10188_v5 = vld [vmem:[#allocation14 + $0xe4] ss:$8 sps:$4 sm:$0xff]  }
 0x43b   :  { %6169 = vmatprep.subr.bf16.mxu0 %v10098_v49  ;;  %6255 = vmatprep.subr.bf16.mxu1 %v10101_v39  ;;  %v10186_v49 = vld [vmem:[#allocation14 + $0xe0] ss:$8 sps:$4 sm:$0xff]   ;;  %v10191_v39 = vld [vmem:[#allocation14 + $0xf4] ss:$8 sps:$4 sm:$0xff]  }
 0x43e   :  { %6170 = vmatpush1.bf16.msra.mxu0 %v10096_v41  ;;  %6256 = vmatpush1.bf16.msra.mxu1 %v10099_v42  ;;  %v10189_v41 = vld [vmem:[#allocation14 + $0xf0] ss:$8 sps:$4 sm:$0xff]   ;;  %v10194_v42 = vld [vmem:[#allocation14 + $0x104] ss:$8 sps:$4 sm:$0xff]  }
 0x43f   :  { %6171 = vmatprep.subr.bf16.mxu0 %v10104_v21  ;;  %6257 = vmatprep.subr.bf16.mxu1 %v10107_v45 }
 0x442   :  { %6172 = vmatpush1.bf16.msra.mxu0 %v10102_v48  ;;  %6258 = vmatpush1.bf16.msra.mxu1 %v10105_v50 }
 0x443   :  { %6173 = vmatprep.subr.bf16.mxu0 %v10110_v52  ;;  %6259 = vmatprep.subr.bf16.mxu1 %v10113_v54 }
 0x446   :  { %6174 = vmatpush1.bf16.msra.mxu0 %v10108_v55  ;;  %6260 = vmatpush1.bf16.msra.mxu1 %v10111_v57 }
 0x447   :  { %6175 = vmatprep.subr.bf16.mxu0 %v10116_v58  ;;  %6261 = vmatprep.subr.bf16.mxu1 %v10119_v40 }
 0x44a   :  { %6176 = vmatpush1.bf16.msra.mxu0 %v10114_v59  ;;  %6262 = vmatpush1.bf16.msra.mxu1 %v10117_v46 }
 0x44b   :  { %6177 = vmatprep.subr.bf16.mxu0 %v10122_v60  ;;  %6263 = vmatprep.subr.bf16.mxu1 %v10125_v61 }
 0x44e   :  { %6178 = vmatpush1.bf16.msra.mxu0 %v10120_v62  ;;  %6264 = vmatpush1.bf16.msra.mxu1 %v10123_v63 }
 0x44f   :  { %6179 = vmatprep.subr.bf16.mxu0 %v10128_v0  ;;  %6265 = vmatprep.subr.bf16.mxu1 %v10131_v2 }
 0x452   :  { %6180 = vmatpush1.bf16.msra.mxu0 %v10126_v3  ;;  %6266 = vmatpush1.bf16.msra.mxu1 %v10129_v31 }
 0x453   :  { %6181 = vmatprep.subr.bf16.mxu0 %v10134_v6  ;;  %6267 = vmatprep.subr.bf16.mxu1 %v10137_v7 }
 0x456   :  { %6182 = vmatpush1.bf16.msra.mxu0 %v10132_v8  ;;  %6268 = vmatpush1.bf16.msra.mxu1 %v10135_v9 }
 0x457   :  { %6183 = vmatprep.subr.bf16.mxu0 %v10140_v11  ;;  %6269 = vmatprep.subr.bf16.mxu1 %v10143_v12 }
 0x45a   :  { %6184 = vmatpush1.bf16.msra.mxu0 %v10138_v37  ;;  %6270 = vmatpush1.bf16.msra.mxu1 %v10141_v13 }
 0x45b   :  { %8894 = vmatprep.subr.bf16.mxu1 %v10363_v15  ;;  %7290 = vmatprep.subr.bf16.mxu0 %v10146_v17 }
 0x45d   :  { %6186 = vmatmul.mubr.bf16.vlgmr.msra.gmra.mrb[4].mxu0 %v5340_v14  ;;  %6272 = vmatmul.mubr.bf16.vlgmr.msra.gmra.mrb[8].mxu1 %v5340_v14 }
 0x45e   :  { %7291 = vmatpush1.bf16.msra.mxu0 %v10144_v16  ;;  %8910 = vmatprep.mubr.msk.bf16.mxu1 %vm10365_vm14, %v10363_v15 }
 0x45f   :  { %7292 = vmatprep.subr.bf16.mxu0 %v10149_v18 }
 0x462   :  { %7293 = vmatpush1.bf16.msra.mxu0 %v10147_v20 }
 0x463   :  { %7294 = vmatprep.subr.bf16.mxu0 %v10152_v4 }
 0x466   :  { %7295 = vmatpush1.bf16.msra.mxu0 %v10150_v22 }
 0x467   :  { %7296 = vmatprep.subr.bf16.mxu0 %v10155_v23 }
 0x46a   :  { %7297 = vmatpush1.bf16.msra.mxu0 %v10153_v24 }
 0x46b   :  { %7298 = vmatprep.subr.bf16.mxu0 %v10158_v25 }
 0x46e   :  { %7299 = vmatpush1.bf16.msra.mxu0 %v10156_v26 }
 0x46f   :  { %7300 = vmatprep.subr.bf16.mxu0 %v10161_v27 }
 0x472   :  { %7301 = vmatpush1.bf16.msra.mxu0 %v10159_v51 }
 0x473   :  { %7302 = vmatprep.subr.bf16.mxu0 %v10164_v56 }
 0x476   :  { %7303 = vmatpush1.bf16.msra.mxu0 %v10162_v28 }
 0x477   :  { %7304 = vmatprep.subr.bf16.mxu0 %v10167_v1 }
 0x47a   :  { %7305 = vmatpush1.bf16.msra.mxu0 %v10165_v29 }
 0x47b   :  { %7306 = vmatprep.subr.bf16.mxu0 %v10170_v30 }
 0x47e   :  { %7307 = vmatpush1.bf16.msra.mxu0 %v10168_v32 }
 0x47f   :  { %7308 = vmatprep.subr.bf16.mxu0 %v10173_v10 }
 0x482   :  { %7309 = vmatpush1.bf16.msra.mxu0 %v10171_v34 }
 0x483   :  { %7310 = vmatprep.subr.bf16.mxu0 %v10176_v33 }
 0x486   :  { %7311 = vmatpush1.bf16.msra.mxu0 %v10174_v35 }
 0x487   :  { %7312 = vmatprep.subr.bf16.mxu0 %v10179_v36 }
 0x48a   :  { %7313 = vmatpush1.bf16.msra.mxu0 %v10177_v19 }
 0x48b   :  { %7314 = vmatprep.subr.bf16.mxu0 %v10182_v38 }
 0x48e   :  { %7315 = vmatpush1.bf16.msra.mxu0 %v10180_v43 }
 0x48f   :  { %7316 = vmatprep.subr.bf16.mxu0 %v10185_v44 }
 0x492   :  { %7317 = vmatpush1.bf16.msra.mxu0 %v10183_v47 }
 0x493   :  { %7318 = vmatprep.subr.bf16.mxu0 %v10188_v5 }
 0x496   :  { %7319 = vmatpush1.bf16.msra.mxu0 %v10186_v49 }
 0x497   :  { %7320 = vmatprep.subr.bf16.mxu0 %v10191_v39 }
 0x49a   :  { %7321 = vmatpush1.bf16.msra.mxu0 %v10189_v41 }
 0x49b   :  { %7333 = vmatprep.subr.bf16.mxu0 %v10194_v42 }
 0x530   :  { %v6187_v21 = vpop.f32.mrb[4].mxu0  ;;  %v6273_v45 = vpop.f32.mrb[8].mxu1 }
 0x531   :  { %6282 = vst [vmem:[#allocation2] sm:$0xff] %v6187_v21  ;;  %6284 = vst [vmem:[#allocation2 + $0x10] sm:$0xff] %v6273_v45  ;;  %v6189_v48 = vpop.f32.mrb[5].mxu0  ;;  %v6275_v50 = vpop.f32.mrb[9].mxu1 }
 0x532   :  { %6283 = vst [vmem:[#allocation2 + $0x8] sm:$0xff] %v6189_v48  ;;  %6285 = vst [vmem:[#allocation2 + $0x18] sm:$0xff] %v6275_v50  ;;  %v6191_v52 = vpop.f32.mrb[6].mxu0  ;;  %v6277_v54 = vpop.f32.mrb[10].mxu1 }
 0x533   :  { %6286 = vst [vmem:[#allocation2 + $0x20] sm:$0xff] %v6191_v52  ;;  %6288 = vst [vmem:[#allocation2 + $0x30] sm:$0xff] %v6277_v54  ;;  %v6193_v55 = vpop.f32.mrb[7].mxu0  ;;  %v6279_v57 = vpop.f32.mrb[11].mxu1 }
 0x534   :  { %6287 = vst [vmem:[#allocation2 + $0x28] sm:$0xff] %v6193_v55  ;;  %6289 = vst [vmem:[#allocation2 + $0x38] sm:$0xff] %v6279_v57 }
 0x538   :  { %v6325_v58 = vld [vmem:[#allocation2] sm:$0x3]  ;;  %v6327_v40 = vld [vmem:[#allocation2 + $0x10] sm:$0x3]  ;;  %v6402_v46 = vld [vmem:[#allocation2] sm:$0xc] }
 0x539   :  { %v6326_v59 = vld [vmem:[#allocation2 + $0x8] sm:$0x3]  ;;  %v6404_v60 = vld [vmem:[#allocation2 + $0x10] sm:$0xc]  ;;  %v6403_v62 = vld [vmem:[#allocation2 + $0x8] sm:$0xc] }
 0x53a   :  { %v6334_v61 = vcombine.low %v6325_v58, %v6326_v59  ;;  %v6328_v63 = vld [vmem:[#allocation2 + $0x18] sm:$0x3]  ;;  %v6405_v0 = vld [vmem:[#allocation2 + $0x18] sm:$0xc]  ;;  %v6411_v31 = vcombine.low %v6402_v46, %v6403_v62  ;;  %v6479_v12 = vld [vmem:[#allocation2] sm:$0x30] }
 0x53b   :  { %v6335_v3 = vcombine.low %v6327_v40, %v6328_v63  ;;  %v6412_v7 = vcombine.low %v6404_v60, %v6405_v0  ;;  %v6481_v37 = vld [vmem:[#allocation2 + $0x10] sm:$0x30]  ;;  %v6480_v14 = vld [vmem:[#allocation2 + $0x8] sm:$0x30]  ;;  %v6482_v16 = vld [vmem:[#allocation2 + $0x18] sm:$0x30] }
 0x53c   :  { %v6342_v2 = vrot.slane %v6334_v61, %v10601_v53  ;;  %v6419_v9 = vrot.slane %v6411_v31, %v10601_v53  ;;  %v6488_v26 = vcombine.high %v6479_v12, %v6480_v14  ;;  %v6489_v27 = vcombine.high %v6481_v37, %v6482_v16  ;;  %v6556_v38 = vld [vmem:[#allocation2] sm:$0xc0]  ;;  %v6558_v43 = vld [vmem:[#allocation2 + $0x10] sm:$0xc0]  ;;  %v6557_v49 = vld [vmem:[#allocation2 + $0x8] sm:$0xc0] }
 0x53d   :  { %v6349_v6 = vrot.slane %v6335_v3, %v10601_v53  ;;  %v6426_v11 = vrot.slane %v6412_v7, %v10601_v53  ;;  %v6559_v39 = vld [vmem:[#allocation2 + $0x18] sm:$0xc0]  ;;  %v6565_v55 = vcombine.high %v6556_v38, %v6557_v49  ;;  %v6633_v7 = vld [vmem:[#allocation2 + $0x20] sm:$0x3]  ;;  %v6634_v12 = vld [vmem:[#allocation2 + $0x28] sm:$0x3] }
 0x53e   :  { %v6496_v33 = vrot.slane %v6488_v26, %v10601_v53  ;;  %v6503_v35 = vrot.slane %v6489_v27, %v10601_v53  ;;  %v6566_v57 = vcombine.high %v6558_v43, %v6559_v39  ;;  %v6636_v37 = vld [vmem:[#allocation2 + $0x38] sm:$0x3]  ;;  %v6711_v43 = vld [vmem:[#allocation2 + $0x28] sm:$0xc] }
 0x53f   :  { %v6350_v8 = vcombine.low %v6342_v2, %v6349_v6  ;;  %v6427_v24 = vcombine.high %v6419_v9, %v6426_v11  ;;  %v6573_v2 = vrot.slane %v6565_v55, %v10601_v53 }
 0x540   :  { %v6504_v45 = vcombine.low %v6496_v33, %v6503_v35  ;;  %v6580_v3 = vrot.slane %v6566_v57, %v10601_v53  ;;  %v6710_v35 = vld [vmem:[#allocation2 + $0x20] sm:$0xc] }
 0x541   :  { %vm6355_vm7 = vcmp.ge.f32.partialorder %v6350_v8, 1.25  ;;  %v6406_v20 = vmul.f32 0.75, %v6350_v8 }
 0x542   :  { %v8774_v13 = vsel %vm6355_vm7, 1.0, %v10363_v15 }
 0x543   :  { %v6358_v17 = vsub.f32 1.0, %v8774_v13  ;;  %v6368_v18 = vrot.slane %v8774_v13, %v10601_v53  ;;  %v6361_v4 = vcombine.high %v8774_v13, %v8774_v13  ;;  %v6429_v28 = vadd.f32 %v6427_v24, %v6406_v20 }
 0x545   :  { %v6359_v22 = vmul.f32 %v6358_v17, %v6350_v8  ;;  %v6376_v23 = vcombine.high %v6368_v18, %v6368_v18  ;;  %v6382_v25 = vpack.c.bf16 %v6368_v18, %v6368_v18  ;;  %v6375_v51 = vrot.slane %v6361_v4, %v10601_v53  ;;  %v6635_v8 = vld [vmem:[#allocation2 + $0x30] sm:$0x3] }
 0x546   :  { %v6483_v47 = vmul.f32 0.75, %v6429_v28  ;;  %v6581_v17 = vcombine.high %v6573_v2, %v6580_v3  ;;  %v6643_v24 = vcombine.low %v6635_v8, %v6636_v37  ;;  %v6787_v2 = vld [vmem:[#allocation2 + $0x20] sm:$0x30]  ;;  %v6789_v3 = vld [vmem:[#allocation2 + $0x30] sm:$0x30] }
 0x547   :  { %v6383_v56 = vpack.c.bf16 %v6376_v23, %v6376_v23  ;;  %v6430_v1 = vmul.f32 0.97, %v6359_v22  ;;  %v6390_v29 = vrot.slane %v6382_v25, 7  ;;  %v6377_v30 = vcombine.high %v6375_v51, %v6375_v51  ;;  %v6790_v8 = vld [vmem:[#allocation2 + $0x38] sm:$0x30] }
 0x548   :  { %v6384_v32 = vpack.c.bf16 %v6375_v51, %v6375_v51  ;;  %v6506_v58 = vadd.f32 %v6504_v45, %v6483_v47  ;;  %v6642_v23 = vcombine.low %v6633_v7, %v6634_v12  ;;  %v6788_v7 = vld [vmem:[#allocation2 + $0x28] sm:$0x30] }
 0x549   :  { %v6391_v10 = vrot.slane %v6383_v56, 7  ;;  %v6431_v34 = vadd.f32 %v6430_v1, %v6429_v28  ;;  %6398 = vst [vmem:[#allocation4] sm:$0x2] %v6390_v29  ;;  %v6385_v36 = vpack.c.bf16 %v6377_v30, %v6377_v30 }
 0x54a   :  { %v6392_v19 = vrot.slane %v6384_v32, 7  ;;  %v6560_v11 = vmul.f32 0.75, %v6506_v58  ;;  %v6650_v32 = vrot.slane %v6642_v23, %v10601_v53 }
 0x54b   :  { %6399 = vst [vmem:[#allocation4 + $0x8] sm:$0x2] %v6391_v10  ;;  %vm6432_vm8 = vcmp.ge.f32.partialorder %v6431_v34, 1.25  ;;  %v6393_v5 = vrot.slane %v6385_v36, 7  ;;  %v6657_v10 = vrot.slane %v6643_v24, %v10601_v53  ;;  %v6712_v36 = vld [vmem:[#allocation2 + $0x30] sm:$0xc] }
 0x54c   :  { %v8775_v44 = vsel %vm6432_vm8, 1.0, %v10363_v15  ;;  %6400 = vst [vmem:[#allocation4 + $0x10] sm:$0x2] %v6392_v19  ;;  %v6583_v25 = vadd.f32 %v6581_v17, %v6560_v11 }
 0x54d   :  { %v6435_v41 = vsub.f32 1.0, %v8775_v44  ;;  %v6445_v42 = vrot.slane %v8775_v44, %v10601_v53  ;;  %v6438_v21 = vcombine.high %v8775_v44, %v8775_v44  ;;  %6401 = vst [vmem:[#allocation4 + $0x18] sm:$0x2] %v6393_v5  ;;  %v6713_v44 = vld [vmem:[#allocation2 + $0x38] sm:$0xc]  ;;  %v6658_v39 = vcombine.low %v6650_v32, %v6657_v10 }
 0x54e   :  { %v6637_v38 = vmul.f32 0.75, %v6583_v25 }
 0x54f   :  { %v6436_v48 = vmul.f32 %v6435_v41, %v6431_v34  ;;  %v6453_v50 = vcombine.high %v6445_v42, %v6445_v42  ;;  %v6459_v52 = vpack.c.bf16 %v6445_v42, %v6445_v42  ;;  %v6452_v54 = vrot.slane %v6438_v21, %v10601_v53 }
 0x551   :  { %v6460_v40 = vpack.c.bf16 %v6453_v50, %v6453_v50  ;;  %v6507_v59 = vmul.f32 0.97, %v6436_v48  ;;  %v6467_v46 = vrot.slane %v6459_v52, 6  ;;  %v6454_v60 = vcombine.high %v6452_v54, %v6452_v54 }
 0x552   :  { %v6461_v61 = vpack.c.bf16 %v6452_v54, %v6452_v54  ;;  %v6719_v48 = vcombine.low %v6710_v35, %v6711_v43  ;;  %v6720_v50 = vcombine.low %v6712_v36, %v6713_v44  ;;  %v6660_v52 = vadd.f32 %v6658_v39, %v6637_v38 }
 0x553   :  { %v6468_v62 = vrot.slane %v6460_v40, 6  ;;  %v6508_v63 = vadd.f32 %v6507_v59, %v6506_v58  ;;  %6475 = vst [vmem:[#allocation4] sm:$0x4] %v6467_v46  ;;  %v6462_v0 = vpack.c.bf16 %v6454_v60, %v6454_v60 }
 0x554   :  { %v6469_v31 = vrot.slane %v6461_v61, 6  ;;  %v6727_v61 = vrot.slane %v6719_v48, %v10601_v53 }
 0x555   :  { %6476 = vst [vmem:[#allocation4 + $0x8] sm:$0x4] %v6468_v62  ;;  %vm6509_vm9 = vcmp.ge.f32.partialorder %v6508_v63, 1.25  ;;  %v6470_v6 = vrot.slane %v6462_v0, 6  ;;  %v6734_v62 = vrot.slane %v6720_v50, %v10601_v53 }
 0x556   :  { %v8776_v9 = vsel %vm6509_vm9, 1.0, %v10363_v15  ;;  %6477 = vst [vmem:[#allocation4 + $0x10] sm:$0x4] %v6469_v31 }
 0x557   :  { %v6512_v13 = vsub.f32 1.0, %v8776_v9  ;;  %v6522_v14 = vrot.slane %v8776_v9, %v10601_v53  ;;  %6478 = vst [vmem:[#allocation4 + $0x18] sm:$0x4] %v6470_v6  ;;  %v6515_v16 = vcombine.high %v8776_v9, %v8776_v9  ;;  %v6714_v6 = vmul.f32 0.75, %v6660_v52 }
 0x558   :  { %v6735_v37 = vcombine.high %v6727_v61, %v6734_v62 }
 0x559   :  { %v6513_v18 = vmul.f32 %v6512_v13, %v6508_v63  ;;  %v6530_v20 = vcombine.high %v6522_v14, %v6522_v14  ;;  %v6536_v4 = vpack.c.bf16 %v6522_v14, %v6522_v14  ;;  %v6529_v22 = vrot.slane %v6515_v16, %v10601_v53 }
 0x55b   :  { %v6537_v26 = vpack.c.bf16 %v6530_v20, %v6530_v20  ;;  %v6584_v27 = vmul.f32 0.97, %v6513_v18  ;;  %v6544_v51 = vrot.slane %v6536_v4, 5  ;;  %v6531_v56 = vcombine.high %v6529_v22, %v6529_v22 }
 0x55c   :  { %v6538_v28 = vpack.c.bf16 %v6529_v22, %v6529_v22  ;;  %v6796_v18 = vcombine.high %v6787_v2, %v6788_v7  ;;  %v6797_v20 = vcombine.high %v6789_v3, %v6790_v8  ;;  %v6737_v4 = vadd.f32 %v6735_v37, %v6714_v6  ;;  %v10197_v7 = vld [vmem:[#allocation14 + $0x114] ss:$8 sps:$4 sm:$0xff]   ;;  %v10198_v37 = vld [vmem:[#allocation14 + $0x120] ss:$8 sps:$4 sm:$0xff]  }
 0x55d   :  { %v6545_v1 = vrot.slane %v6537_v26, 5  ;;  %v6585_v29 = vadd.f32 %v6584_v27, %v6583_v25  ;;  %6552 = vst [vmem:[#allocation4] sm:$0x8] %v6544_v51  ;;  %v6539_v30 = vpack.c.bf16 %v6531_v56, %v6531_v56 }
 0x55e   :  { %v6546_v34 = vrot.slane %v6538_v28, 5  ;;  %v6804_v28 = vrot.slane %v6796_v18, %v10601_v53  ;;  %v6791_v10 = vmul.f32 0.75, %v6737_v4  ;;  %v10209_v18 = vld [vmem:[#allocation14 + $0x154] ss:$8 sps:$4 sm:$0xff]  }
 0x55f   :  { %6553 = vst [vmem:[#allocation4 + $0x8] sm:$0x8] %v6545_v1  ;;  %vm6586_vm10 = vcmp.ge.f32.partialorder %v6585_v29, 1.25  ;;  %v6547_v33 = vrot.slane %v6539_v30, 5  ;;  %v6811_v1 = vrot.slane %v6797_v20, %v10601_v53  ;;  %v10207_v20 = vld [vmem:[#allocation14 + $0x150] ss:$8 sps:$4 sm:$0xff]  }
 0x560   :  { %v8777_v19 = vsel %vm6586_vm10, 1.0, %v10363_v15  ;;  %6554 = vst [vmem:[#allocation4 + $0x10] sm:$0x8] %v6546_v34 }
 0x561   :  { %v6589_v47 = vsub.f32 1.0, %v8777_v19  ;;  %v6599_v5 = vrot.slane %v8777_v19, %v10601_v53  ;;  %6555 = vst [vmem:[#allocation4 + $0x18] sm:$0x8] %v6547_v33  ;;  %v6592_v49 = vcombine.high %v8777_v19, %v8777_v19  ;;  %v6812_v36 = vcombine.low %v6804_v28, %v6811_v1  ;;  %v10222_v28 = vld [vmem:[#allocation14 + $0x1a0] ss:$8 sps:$4 sm:$0xff]  }
 0x562   :  { %v10227_v1 = vld [vmem:[#allocation14 + $0x1b4] ss:$8 sps:$4 sm:$0xff]  }
 0x563   :  { %v6590_v41 = vmul.f32 %v6589_v47, %v6585_v29  ;;  %v6607_v42 = vcombine.high %v6599_v5, %v6599_v5  ;;  %v6613_v21 = vpack.c.bf16 %v6599_v5, %v6599_v5  ;;  %v6606_v45 = vrot.slane %v6592_v49, %v10601_v53 }
 0x564   :  { %v6814_v47 = vadd.f32 %v6812_v36, %v6791_v10  ;;  %v10233_v10 = vld [vmem:[#allocation14 + $0x1d4] ss:$8 sps:$4 sm:$0xff]  }
 0x565   :  { %v6614_v54 = vpack.c.bf16 %v6607_v42, %v6607_v42  ;;  %v6661_v55 = vmul.f32 0.97, %v6590_v41  ;;  %v6621_v57 = vrot.slane %v6613_v21, 4  ;;  %v6608_v58 = vcombine.high %v6606_v45, %v6606_v45  ;;  %v10239_v36 = vld [vmem:[#allocation14 + $0x1f4] ss:$8 sps:$4 sm:$0xff]  }
 0x566   :  { %v6615_v40 = vpack.c.bf16 %v6606_v45, %v6606_v45 }
 0x567   :  { %v6622_v59 = vrot.slane %v6614_v54, 4  ;;  %v6662_v46 = vadd.f32 %v6661_v55, %v6660_v52  ;;  %6629 = vst [vmem:[#allocation4] sm:$0x10] %v6621_v57  ;;  %v6616_v60 = vpack.c.bf16 %v6608_v58, %v6608_v58 }
 0x568   :  { %v6623_v63 = vrot.slane %v6615_v40, 4 }
 0x569   :  { %6630 = vst [vmem:[#allocation4 + $0x8] sm:$0x10] %v6622_v59  ;;  %vm6663_vm11 = vcmp.ge.f32.partialorder %v6662_v46, 1.25  ;;  %v6624_v0 = vrot.slane %v6616_v60, 4 }
 0x56a   :  { %v8778_v31 = vsel %vm6663_vm11, 1.0, %v10363_v15  ;;  %6631 = vst [vmem:[#allocation4 + $0x10] sm:$0x10] %v6623_v63 }
 0x56b   :  { %v6666_v9 = vsub.f32 1.0, %v8778_v31  ;;  %v6676_v11 = vrot.slane %v8778_v31, %v10601_v53  ;;  %6632 = vst [vmem:[#allocation4 + $0x18] sm:$0x10] %v6624_v0  ;;  %v6669_v12 = vcombine.high %v8778_v31, %v8778_v31  ;;  %v10192_v31 = vld [vmem:[#allocation14 + $0x100] ss:$8 sps:$4 sm:$0xff]  }
 0x56d   :  { %v6667_v13 = vmul.f32 %v6666_v9, %v6662_v46  ;;  %v6684_v14 = vcombine.high %v6676_v11, %v6676_v11  ;;  %v6690_v16 = vpack.c.bf16 %v6676_v11, %v6676_v11  ;;  %v6683_v17 = vrot.slane %v6669_v12, %v10601_v53  ;;  %v10195_v11 = vld [vmem:[#allocation14 + $0x110] ss:$8 sps:$4 sm:$0xff]   ;;  %v10200_v12 = vld [vmem:[#allocation14 + $0x124] ss:$8 sps:$4 sm:$0xff]  }
 0x56f   :  { %v6691_v22 = vpack.c.bf16 %v6684_v14, %v6684_v14  ;;  %v6738_v23 = vmul.f32 0.97, %v6667_v13  ;;  %v6698_v24 = vrot.slane %v6690_v16, 3  ;;  %v6685_v25 = vcombine.high %v6683_v17, %v6683_v17  ;;  %v10203_v13 = vld [vmem:[#allocation14 + $0x134] ss:$8 sps:$4 sm:$0xff]  }
 0x570   :  { %v6692_v26 = vpack.c.bf16 %v6683_v17, %v6683_v17  ;;  %v10201_v14 = vld [vmem:[#allocation14 + $0x130] ss:$8 sps:$4 sm:$0xff]   ;;  %v10206_v16 = vld [vmem:[#allocation14 + $0x144] ss:$8 sps:$4 sm:$0xff]   ;;  %v10204_v17 = vld [vmem:[#allocation14 + $0x140] ss:$8 sps:$4 sm:$0xff]  }
 0x571   :  { %v6699_v27 = vrot.slane %v6691_v22, 3  ;;  %v6739_v51 = vadd.f32 %v6738_v23, %v6737_v4  ;;  %6706 = vst [vmem:[#allocation4] sm:$0x20] %v6698_v24  ;;  %v6693_v56 = vpack.c.bf16 %v6685_v25, %v6685_v25  ;;  %v10212_v4 = vld [vmem:[#allocation14 + $0x164] ss:$8 sps:$4 sm:$0xff]  }
 0x572   :  { %v6700_v29 = vrot.slane %v6692_v26, 3  ;;  %v10210_v22 = vld [vmem:[#allocation14 + $0x160] ss:$8 sps:$4 sm:$0xff]   ;;  %v10215_v23 = vld [vmem:[#allocation14 + $0x174] ss:$8 sps:$4 sm:$0xff]  }
 0x573   :  { %6707 = vst [vmem:[#allocation4 + $0x8] sm:$0x20] %v6699_v27  ;;  %vm6740_vm12 = vcmp.ge.f32.partialorder %v6739_v51, 1.25  ;;  %v6701_v30 = vrot.slane %v6693_v56, 3  ;;  %v10213_v24 = vld [vmem:[#allocation14 + $0x170] ss:$8 sps:$4 sm:$0xff]  }
 0x574   :  { %v8779_v32 = vsel %vm6740_vm12, 1.0, %v10363_v15  ;;  %6708 = vst [vmem:[#allocation4 + $0x10] sm:$0x20] %v6700_v29  ;;  %v10218_v25 = vld [vmem:[#allocation14 + $0x184] ss:$8 sps:$4 sm:$0xff]  }
 0x575   :  { %v6743_v34 = vsub.f32 1.0, %v8779_v32  ;;  %v6753_v33 = vrot.slane %v8779_v32, %v10601_v53  ;;  %6709 = vst [vmem:[#allocation4 + $0x18] sm:$0x20] %v6701_v30  ;;  %v6746_v35 = vcombine.high %v8779_v32, %v8779_v32  ;;  %v10216_v26 = vld [vmem:[#allocation14 + $0x180] ss:$8 sps:$4 sm:$0xff]  }
 0x576   :  { %v10221_v27 = vld [vmem:[#allocation14 + $0x194] ss:$8 sps:$4 sm:$0xff]   ;;  %v10224_v56 = vld [vmem:[#allocation14 + $0x1a4] ss:$8 sps:$4 sm:$0xff]   ;;  %v10225_v29 = vld [vmem:[#allocation14 + $0x1b0] ss:$8 sps:$4 sm:$0xff]  }
 0x577   :  { %v6744_v19 = vmul.f32 %v6743_v34, %v6739_v51  ;;  %v6761_v38 = vcombine.high %v6753_v33, %v6753_v33  ;;  %v6767_v43 = vpack.c.bf16 %v6753_v33, %v6753_v33  ;;  %v6760_v44 = vrot.slane %v6746_v35, %v10601_v53  ;;  %v10219_v51 = vld [vmem:[#allocation14 + $0x190] ss:$8 sps:$4 sm:$0xff]   ;;  %v10230_v30 = vld [vmem:[#allocation14 + $0x1c4] ss:$8 sps:$4 sm:$0xff]   ;;  %v10228_v32 = vld [vmem:[#allocation14 + $0x1c0] ss:$8 sps:$4 sm:$0xff]  }
 0x578   :  { %v10231_v34 = vld [vmem:[#allocation14 + $0x1d0] ss:$8 sps:$4 sm:$0xff]   ;;  %v10236_v33 = vld [vmem:[#allocation14 + $0x1e4] ss:$8 sps:$4 sm:$0xff]   ;;  %v10234_v35 = vld [vmem:[#allocation14 + $0x1e0] ss:$8 sps:$4 sm:$0xff]  }
 0x579   :  { %v6768_v5 = vpack.c.bf16 %v6761_v38, %v6761_v38  ;;  %v6815_v49 = vmul.f32 0.97, %v6744_v19  ;;  %v6775_v39 = vrot.slane %v6767_v43, 2  ;;  %v6762_v41 = vcombine.high %v6760_v44, %v6760_v44  ;;  %v10237_v19 = vld [vmem:[#allocation14 + $0x1f0] ss:$8 sps:$4 sm:$0xff]   ;;  %v10240_v43 = vld [vmem:[#allocation15] sm:$0xff]  }
 0x57a   :  { %v6769_v42 = vpack.c.bf16 %v6760_v44, %v6760_v44  ;;  %8895 = vmatpush3.bf16.msra.mxu1 %v10240_v43  ;;  %v10241_v44 = vld [vmem:[#allocation15 + $0x8] sm:$0xff]  }
 0x57b   :  { %v6776_v21 = vrot.slane %v6768_v5, 2  ;;  %v6816_v45 = vadd.f32 %v6815_v49, %v6814_v47  ;;  %6783 = vst [vmem:[#allocation4] sm:$0x40] %v6775_v39  ;;  %v6770_v48 = vpack.c.bf16 %v6762_v41, %v6762_v41  ;;  %8896 = vmatprep.subr.bf16.mxu1 %v10363_v15  ;;  %v10242_v39 = vld [vmem:[#allocation15 + $0x10] sm:$0xff]  }
 0x57c   :  { %v6777_v50 = vrot.slane %v6769_v42, 2  ;;  %v8846_v47 = vld.sshfl [vmem:[#allocation8 + $0x8] sm:$0x33 pattern:$0x76325410] }
 0x57d   :  { %6784 = vst [vmem:[#allocation4 + $0x8] sm:$0x40] %v6776_v21  ;;  %vm6817_vm13 = vcmp.ge.f32.partialorder %v6816_v45, 1.25  ;;  %v6778_v52 = vrot.slane %v6770_v48, 2  ;;  %v7393_v5 = vcombine.high %v8846_v47, %v8846_v47  ;;  %v7396_v49 = vpack.c.bf16 %v8846_v47, %v8846_v47  ;;  %v10243_v42 = vld [vmem:[#allocation15 + $0x18] sm:$0xff]   ;;  %v10244_v21 = vld [vmem:[#allocation15 + $0x20] sm:$0xff]  }
 0x57e   :  { %v8780_v54 = vsel %vm6817_vm13, 1.0, %v10363_v15  ;;  %6785 = vst [vmem:[#allocation4 + $0x10] sm:$0x40] %v6777_v50  ;;  %8897 = vmatpush3.bf16.msra.mxu1 %v10241_v44  ;;  %v10245_v45 = vld [vmem:[#allocation15 + $0x28] sm:$0xff]   ;;  %v10246_v48 = vld [vmem:[#allocation15 + $0x30] sm:$0xff]   ;;  %v10247_v50 = vld [vmem:[#allocation15 + $0x38] sm:$0xff]  }
 0x57f   :  { %v6830_v55 = vrot.slane %v8780_v54, %v10601_v53  ;;  %6786 = vst [vmem:[#allocation4 + $0x18] sm:$0x40] %v6778_v52  ;;  %v6823_v57 = vcombine.high %v8780_v54, %v8780_v54  ;;  %v7397_v41 = vpack.c.bf16 %v7393_v5, %v7393_v5  ;;  %7398 = vst [vmem:[#allocation5] sm:$0x1] %v7396_v49  ;;  %8898 = vmatprep.subr.bf16.mxu1 %v10363_v15 }
 0x581   :  { %v6838_v58 = vcombine.high %v6830_v55, %v6830_v55  ;;  %v6844_v40 = vpack.c.bf16 %v6830_v55, %v6830_v55  ;;  %v6837_v59 = vrot.slane %v6823_v57, %v10601_v53  ;;  %7399 = vst [vmem:[#allocation5 + $0x8] sm:$0x1] %v7397_v41 }
 0x582   :  { %8899 = vmatpush3.bf16.msra.mxu1 %v10242_v39 }
 0x583   :  { %v6845_v46 = vpack.c.bf16 %v6838_v58, %v6838_v58  ;;  %v6852_v60 = vrot.slane %v6844_v40, 1  ;;  %v6839_v61 = vcombine.high %v6837_v59, %v6837_v59  ;;  %v6846_v62 = vpack.c.bf16 %v6837_v59, %v6837_v59  ;;  %8900 = vmatprep.subr.bf16.mxu1 %v10363_v15  ;;  %v7380_v58 = vld [vmem:[#allocation8] sm:$0xf]  ;;  %v7382_v40 = vld [vmem:[#allocation8 + $0x4] sm:$0xf] }
 0x584   :  { %v7402_v59 = vmul.f32 0.75, %v7380_v58 }
 0x585   :  { %v6853_v63 = vrot.slane %v6845_v46, 1  ;;  %6860 = vst [vmem:[#allocation4] sm:$0x80] %v6852_v60  ;;  %v6847_v0 = vpack.c.bf16 %v6839_v61, %v6839_v61  ;;  %v6854_v2 = vrot.slane %v6846_v62, 1  ;;  %v7415_v61 = vmul.f32 0.97, %v7382_v40 }
 0x586   :  { %8901 = vmatpush3.bf16.msra.mxu1 %v10243_v42 }
 0x587   :  { %6861 = vst [vmem:[#allocation4 + $0x8] sm:$0x80] %v6853_v63  ;;  %v6855_v3 = vrot.slane %v6847_v0, 1  ;;  %6862 = vst [vmem:[#allocation4 + $0x10] sm:$0x80] %v6854_v2  ;;  %8902 = vmatprep.subr.bf16.mxu1 %v10363_v15 }
 0x589   :  { %6863 = vst [vmem:[#allocation4 + $0x18] sm:$0x80] %v6855_v3 }
 0x58a   :  { %8903 = vmatpush3.bf16.msra.mxu1 %v10244_v21 }
 0x58b   :  { %8904 = vmatprep.subr.bf16.mxu1 %v10363_v15 }
 0x58c   :  { %v6902_v8 = vld [vmem:[#allocation4] sm:$0xff] }
 0x58e   :  { %v6903_v6 = vld [vmem:[#allocation4 + $0x8] sm:$0xff]  ;;  %v6904_v38 = vld [vmem:[#allocation4 + $0x10] sm:$0xff]  ;;  %8905 = vmatpush3.bf16.msra.mxu1 %v10245_v45 }
 0x58f   :  { %7322 = vmatprep.mubr.bf16.mxu0 %v6903_v6  ;;  %8906 = vmatprep.subr.bf16.mxu1 %v10363_v15 }
 0x590   :  { %7323 = vmatmul.mubr.bf16.vlgmr.msra.gmra.mrb[8].mxu0 %v6902_v8  ;;  %v6905_v9 = vld [vmem:[#allocation4 + $0x18] sm:$0xff] }
 0x591   :  { %7334 = vmatpush1.bf16.msra.mxu0 %v10192_v31  ;;  %7365 = vmatprep.mubr.bf16.mxu0 %v6905_v9 }
 0x592   :  { %7335 = vmatprep.subr.bf16.mxu0 %v10197_v7  ;;  %8907 = vmatpush3.bf16.msra.mxu1 %v10246_v48 }
 0x593   :  { %8908 = vmatprep.subr.bf16.mxu1 %v10363_v15 }
 0x595   :  { %7336 = vmatpush1.bf16.msra.mxu0 %v10195_v11 }
 0x596   :  { %7337 = vmatprep.subr.bf16.mxu0 %v10200_v12  ;;  %8909 = vmatpush3.bf16.msra.mxu1 %v10247_v50 }
 0x599   :  { %7338 = vmatpush1.bf16.msra.mxu0 %v10198_v37 }
 0x59a   :  { %7339 = vmatprep.subr.bf16.mxu0 %v10203_v13 }
 0x59d   :  { %7340 = vmatpush1.bf16.msra.mxu0 %v10201_v14 }
 0x59e   :  { %7341 = vmatprep.subr.bf16.mxu0 %v10206_v16 }
 0x5a1   :  { %7342 = vmatpush1.bf16.msra.mxu0 %v10204_v17 }
 0x5a2   :  { %7343 = vmatprep.subr.bf16.mxu0 %v10209_v18 }
 0x5a5   :  { %7344 = vmatpush1.bf16.msra.mxu0 %v10207_v20 }
 0x5a6   :  { %7345 = vmatprep.subr.bf16.mxu0 %v10212_v4 }
 0x5a9   :  { %7346 = vmatpush1.bf16.msra.mxu0 %v10210_v22 }
 0x5aa   :  { %7347 = vmatprep.subr.bf16.mxu0 %v10215_v23 }
 0x5ad   :  { %7348 = vmatpush1.bf16.msra.mxu0 %v10213_v24 }
 0x5ae   :  { %7349 = vmatprep.subr.bf16.mxu0 %v10218_v25 }
 0x5b1   :  { %7350 = vmatpush1.bf16.msra.mxu0 %v10216_v26 }
 0x5b2   :  { %7351 = vmatprep.subr.bf16.mxu0 %v10221_v27 }
 0x5b5   :  { %7352 = vmatpush1.bf16.msra.mxu0 %v10219_v51 }
 0x5b6   :  { %7353 = vmatprep.subr.bf16.mxu0 %v10224_v56 }
 0x5b9   :  { %7354 = vmatpush1.bf16.msra.mxu0 %v10222_v28 }
 0x5ba   :  { %7355 = vmatprep.subr.bf16.mxu0 %v10227_v1 }
 0x5bd   :  { %7356 = vmatpush1.bf16.msra.mxu0 %v10225_v29 }
 0x5be   :  { %7357 = vmatprep.subr.bf16.mxu0 %v10230_v30 }
 0x5c1   :  { %7358 = vmatpush1.bf16.msra.mxu0 %v10228_v32 }
 0x5c2   :  { %7359 = vmatprep.subr.bf16.mxu0 %v10233_v10 }
 0x5c5   :  { %7360 = vmatpush1.bf16.msra.mxu0 %v10231_v34 }
 0x5c6   :  { %7361 = vmatprep.subr.bf16.mxu0 %v10236_v33 }
 0x5c9   :  { %7362 = vmatpush1.bf16.msra.mxu0 %v10234_v35 }
 0x5ca   :  { %7363 = vmatprep.subr.bf16.mxu0 %v10239_v36 }
 0x5cd   :  { %7364 = vmatpush1.bf16.msra.mxu0 %v10237_v19 }
 0x5d0   :  { %7366 = vmatmul.mubr.bf16.vlgmr.msra.gmra.mrb[8].mxu0 %v6904_v38 }
 0x6a3   :  { %v7367_v52 = vpop.f32.mrb[8].mxu0 }
 0x6a4   :  { %7376 = vst [vmem:[#allocation2] sm:$0xff] %v7367_v52  ;;  %v7369_v54 = vpop.f32.mrb[9].mxu0 }
 0x6a5   :  { %7377 = vst [vmem:[#allocation2 + $0x8] sm:$0xff] %v7369_v54  ;;  %v7371_v55 = vpop.f32.mrb[10].mxu0 }
 0x6a6   :  { %7378 = vst [vmem:[#allocation2 + $0x20] sm:$0xff] %v7371_v55  ;;  %v7373_v57 = vpop.f32.mrb[11].mxu0 }
 0x6a7   :  { %7379 = vst [vmem:[#allocation2 + $0x28] sm:$0xff] %v7373_v57 }
 0x6ac   :  { %v10248_v46 = vld [vmem:[#allocation2] ss:$8 sps:$4 sm:$0x33]   ;;  %v10249_v63 = vld [vmem:[#allocation2] ss:$8 sps:$4 sm:$0xcc]  }
 0x6ad   :  { %v7412_v60 = vrot.slane %v10248_v46, %v10601_v53  ;;  %v7455_v3 = vrot.slane %v10249_v63, %v10601_v53  ;;  %v10250_v31 = vld [vmem:[#allocation2 + $0x4] ss:$8 sps:$4 sm:$0x33]   ;;  %v10251_v6 = vld [vmem:[#allocation2 + $0x4] ss:$8 sps:$4 sm:$0xcc]  }
 0x6ae   :  { %v7574_v37 = vld [vmem:[#allocation2 + $0x20] sm:$0x3]  ;;  %v7617_v13 = vld [vmem:[#allocation2 + $0x20] sm:$0xc]  ;;  %v7499_v14 = vrot.slane %v10250_v31, %v10601_v53  ;;  %v7542_v16 = vrot.slane %v10251_v6, %v10601_v53  ;;  %v7575_v17 = vld [vmem:[#allocation2 + $0x28] sm:$0x3] }
 0x6af   :  { %v7414_v62 = vadd.f32 %v7412_v60, %v7402_v59  ;;  %v7456_v7 = vcombine.high %v7455_v3, %v7455_v3  ;;  %v7618_v18 = vld [vmem:[#allocation2 + $0x28] sm:$0xc]  ;;  %v7579_v51 = vcombine.low %v7574_v37, %v7575_v17  ;;  %v7661_v10 = vld [vmem:[#allocation2 + $0x20] sm:$0x30]  ;;  %v7704_v34 = vld [vmem:[#allocation2 + $0x20] sm:$0xc0] }
 0x6b0   :  { %v7622_v56 = vcombine.low %v7617_v13, %v7618_v18  ;;  %v7543_v30 = vcombine.high %v7542_v16, %v7542_v16  ;;  %v7662_v36 = vld [vmem:[#allocation2 + $0x28] sm:$0x30]  ;;  %v7705_v19 = vld [vmem:[#allocation2 + $0x28] sm:$0xc0] }
 0x6b1   :  { %v7416_v0 = vadd.f32 %v7415_v61, %v7414_v62  ;;  %v7445_v2 = vmul.f32 0.75, %v7414_v62  ;;  %v7586_v47 = vrot.slane %v7579_v51, %v10601_v53  ;;  %v7666_v42 = vcombine.high %v7661_v10, %v7662_v36 }
 0x6b2   :  { %v7629_v35 = vrot.slane %v7622_v56, %v10601_v53  ;;  %v7709_v21 = vcombine.high %v7704_v34, %v7705_v19 }
 0x6b3   :  { %vm7417_vm15 = vcmp.ge.f32.partialorder %v7416_v0, 1.25  ;;  %v7458_v12 = vadd.f32 %v7456_v7, %v7445_v2  ;;  %v7673_v46 = vrot.slane %v7666_v42, %v10601_v53 }
 0x6b4   :  { %v8847_v8 = vsel %vm7417_vm15, 1.0, %v10363_v15  ;;  %v7630_v45 = vcombine.high %v7629_v35, %v7629_v35  ;;  %v7716_v40 = vrot.slane %v7709_v21, %v10601_v53 }
 0x6b5   :  { %v7420_v9 = vsub.f32 1.0, %v8847_v8  ;;  %v7429_v11 = vrot.slane %v8847_v8, %v10601_v53  ;;  %v7489_v23 = vmul.f32 0.75, %v7458_v12 }
 0x6b7   :  { %v7421_v20 = vmul.f32 %v7420_v9, %v7416_v0  ;;  %v7430_v4 = vcombine.high %v7429_v11, %v7429_v11  ;;  %v7433_v22 = vpack.c.bf16 %v7429_v11, %v7429_v11  ;;  %v7501_v27 = vadd.f32 %v7499_v14, %v7489_v23 }
 0x6b8   :  { %v7717_v0 = vcombine.high %v7716_v40, %v7716_v40 }
 0x6b9   :  { %v7434_v24 = vpack.c.bf16 %v7430_v4, %v7430_v4  ;;  %v7437_v25 = vrot.slane %v7433_v22, 7  ;;  %v7459_v26 = vmul.f32 0.97, %v7421_v20  ;;  %v7532_v29 = vmul.f32 0.75, %v7501_v27 }
 0x6bb   :  { %v7438_v28 = vrot.slane %v7434_v24, 7  ;;  %7441 = vst [vmem:[#allocation5] sm:$0x2] %v7437_v25  ;;  %v7460_v1 = vadd.f32 %v7459_v26, %v7458_v12  ;;  %v7545_v32 = vadd.f32 %v7543_v30, %v7532_v29 }
 0x6bd   :  { %7442 = vst [vmem:[#allocation5 + $0x8] sm:$0x2] %v7438_v28  ;;  %vm7461_vm0 = vcmp.ge.f32.partialorder %v7460_v1, 1.25  ;;  %v7576_v44 = vmul.f32 0.75, %v7545_v32 }
 0x6be   :  { %v8848_v33 = vsel %vm7461_vm0, 1.0, %v10363_v15 }
 0x6bf   :  { %v7464_v38 = vsub.f32 1.0, %v8848_v33  ;;  %v7473_v43 = vrot.slane %v8848_v33, %v10601_v53  ;;  %v7588_v41 = vadd.f32 %v7586_v47, %v7576_v44 }
 0x6c1   :  { %v7465_v5 = vmul.f32 %v7464_v38, %v7460_v1  ;;  %v7474_v49 = vcombine.high %v7473_v43, %v7473_v43  ;;  %v7477_v39 = vpack.c.bf16 %v7473_v43, %v7473_v43  ;;  %v7619_v54 = vmul.f32 0.75, %v7588_v41 }
 0x6c3   :  { %v7478_v48 = vpack.c.bf16 %v7474_v49, %v7474_v49  ;;  %v7481_v50 = vrot.slane %v7477_v39, 6  ;;  %v7502_v52 = vmul.f32 0.97, %v7465_v5  ;;  %v7632_v58 = vadd.f32 %v7630_v45, %v7619_v54 }
 0x6c5   :  { %v7482_v55 = vrot.slane %v7478_v48, 6  ;;  %7485 = vst [vmem:[#allocation5] sm:$0x4] %v7481_v50  ;;  %v7503_v57 = vadd.f32 %v7502_v52, %v7501_v27  ;;  %v7663_v59 = vmul.f32 0.75, %v7632_v58 }
 0x6c7   :  { %7486 = vst [vmem:[#allocation5 + $0x8] sm:$0x4] %v7482_v55  ;;  %vm7504_vm1 = vcmp.ge.f32.partialorder %v7503_v57, 1.25  ;;  %v7675_v63 = vadd.f32 %v7673_v46, %v7663_v59 }
 0x6c8   :  { %v8849_v60 = vsel %vm7504_vm1, 1.0, %v10363_v15 }
 0x6c9   :  { %v7507_v61 = vsub.f32 1.0, %v8849_v60  ;;  %v7516_v62 = vrot.slane %v8849_v60, %v10601_v53  ;;  %v7706_v6 = vmul.f32 0.75, %v7675_v63 }
 0x6cb   :  { %v7508_v2 = vmul.f32 %v7507_v61, %v7503_v57  ;;  %v7517_v3 = vcombine.high %v7516_v62, %v7516_v62  ;;  %v7520_v31 = vpack.c.bf16 %v7516_v62, %v7516_v62  ;;  %v7719_v11 = vadd.f32 %v7717_v0, %v7706_v6 }
 0x6cd   :  { %v7521_v7 = vpack.c.bf16 %v7517_v3, %v7517_v3  ;;  %v7524_v8 = vrot.slane %v7520_v31, 5  ;;  %v7546_v9 = vmul.f32 0.97, %v7508_v2  ;;  %7727 = vst [vmem:[#allocation8] sm:$0xf] %v7719_v11 }
 0x6ce   :  { %v7848_v31 = vld [vmem:[#allocation9] sm:$0x3] }
 0x6cf   :  { %v7525_v12 = vrot.slane %v7521_v7, 5  ;;  %7528 = vst [vmem:[#allocation5] sm:$0x8] %v7524_v8  ;;  %v7547_v37 = vadd.f32 %v7546_v9, %v7545_v32  ;;  %v7850_v8 = vld [vmem:[#allocation9 + $0x2] sm:$0x3]  ;;  %v7856_v9 = vmul.f32 0.75, %v7848_v31 }
 0x6d1   :  { %7529 = vst [vmem:[#allocation5 + $0x8] sm:$0x8] %v7525_v12  ;;  %vm7548_vm2 = vcmp.ge.f32.partialorder %v7547_v37, 1.25 }
 0x6d2   :  { %v8850_v13 = vsel %vm7548_vm2, 1.0, %v10363_v15 }
 0x6d3   :  { %v7551_v14 = vsub.f32 1.0, %v8850_v13  ;;  %v7560_v16 = vrot.slane %v8850_v13, %v10601_v53 }
 0x6d5   :  { %v7552_v17 = vmul.f32 %v7551_v14, %v7547_v37  ;;  %v7561_v18 = vcombine.high %v7560_v16, %v7560_v16  ;;  %v7564_v20 = vpack.c.bf16 %v7560_v16, %v7560_v16 }
 0x6d7   :  { %v7565_v4 = vpack.c.bf16 %v7561_v18, %v7561_v18  ;;  %v7568_v22 = vrot.slane %v7564_v20, 4  ;;  %v7589_v23 = vmul.f32 0.97, %v7552_v17 }
 0x6d9   :  { %v7569_v24 = vrot.slane %v7565_v4, 4  ;;  %7572 = vst [vmem:[#allocation5] sm:$0x10] %v7568_v22  ;;  %v7590_v25 = vadd.f32 %v7589_v23, %v7588_v41 }
 0x6db   :  { %7573 = vst [vmem:[#allocation5 + $0x8] sm:$0x10] %v7569_v24  ;;  %vm7591_vm3 = vcmp.ge.f32.partialorder %v7590_v25, 1.25 }
 0x6dc   :  { %v8851_v26 = vsel %vm7591_vm3, 1.0, %v10363_v15 }
 0x6dd   :  { %v7594_v27 = vsub.f32 1.0, %v8851_v26  ;;  %v7603_v51 = vrot.slane %v8851_v26, %v10601_v53 }
 0x6df   :  { %v7595_v56 = vmul.f32 %v7594_v27, %v7590_v25  ;;  %v7604_v28 = vcombine.high %v7603_v51, %v7603_v51  ;;  %v7607_v1 = vpack.c.bf16 %v7603_v51, %v7603_v51 }
 0x6e1   :  { %v7608_v29 = vpack.c.bf16 %v7604_v28, %v7604_v28  ;;  %v7611_v30 = vrot.slane %v7607_v1, 3  ;;  %v7633_v32 = vmul.f32 0.97, %v7595_v56 }
 0x6e3   :  { %v7612_v10 = vrot.slane %v7608_v29, 3  ;;  %7615 = vst [vmem:[#allocation5] sm:$0x20] %v7611_v30  ;;  %v7634_v34 = vadd.f32 %v7633_v32, %v7632_v58 }
 0x6e5   :  { %7616 = vst [vmem:[#allocation5 + $0x8] sm:$0x20] %v7612_v10  ;;  %vm7635_vm4 = vcmp.ge.f32.partialorder %v7634_v34, 1.25 }
 0x6e6   :  { %v8852_v33 = vsel %vm7635_vm4, 1.0, %v10363_v15 }
 0x6e7   :  { %v7638_v35 = vsub.f32 1.0, %v8852_v33  ;;  %v7647_v36 = vrot.slane %v8852_v33, %v10601_v53 }
 0x6e9   :  { %v7639_v19 = vmul.f32 %v7638_v35, %v7634_v34  ;;  %v7648_v38 = vcombine.high %v7647_v36, %v7647_v36  ;;  %v7651_v43 = vpack.c.bf16 %v7647_v36, %v7647_v36 }
 0x6eb   :  { %v7652_v44 = vpack.c.bf16 %v7648_v38, %v7648_v38  ;;  %v7655_v47 = vrot.slane %v7651_v43, 2  ;;  %v7676_v5 = vmul.f32 0.97, %v7639_v19 }
 0x6ed   :  { %v7656_v49 = vrot.slane %v7652_v44, 2  ;;  %7659 = vst [vmem:[#allocation5] sm:$0x40] %v7655_v47  ;;  %v7677_v39 = vadd.f32 %v7676_v5, %v7675_v63  ;;  %v7852_v63 = vld [vmem:[#allocation9 + $0x4] sm:$0x3] }
 0x6ee   :  { %v7853_v0 = vpack.c.bf16 %v7852_v63, %v7852_v63 }
 0x6ef   :  { %7660 = vst [vmem:[#allocation5 + $0x8] sm:$0x40] %v7656_v49  ;;  %vm7678_vm5 = vcmp.ge.f32.partialorder %v7677_v39, 1.25 }
 0x6f0   :  { %v8853_v41 = vsel %vm7678_vm5, 1.0, %v10363_v15  ;;  %7854 = vst [vmem:[%s10759_s5] sm:$0x1] %v7853_v0 }
 0x6f1   :  { %v7681_v42 = vsub.f32 1.0, %v8853_v41  ;;  %v7690_v21 = vrot.slane %v8853_v41, %v10601_v53 }
 0x6f3   :  { %v7682_v45 = vmul.f32 %v7681_v42, %v7677_v39  ;;  %v7691_v48 = vcombine.high %v7690_v21, %v7690_v21  ;;  %v7694_v50 = vpack.c.bf16 %v7690_v21, %v7690_v21 }
 0x6f5   :  { %v7695_v52 = vpack.c.bf16 %v7691_v48, %v7691_v48  ;;  %v7698_v54 = vrot.slane %v7694_v50, 1  ;;  %v7720_v55 = vmul.f32 0.97, %v7682_v45 }
 0x6f7   :  { %v7699_v57 = vrot.slane %v7695_v52, 1  ;;  %7702 = vst [vmem:[#allocation5] sm:$0x80] %v7698_v54  ;;  %v7721_v58 = vadd.f32 %v7720_v55, %v7719_v11  ;;  %v7858_v11 = vmul.f32 0.97, %v7850_v8 }
 0x6f9   :  { %7703 = vst [vmem:[#allocation5 + $0x8] sm:$0x80] %v7699_v57  ;;  %vm7722_vm6 = vcmp.ge.f32.partialorder %v7721_v58, 1.25 }
 0x6fa   :  { %v8854_v40 = vsel %vm7722_vm6, 1.0, %v10363_v15 }
 0x6fb   :  { %v7725_v59 = vsub.f32 1.0, %v8854_v40  ;;  %7729 = vst [vmem:[#allocation8 + $0x8] sm:$0xf] %v8854_v40 }
 0x6fd   :  { %v7726_v46 = vmul.f32 %v7725_v59, %v7721_v58 }
 0x6fe   :  { %v7740_v60 = vld [vmem:[#allocation5] sm:$0xff] }
 0x6ff   :  { %7728 = vst [vmem:[#allocation8 + $0x4] sm:$0xf] %v7726_v46  ;;  %8911 = vmatmul.mubr.bf16.vlgmr.msra.gmra.mrb[12].mxu1 %v7740_v60 }
 0x700   :  { %v7730_v53 = vld [vmem:[#allocation5 + $0x8] sm:$0xff] }
 0x701   :  { %v8855_v61 = vcombine.low %v7730_v53, %v7730_v53  ;;  %v8856_v62 = vcombine.high %v7730_v53, %v7730_v53 }
 0x703   :  { %7738 = vst [vmem:[%s10760_s6] sm:$0xf] %v8855_v61  ;;  %7739 = vst [vmem:[%s10760_s6 + $0x4] sm:$0xf] %v8856_v62 }
 0x7d2   :  { %v7839_v2 = vpop.f32.mrb[12].mxu1 }
 0x7d3   :  { %7846 = vst [vmem:[#allocation2] sm:$0xff] %v7839_v2  ;;  %v8912_v3 = vpop.f32.mrb[13].mxu1 }
 0x7d4   :  { %v7842_v6 = vpop.f32.mrb[14].mxu1 }
 0x7d5   :  { %7847 = vst [vmem:[#allocation2 + $0x20] sm:$0xff] %v7842_v6  ;;  %v8913_v7 = vpop.f32.mrb[15].mxu1 }
 0x7da   :  { %v7855_v12 = vld [vmem:[#allocation2] sm:$0x3]  ;;  %v7872_v37 = vld [vmem:[#allocation2] sm:$0xc]  ;;  %v7892_v18 = vld [vmem:[#allocation2] sm:$0x30] }
 0x7db   :  { %v7857_v13 = vadd.f32 %v7856_v9, %v7855_v12  ;;  %v7875_v16 = vrot.slane %v7872_v37, 2  ;;  %v7895_v25 = vrot.slane %v7892_v18, 4  ;;  %v7912_v26 = vld [vmem:[#allocation2] sm:$0xc0] }
 0x7dc   :  { %v7915_v29 = vrot.slane %v7912_v26, 6  ;;  %v7927_v33 = vld [vmem:[#allocation2 + $0x20] sm:$0x3]  ;;  %v7944_v35 = vld [vmem:[#allocation2 + $0x20] sm:$0xc] }
 0x7dd   :  { %v7859_v14 = vadd.f32 %v7858_v11, %v7857_v13  ;;  %v7873_v17 = vmul.f32 0.75, %v7857_v13  ;;  %v7947_v5 = vrot.slane %v7944_v35, 2  ;;  %v7964_v49 = vld [vmem:[#allocation2 + $0x20] sm:$0x30]  ;;  %v7984_v48 = vld [vmem:[#allocation2 + $0x20] sm:$0xc0] }
 0x7de   :  { %v7967_v45 = vrot.slane %v7964_v49, 4  ;;  %v7987_v58 = vrot.slane %v7984_v48, 6 }
 0x7df   :  { %vm7860_vm7 = vcmp.ge.f32.partialorder %v7859_v14, 1.25  ;;  %v7877_v20 = vadd.f32 %v7875_v16, %v7873_v17 }
 0x7e0   :  { %v8865_v4 = vsel %vm7860_vm7, 1.0, %v10363_v15 }
 0x7e1   :  { %v7863_v22 = vsub.f32 1.0, %v8865_v4  ;;  %v8879_v23 = vpack.c.bf16 %v8865_v4, %v8865_v4  ;;  %v7893_v24 = vmul.f32 0.75, %v7877_v20 }
 0x7e3   :  { %v7864_v27 = vmul.f32 %v7863_v22, %v7859_v14  ;;  %v7869_v51 = vrot.slane %v8879_v23, 7  ;;  %v7897_v56 = vadd.f32 %v7895_v25, %v7893_v24 }
 0x7e5   :  { %7871 = vst [vmem:[%s10759_s5] sm:$0x2] %v7869_v51  ;;  %v7878_v28 = vmul.f32 0.97, %v7864_v27  ;;  %v7913_v1 = vmul.f32 0.75, %v7897_v56 }
 0x7e7   :  { %v7879_v30 = vadd.f32 %v7878_v28, %v7877_v20  ;;  %v7917_v32 = vadd.f32 %v7915_v29, %v7913_v1 }
 0x7e9   :  { %vm7880_vm8 = vcmp.ge.f32.partialorder %v7879_v30, 1.25  ;;  %v7928_v10 = vmul.f32 0.75, %v7917_v32 }
 0x7ea   :  { %v8867_v34 = vsel %vm7880_vm8, 1.0, %v10363_v15 }
 0x7eb   :  { %v7883_v36 = vsub.f32 1.0, %v8867_v34  ;;  %v8880_v19 = vpack.c.bf16 %v8867_v34, %v8867_v34  ;;  %v7929_v38 = vadd.f32 %v7928_v10, %v7927_v33 }
 0x7ed   :  { %v7884_v43 = vmul.f32 %v7883_v36, %v7879_v30  ;;  %v7889_v44 = vrot.slane %v8880_v19, 6  ;;  %v7945_v47 = vmul.f32 0.75, %v7929_v38 }
 0x7ef   :  { %7891 = vst [vmem:[%s10759_s5] sm:$0x4] %v7889_v44  ;;  %v7898_v39 = vmul.f32 0.97, %v7884_v43  ;;  %v7949_v41 = vadd.f32 %v7947_v5, %v7945_v47 }
 0x7f1   :  { %v7899_v42 = vadd.f32 %v7898_v39, %v7897_v56  ;;  %v7965_v21 = vmul.f32 0.75, %v7949_v41 }
 0x7f3   :  { %vm7900_vm9 = vcmp.ge.f32.partialorder %v7899_v42, 1.25  ;;  %v7969_v50 = vadd.f32 %v7967_v45, %v7965_v21 }
 0x7f4   :  { %v8869_v52 = vsel %vm7900_vm9, 1.0, %v10363_v15 }
 0x7f5   :  { %v7903_v54 = vsub.f32 1.0, %v8869_v52  ;;  %v8881_v55 = vpack.c.bf16 %v8869_v52, %v8869_v52  ;;  %v7985_v57 = vmul.f32 0.75, %v7969_v50 }
 0x7f7   :  { %v7904_v40 = vmul.f32 %v7903_v54, %v7899_v42  ;;  %v7909_v59 = vrot.slane %v8881_v55, 5  ;;  %v7989_v46 = vadd.f32 %v7987_v58, %v7985_v57 }
 0x7f9   :  { %7911 = vst [vmem:[%s10759_s5] sm:$0x8] %v7909_v59  ;;  %v7918_v60 = vmul.f32 0.97, %v7904_v40  ;;  %7997 = vst [vmem:[#allocation9] sm:$0x3] %v7989_v46 }
 0x7fb   :  { %v7919_v53 = vadd.f32 %v7918_v60, %v7917_v32 }
 0x7fd   :  { %vm7920_vm10 = vcmp.ge.f32.partialorder %v7919_v53, 1.25 }
 0x7fe   :  { %v8871_v61 = vsel %vm7920_vm10, 1.0, %v10363_v15 }
 0x7ff   :  { %v7923_v62 = vsub.f32 1.0, %v8871_v61  ;;  %v7925_v63 = vpack.c.bf16 %v8871_v61, %v8871_v61 }
 0x801   :  { %v7924_v0 = vmul.f32 %v7923_v62, %v7919_v53  ;;  %7926 = vst [vmem:[%s10759_s5 + $0x4] sm:$0x1] %v7925_v63 }
 0x803   :  { %v7930_v2 = vmul.f32 0.97, %v7924_v0 }
 0x805   :  { %v7931_v3 = vadd.f32 %v7930_v2, %v7929_v38 }
 0x807   :  { %vm7932_vm11 = vcmp.ge.f32.partialorder %v7931_v3, 1.25 }
 0x808   :  { %v8872_v31 = vsel %vm7932_vm11, 1.0, %v10363_v15 }
 0x809   :  { %v7935_v6 = vsub.f32 1.0, %v8872_v31  ;;  %v8882_v7 = vpack.c.bf16 %v8872_v31, %v8872_v31 }
 0x80b   :  { %v7936_v8 = vmul.f32 %v7935_v6, %v7931_v3  ;;  %v7941_v9 = vrot.slane %v8882_v7, 7 }
 0x80d   :  { %7943 = vst [vmem:[%s10759_s5 + $0x4] sm:$0x2] %v7941_v9  ;;  %v7950_v11 = vmul.f32 0.97, %v7936_v8 }
 0x80f   :  { %v7951_v12 = vadd.f32 %v7950_v11, %v7949_v41 }
 0x811   :  { %vm7952_vm12 = vcmp.ge.f32.partialorder %v7951_v12, 1.25 }
 0x812   :  { %v8874_v37 = vsel %vm7952_vm12, 1.0, %v10363_v15 }
 0x813   :  { %v7955_v13 = vsub.f32 1.0, %v8874_v37  ;;  %v8883_v14 = vpack.c.bf16 %v8874_v37, %v8874_v37 }
 0x815   :  { %v7956_v16 = vmul.f32 %v7955_v13, %v7951_v12  ;;  %v7961_v17 = vrot.slane %v8883_v14, 6 }
 0x817   :  { %7963 = vst [vmem:[%s10759_s5 + $0x4] sm:$0x4] %v7961_v17  ;;  %v7970_v18 = vmul.f32 0.97, %v7956_v16 }
 0x819   :  { %v7971_v20 = vadd.f32 %v7970_v18, %v7969_v50 }
 0x81b   :  { %vm7972_vm13 = vcmp.ge.f32.partialorder %v7971_v20, 1.25 }
 0x81c   :  { %v8876_v4 = vsel %vm7972_vm13, 1.0, %v10363_v15 }
 0x81d   :  { %v7975_v22 = vsub.f32 1.0, %v8876_v4  ;;  %v8884_v23 = vpack.c.bf16 %v8876_v4, %v8876_v4 }
 0x81f   :  { %v7976_v24 = vmul.f32 %v7975_v22, %v7971_v20  ;;  %v7981_v25 = vrot.slane %v8884_v23, 5 }
 0x821   :  { %7983 = vst [vmem:[%s10759_s5 + $0x4] sm:$0x8] %v7981_v25  ;;  %v7990_v26 = vmul.f32 0.97, %v7976_v24 }
 0x823   :  { %v7991_v27 = vadd.f32 %v7990_v26, %v7989_v46 }
 0x825   :  { %vm7992_vm14 = vcmp.ge.f32.partialorder %v7991_v27, 1.25 }
 0x826   :  { %v8878_v51 = vsel %vm7992_vm14, 1.0, %v10363_v15 }
 0x827   :  { %v7995_v56 = vsub.f32 1.0, %v8878_v51  ;;  %7999 = vst [vmem:[#allocation9 + $0x4] sm:$0x3] %v8878_v51 }
 0x829   :  { %v7996_v28 = vmul.f32 %v7995_v56, %v7991_v27 }
 0x82b   :  { %7998 = vst [vmem:[#allocation9 + $0x2] sm:$0x3] %v7996_v28 }
 0x82c   :  { %8008 = vsyncpa [#allocation11], 1 }
 0x82d   :  { %8009 = vsyncpa [#allocation13], 1 }
 0x82e   :  { %8010 = vsyncpa [#allocation16], 1 }

</bundles_post_ra>
